<compile_context>
chip_gen: v7x
topology: tpu7x:2x2x1
jax: 0.10.0
libtpu: 0.0.40
codegen_flags: <defaults>
</compile_context>

<pallas_src>
import functools

import numpy as np
import jax
import jax.numpy as jnp
from jax.experimental import pallas as pl
from jax.experimental.pallas import tpu as pltpu


# ----------------------------------------------------------------------------
# Fused kernel: v-projection -> neighborhood aggregation -> output projection
# ----------------------------------------------------------------------------
def _fused_sna_kernel(attn_ref, x_ref, vw_ref, vb_ref, pw_ref, pb_ref, e_ref,
                      out_ref, vbuf_ref, acc_ref, *, W, C, K, nH, TH):
    # attn_ref: (TH*W, K*K*nH) per-pixel attention, taps-major / heads-minor
    # x_ref:    ((H+2*half)*W, C) full (row-padded) image, resident per batch
    # vw_ref/pw_ref: (C, C), vb_ref/pb_ref: (1, C), e_ref: (nH, C) one-hot
    # out_ref:  (TH*W, C)
    # vbuf_ref: (TH+2*half, W, C) f32 scratch (projected values incl. halo)
    # acc_ref:  (TH, W, C) f32 scratch (aggregation accumulator)
    half = K // 2
    RS = TH + 2 * half            # halo-extended source rows for this tile
    Wi = W - 2 * half             # interior output columns
    t = pl.program_id(1)
    nt = pl.num_programs(1)

    # ---- fused v = x @ Wv + bv over the tile's halo-extended window (MXU) ----
    r0 = pl.multiple_of(t * (TH * W), 8)
    xw = x_ref[pl.ds(r0, RS * W), :]                                  # (RS*W, C)
    v = jnp.dot(xw, vw_ref[...], preferred_element_type=jnp.float32)
    vbuf_ref[...] = (v + vb_ref[...]).reshape(RS, W, C)
    # TODO(synk): on v6e/v7x keep vbuf in bf16 (f32 accumulate) to halve VMEM/BW.

    acc_ref[...] = jnp.zeros_like(acc_ref)

    attn = attn_ref[...].astype(jnp.float32)                          # (TH*W, KK*nH)
    e = e_ref[...]                                                    # (nH, C)

    def expand(a_cols, rows):
        # (rows*W, nH) per-pixel/per-head weights -> (rows, W, C), heads on lanes.
        wk = jnp.dot(a_cols, e, preferred_element_type=jnp.float32)
        return wk.reshape(rows, W, C)

    # ---- main pass: every output row treated with the row-interior formula ----
    # (global border rows live only in the first / last tile and are overwritten
    #  by the strip corrections below).
    # TODO(synk): for large K switch the kj loop to lax.fori_loop to bound code size.
    for ki in range(K):
        for kj in range(K):
            k = ki * K + kj
            w_k = expand(attn[:, k * nH:(k + 1) * nH], TH)            # (TH, W, C)
            # interior columns: src col = j - half + kj
            acc_ref[:, half:W - half, :] += (
                w_k[:, half:W - half, :] * vbuf_ref[ki:ki + TH, kj:kj + Wi, :])
            # left clamped columns: src col = kj
            acc_ref[:, 0:half, :] += (
                w_k[:, 0:half, :] * vbuf_ref[ki:ki + TH, kj:kj + 1, :])
            # right clamped columns: src col = W - K + kj
            acc_ref[:, W - half:W, :] += (
                w_k[:, W - half:W, :]
                * vbuf_ref[ki:ki + TH, W - K + kj:W - K + kj + 1, :])

    # ---- row-clamped border strips (only the first / last row tile) ----
    def strip_fix(p0, a_strip, q_of_ki):
        acc_ref[p0:p0 + half] = jnp.zeros((half, W, C), jnp.float32)
        for ki in range(K):
            vrow = vbuf_ref[q_of_ki(ki)]                              # (W, C)
            for kj in range(K):
                k = ki * K + kj
                w_s = expand(a_strip[:, k * nH:(k + 1) * nH], half)   # (half, W, C)
                acc_ref[p0:p0 + half, half:W - half, :] += (
                    w_s[:, half:W - half, :] * vrow[kj:kj + Wi, :][None])
                acc_ref[p0:p0 + half, 0:half, :] += (
                    w_s[:, 0:half, :] * vrow[kj:kj + 1, :][None])
                acc_ref[p0:p0 + half, W - half:W, :] += (
                    w_s[:, W - half:W, :] * vrow[W - K + kj:W - K + kj + 1, :][None])

    @pl.when(t == 0)
    def _top():      # global rows [0, half): src row = ki -> vbuf row ki + half
        strip_fix(0, attn[0:half * W, :], lambda ki: half + ki)

    @pl.when(t == nt - 1)
    def _bottom():   # global rows [H-half, H): src row = H-K+ki -> TH-half-1+ki
        strip_fix(TH - half, attn[(TH - half) * W:TH * W, :],
                  lambda ki: TH - half - 1 + ki)

    # ---- fused output projection (MXU) ----
    y = jnp.dot(acc_ref[...].reshape(TH * W, C), pw_ref[...],
                preferred_element_type=jnp.float32) + pb_ref[...]
    out_ref[...] = y.astype(out_ref.dtype)


def _build_head_expand(num_heads, head_dim):
    """(nH, C) one-hot: head h -> its head_dim channel lanes."""
    C = num_heads * head_dim
    e = np.zeros((num_heads, C), np.float32)
    for h in range(num_heads):
        e[h, h * head_dim:(h + 1) * head_dim] = 1.0
    return jnp.asarray(e)


def _pick_row_tile(H, W, C, K, budget_bytes=6 * 1024 * 1024):
    """Largest divisor of H (>= K) whose per-tile f32 working set fits budget."""
    divs = [d for d in range(K, H + 1) if H % d == 0]
    if not divs:
        return H

    def per_tile_bytes(th):
        rs = th + 2 * (K // 2)
        return 4 * (rs * W * C + 2 * th * W * C + th * W * K * K)

    for d in reversed(divs):
        if per_tile_bytes(d) <= budget_bytes:
            return d
    return divs[0]


# ----------------------------------------------------------------------------
# Module forward (all hot work inside one fused Pallas kernel)
# ----------------------------------------------------------------------------
def neigh_superpixel_agg_forward(x, attn, params, *, num_heads, kernel_size,
                                 row_tile=None):
    """Mirrors NeighSuperpixelAgg.forward (dropouts are identity at p=0)."""
    B, Hp, Wp, C = x.shape
    K = kernel_size
    assert K >= 3 and K % 2 == 1
    assert C % num_heads == 0
    half = K // 2
    window = K            # dilation == 1

    # Module's small-input pad (right / bottom up to the window size).
    H, W = Hp, Wp
    pad_r = max(0, window - W)
    pad_b = max(0, window - H)
    if pad_r or pad_b:
        x = jnp.pad(x, ((0, 0), (0, pad_b), (0, pad_r), (0, 0)))
        H, W = x.shape[1], x.shape[2]
    assert attn.shape == (B, num_heads, H, W, K * K), \
        "attn must be computed on the (padded) H x W grid"
    # TODO(synk): general W needs column padding or per-row projection matmuls.
    assert W % 8 == 0, "W must be a multiple of 8"

    if row_tile is None:
        row_tile = _pick_row_tile(H, W, C, K)
    assert H % row_tile == 0 and row_tile >= K
    nt = H // row_tile
    RS = row_tile + 2 * half
    KKnH = K * K * num_heads

    # Halo row pad (zeros); padded rows are never read for valid products.
    xpad = jnp.pad(x, ((0, 0), (half, half), (0, 0), (0, 0)))
    x2d = xpad.reshape(B, (H + 2 * half) * W, C)

    # attn: (B, nH, H, W, KK) -> per-pixel rows, taps-major / heads-minor cols.
    # TODO(synk): this transpose is one extra HBM round trip over attn; fold it
    #             into the attn producer if it shows up in profiles.
    attn2d = attn.transpose(0, 2, 3, 4, 1).reshape(B, H * W, KKnH)

    e_head = _build_head_expand(num_heads, C // num_heads)
    vb = params["v_b"].reshape(1, C)
    pb = params["proj_b"].reshape(1, C)

    kernel = functools.partial(_fused_sna_kernel, W=W, C=C, K=K,
                               nH=num_heads, TH=row_tile)
    out = pl.pallas_call(
        kernel,
        out_shape=jax.ShapeDtypeStruct((B, H * W, C), x.dtype),
        grid=(B, nt),
        in_specs=[
            pl.BlockSpec((None, row_tile * W, KKnH), lambda b, t: (b, t, 0)),
            pl.BlockSpec((None, (H + 2 * half) * W, C), lambda b, t: (b, 0, 0)),
            pl.BlockSpec((C, C), lambda b, t: (0, 0)),
            pl.BlockSpec((1, C), lambda b, t: (0, 0)),
            pl.BlockSpec((C, C), lambda b, t: (0, 0)),
            pl.BlockSpec((1, C), lambda b, t: (0, 0)),
            pl.BlockSpec((num_heads, C), lambda b, t: (0, 0)),
        ],
        out_specs=pl.BlockSpec((None, row_tile * W, C), lambda b, t: (b, t, 0)),
        scratch_shapes=[
            pltpu.VMEM((RS, W, C), jnp.float32),
            pltpu.VMEM((row_tile, W, C), jnp.float32),
        ],
        compiler_params=pltpu.CompilerParams(
            dimension_semantics=("parallel", "parallel"),
            vmem_limit_bytes=48 * 1024 * 1024,
        ),
    )(attn2d, x2d, params["v_w"], vb, params["proj_w"], pb, e_head)

    y = out.reshape(B, H, W, C)
    if pad_r or pad_b:
        y = y[:, :Hp, :Wp, :]
    return y


# ----------------------------------------------------------------------------
# Pure numpy reference (for correctness verification)
# ----------------------------------------------------------------------------
def reference_forward(x, attn, params, *, num_heads, kernel_size):
    x = np.asarray(x, np.float64)
    attn = np.asarray(attn, np.float64)
    vw = np.asarray(params["v_w"], np.float64)
    vb = np.asarray(params["v_b"], np.float64)
    pw = np.asarray(params["proj_w"], np.float64)
    pb = np.asarray(params["proj_b"], np.float64)

    B, H, W, C = x.shape
    hd = C // num_heads
    K = kernel_size
    half = K // 2

    v = x.reshape(-1, C) @ vw + vb
    v = v.reshape(B, H, W, num_heads, hd).transpose(0, 3, 1, 2, 4)
    out = np.zeros_like(v)
    for b in range(B):
        for h in range(num_heads):
            for i in range(H):
                si = min(max(i - half, 0), H - K)
                for j in range(W):
                    sj = min(max(j - half, 0), W - K)
                    for ki in range(K):
                        for kj in range(K):
                            out[b, h, i, j] += (
                                attn[b, h, i, j, ki * K + kj]
                                * v[b, h, si + ki, sj + kj])
    y = out.transpose(0, 2, 3, 1, 4).reshape(B, H, W, C)
    y = y.reshape(-1, C) @ pw + pb
    return y.reshape(B, H, W, C)


# ----------------------------------------------------------------------------
# Main
# ----------------------------------------------------------------------------
if __name__ == "__main__":
    B, H, W, C = 2, 12, 8, 128
    num_heads = 4
    kernel_size = 3
    row_tile = 4          # 3 row tiles/image: exercises top / middle / bottom paths

    key = jax.random.PRNGKey(0)
    k_x, k_a, k_vw, k_vb, k_pw, k_pb = jax.random.split(key, 6)

    x = jax.random.normal(k_x, (B, H, W, C), jnp.float32)
    attn_logits = jax.random.normal(
        k_a, (B, num_heads, H, W, kernel_size * kernel_size), jnp.float32)
    attn = jax.nn.softmax(attn_logits, axis=-1)

    # Deterministic synthetic parameters (nn.Linear weights stored as (Cin, Cout)).
    params = {
        "v_w": 0.05 * jax.random.normal(k_vw, (C, C), jnp.float32),
        "v_b": 0.05 * jax.random.normal(k_vb, (C,), jnp.float32),
        "proj_w": 0.05 * jax.random.normal(k_pw, (C, C), jnp.float32),
        "proj_b": 0.05 * jax.random.normal(k_pb, (C,), jnp.float32),
    }

    fwd = jax.jit(functools.partial(
        neigh_superpixel_agg_forward, num_heads=num_heads,
        kernel_size=kernel_size, row_tile=row_tile))
    y = fwd(x, attn, params)
    y = jax.block_until_ready(y)

    y_ref = reference_forward(x, attn, params, num_heads=num_heads,
                              kernel_size=kernel_size)
    np.testing.assert_allclose(np.asarray(y, np.float64), y_ref,
                               rtol=2e-4, atol=2e-4)

    print("KERNEL_OK")
</pallas_src>

<mosaic_0001>
module attributes {stable_mosaic.version = 11 : i64} {
  func.func @_fused_sna_kernel(%arg0: i32, %arg1: i32, %arg2: memref<1x32x36xf32, #tpu.memory_space<vmem>>, %arg3: memref<1x112x128xf32, #tpu.memory_space<vmem>>, %arg4: memref<128x128xf32, #tpu.memory_space<vmem>>, %arg5: memref<1x128xf32, #tpu.memory_space<vmem>>, %arg6: memref<128x128xf32, #tpu.memory_space<vmem>>, %arg7: memref<1x128xf32, #tpu.memory_space<vmem>>, %arg8: memref<4x128xf32, #tpu.memory_space<vmem>>, %arg9: memref<1x32x128xf32, #tpu.memory_space<vmem>>, %arg10: memref<6x8x128xf32, #tpu.memory_space<vmem>>, %arg11: memref<4x8x128xf32, #tpu.memory_space<vmem>>) attributes {dimension_semantics = [#tpu.dimension_semantics<parallel>, #tpu.dimension_semantics<parallel>], iteration_bounds = array<i64: 2, 3>, scalar_prefetch = 0 : i64, scratch_operands = 2 : i64, tpu.core_type = #tpu.core_type<tc>, window_params = [{transform_indices = @transform_0, window_bounds = array<i64: 1, 32, 36>}, {transform_indices = @transform_1, window_bounds = array<i64: 1, 112, 128>}, {pipeline_mode = #tpu.pipeline_mode<synchronous>, transform_indices = @transform_2, window_bounds = array<i64: 128, 128>}, {pipeline_mode = #tpu.pipeline_mode<synchronous>, transform_indices = @transform_3, window_bounds = array<i64: 1, 128>}, {pipeline_mode = #tpu.pipeline_mode<synchronous>, transform_indices = @transform_4, window_bounds = array<i64: 128, 128>}, {pipeline_mode = #tpu.pipeline_mode<synchronous>, transform_indices = @transform_5, window_bounds = array<i64: 1, 128>}, {pipeline_mode = #tpu.pipeline_mode<synchronous>, transform_indices = @transform_6, window_bounds = array<i64: 4, 128>}, {transform_indices = @transform_7, window_bounds = array<i64: 1, 32, 128>}]} {
    %c32_i32 = arith.constant 32 : i32
    %0 = arith.muli %arg1, %c32_i32 : i32
    %1 = tpu.assume_multiple %0, 8 : i32
    %c0 = arith.constant 0 : index
    %2 = arith.index_cast %1 : i32 to index
    %c0_0 = arith.constant 0 : index
    %3 = vector.load %arg3[%c0, %2, %c0_0] : memref<1x112x128xf32, #tpu.memory_space<vmem>>, vector<1x48x128xf32>
    %4 = vector.shape_cast %3 : vector<1x48x128xf32> to vector<48x128xf32>
    %c0_1 = arith.constant 0 : index
    %c0_2 = arith.constant 0 : index
    %5 = vector.load %arg4[%c0_1, %c0_2] : memref<128x128xf32, #tpu.memory_space<vmem>>, vector<128x128xf32>
    %cst = arith.constant dense<0.000000e+00> : vector<48x128xf32>
    %6 = tpu.matmul %4, %5, %cst {dimension_numbers = #tpu.dot_dimension_numbers<[1], [0], [0], [1], [0, 0, 1, 1], [], []>} : vector<48x128xf32>, vector<128x128xf32>, vector<48x128xf32> -> vector<48x128xf32>
    %c0_3 = arith.constant 0 : index
    %c0_4 = arith.constant 0 : index
    %7 = vector.load %arg5[%c0_3, %c0_4] : memref<1x128xf32, #tpu.memory_space<vmem>>, vector<1x128xf32>
    %8 = vector.broadcast %7 : vector<1x128xf32> to vector<48x128xf32>
    %9 = arith.addf %6, %8 : vector<48x128xf32>
    %10 = vector.shape_cast %9 : vector<48x128xf32> to vector<6x8x128xf32>
    %c0_5 = arith.constant 0 : index
    %c0_6 = arith.constant 0 : index
    %c0_7 = arith.constant 0 : index
    %11 = vector.load %arg10[%c0_5, %c0_6, %c0_7] : memref<6x8x128xf32, #tpu.memory_space<vmem>>, vector<6x8x128xf32>
    tpu.vector_store %arg10[%c0_5, %c0_6, %c0_7], %10 {strides = array<i32>} : memref<6x8x128xf32, #tpu.memory_space<vmem>>, vector<6x8x128xf32>,
    %cst_8 = arith.constant 0.000000e+00 : f32
    %12 = vector.broadcast %cst_8 : f32 to vector<4x8x128xf32>
    %c0_9 = arith.constant 0 : index
    %c0_10 = arith.constant 0 : index
    %c0_11 = arith.constant 0 : index
    %13 = vector.load %arg11[%c0_9, %c0_10, %c0_11] : memref<4x8x128xf32, #tpu.memory_space<vmem>>, vector<4x8x128xf32>
    tpu.vector_store %arg11[%c0_9, %c0_10, %c0_11], %12 {strides = array<i32>} : memref<4x8x128xf32, #tpu.memory_space<vmem>>, vector<4x8x128xf32>,
    %c0_12 = arith.constant 0 : index
    %c0_13 = arith.constant 0 : index
    %c0_14 = arith.constant 0 : index
    %14 = vector.load %arg2[%c0_12, %c0_13, %c0_14] : memref<1x32x36xf32, #tpu.memory_space<vmem>>, vector<1x32x36xf32>
    %15 = vector.shape_cast %14 : vector<1x32x36xf32> to vector<32x36xf32>
    %c0_15 = arith.constant 0 : index
    %c0_16 = arith.constant 0 : index
    %16 = vector.load %arg8[%c0_15, %c0_16] : memref<4x128xf32, #tpu.memory_space<vmem>>, vector<4x128xf32>
    %17 = vector.extract_strided_slice %15 {offsets = [0, 0], sizes = [32, 4], strides = [1, 1]} : vector<32x36xf32> to vector<32x4xf32>
    %cst_17 = arith.constant dense<0.000000e+00> : vector<32x128xf32>
    %18 = tpu.matmul %17, %16, %cst_17 {dimension_numbers = #tpu.dot_dimension_numbers<[1], [0], [0], [1], [0, 0, 1, 1], [], []>} : vector<32x4xf32>, vector<4x128xf32>, vector<32x128xf32> -> vector<32x128xf32>
    %19 = vector.shape_cast %18 : vector<32x128xf32> to vector<4x8x128xf32>
    %c0_18 = arith.constant 0 : index
    %c1 = arith.constant 1 : index
    %c0_19 = arith.constant 0 : index
    %20 = vector.load %arg11[%c0_18, %c1, %c0_19] : memref<4x8x128xf32, #tpu.memory_space<vmem>>, vector<4x6x128xf32>
    %21 = vector.extract_strided_slice %19 {offsets = [0, 1, 0], sizes = [4, 6, 128], strides = [1, 1, 1]} : vector<4x8x128xf32> to vector<4x6x128xf32>
    %c0_20 = arith.constant 0 : index
    %c0_21 = arith.constant 0 : index
    %c0_22 = arith.constant 0 : index
    %22 = vector.load %arg10[%c0_20, %c0_21, %c0_22] : memref<6x8x128xf32, #tpu.memory_space<vmem>>, vector<4x6x128xf32>
    %23 = arith.mulf %21, %22 : vector<4x6x128xf32>
    %24 = arith.addf %20, %23 : vector<4x6x128xf32>
    %c0_23 = arith.constant 0 : index
    %c1_24 = arith.constant 1 : index
    %c0_25 = arith.constant 0 : index
    %25 = vector.load %arg11[%c0_23, %c1_24, %c0_25] : memref<4x8x128xf32, #tpu.memory_space<vmem>>, vector<4x6x128xf32>
    tpu.vector_store %arg11[%c0_23, %c1_24, %c0_25], %24 {strides = array<i32>} : memref<4x8x128xf32, #tpu.memory_space<vmem>>, vector<4x6x128xf32>,
    %c0_26 = arith.constant 0 : index
    %c0_27 = arith.constant 0 : index
    %c0_28 = arith.constant 0 : index
    %26 = vector.load %arg11[%c0_26, %c0_27, %c0_28] : memref<4x8x128xf32, #tpu.memory_space<vmem>>, vector<4x1x128xf32>
    %27 = vector.extract_strided_slice %19 {offsets = [0, 0, 0], sizes = [4, 1, 128], strides = [1, 1, 1]} : vector<4x8x128xf32> to vector<4x1x128xf32>
    %c0_29 = arith.constant 0 : index
    %c0_30 = arith.constant 0 : index
    %c0_31 = arith.constant 0 : index
    %28 = vector.load %arg10[%c0_29, %c0_30, %c0_31] : memref<6x8x128xf32, #tpu.memory_space<vmem>>, vector<4x1x128xf32>
    %29 = arith.mulf %27, %28 : vector<4x1x128xf32>
    %30 = arith.addf %26, %29 : vector<4x1x128xf32>
    %c0_32 = arith.constant 0 : index
    %c0_33 = arith.constant 0 : index
    %c0_34 = arith.constant 0 : index
    %31 = vector.load %arg11[%c0_32, %c0_33, %c0_34] : memref<4x8x128xf32, #tpu.memory_space<vmem>>, vector<4x1x128xf32>
    tpu.vector_store %arg11[%c0_32, %c0_33, %c0_34], %30 {strides = array<i32>} : memref<4x8x128xf32, #tpu.memory_space<vmem>>, vector<4x1x128xf32>,
    %c0_35 = arith.constant 0 : index
    %c7 = arith.constant 7 : index
    %c0_36 = arith.constant 0 : index
    %32 = vector.load %arg11[%c0_35, %c7, %c0_36] : memref<4x8x128xf32, #tpu.memory_space<vmem>>, vector<4x1x128xf32>
    %33 = vector.extract_strided_slice %19 {offsets = [0, 7, 0], sizes = [4, 1, 128], strides = [1, 1, 1]} : vector<4x8x128xf32> to vector<4x1x128xf32>
    %c0_37 = arith.constant 0 : index
    %c5 = arith.constant 5 : index
    %c0_38 = arith.constant 0 : index
    %34 = vector.load %arg10[%c0_37, %c5, %c0_38] : memref<6x8x128xf32, #tpu.memory_space<vmem>>, vector<4x1x128xf32>
    %35 = arith.mulf %33, %34 : vector<4x1x128xf32>
    %36 = arith.addf %32, %35 : vector<4x1x128xf32>
    %c0_39 = arith.constant 0 : index
    %c7_40 = arith.constant 7 : index
    %c0_41 = arith.constant 0 : index
    %37 = vector.load %arg11[%c0_39, %c7_40, %c0_41] : memref<4x8x128xf32, #tpu.memory_space<vmem>>, vector<4x1x128xf32>
    tpu.vector_store %arg11[%c0_39, %c7_40, %c0_41], %36 {strides = array<i32>} : memref<4x8x128xf32, #tpu.memory_space<vmem>>, vector<4x1x128xf32>,
    %38 = vector.extract_strided_slice %15 {offsets = [0, 4], sizes = [32, 4], strides = [1, 1]} : vector<32x36xf32> to vector<32x4xf32>
    %cst_42 = arith.constant dense<0.000000e+00> : vector<32x128xf32>
    %39 = tpu.matmul %38, %16, %cst_42 {dimension_numbers = #tpu.dot_dimension_numbers<[1], [0], [0], [1], [0, 0, 1, 1], [], []>} : vector<32x4xf32>, vector<4x128xf32>, vector<32x128xf32> -> vector<32x128xf32>
    %40 = vector.shape_cast %39 : vector<32x128xf32> to vector<4x8x128xf32>
    %c0_43 = arith.constant 0 : index
    %c1_44 = arith.constant 1 : index
    %c0_45 = arith.constant 0 : index
    %41 = vector.load %arg11[%c0_43, %c1_44, %c0_45] : memref<4x8x128xf32, #tpu.memory_space<vmem>>, vector<4x6x128xf32>
    %42 = vector.extract_strided_slice %40 {offsets = [0, 1, 0], sizes = [4, 6, 128], strides = [1, 1, 1]} : vector<4x8x128xf32> to vector<4x6x128xf32>
    %c0_46 = arith.constant 0 : index
    %c1_47 = arith.constant 1 : index
    %c0_48 = arith.constant 0 : index
    %43 = vector.load %arg10[%c0_46, %c1_47, %c0_48] : memref<6x8x128xf32, #tpu.memory_space<vmem>>, vector<4x6x128xf32>
    %44 = arith.mulf %42, %43 : vector<4x6x128xf32>
    %45 = arith.addf %41, %44 : vector<4x6x128xf32>
    %c0_49 = arith.constant 0 : index
    %c1_50 = arith.constant 1 : index
    %c0_51 = arith.constant 0 : index
    %46 = vector.load %arg11[%c0_49, %c1_50, %c0_51] : memref<4x8x128xf32, #tpu.memory_space<vmem>>, vector<4x6x128xf32>
    tpu.vector_store %arg11[%c0_49, %c1_50, %c0_51], %45 {strides = array<i32>} : memref<4x8x128xf32, #tpu.memory_space<vmem>>, vector<4x6x128xf32>,
    %c0_52 = arith.constant 0 : index
    %c0_53 = arith.constant 0 : index
    %c0_54 = arith.constant 0 : index
    %47 = vector.load %arg11[%c0_52, %c0_53, %c0_54] : memref<4x8x128xf32, #tpu.memory_space<vmem>>, vector<4x1x128xf32>
    %48 = vector.extract_strided_slice %40 {offsets = [0, 0, 0], sizes = [4, 1, 128], strides = [1, 1, 1]} : vector<4x8x128xf32> to vector<4x1x128xf32>
    %c0_55 = arith.constant 0 : index
    %c1_56 = arith.constant 1 : index
    %c0_57 = arith.constant 0 : index
    %49 = vector.load %arg10[%c0_55, %c1_56, %c0_57] : memref<6x8x128xf32, #tpu.memory_space<vmem>>, vector<4x1x128xf32>
    %50 = arith.mulf %48, %49 : vector<4x1x128xf32>
    %51 = arith.addf %47, %50 : vector<4x1x128xf32>
    %c0_58 = arith.constant 0 : index
    %c0_59 = arith.constant 0 : index
    %c0_60 = arith.constant 0 : index
    %52 = vector.load %arg11[%c0_58, %c0_59, %c0_60] : memref<4x8x128xf32, #tpu.memory_space<vmem>>, vector<4x1x128xf32>
    tpu.vector_store %arg11[%c0_58, %c0_59, %c0_60], %51 {strides = array<i32>} : memref<4x8x128xf32, #tpu.memory_space<vmem>>, vector<4x1x128xf32>,
    %c0_61 = arith.constant 0 : index
    %c7_62 = arith.constant 7 : index
    %c0_63 = arith.constant 0 : index
    %53 = vector.load %arg11[%c0_61, %c7_62, %c0_63] : memref<4x8x128xf32, #tpu.memory_space<vmem>>, vector<4x1x128xf32>
    %54 = vector.extract_strided_slice %40 {offsets = [0, 7, 0], sizes = [4, 1, 128], strides = [1, 1, 1]} : vector<4x8x128xf32> to vector<4x1x128xf32>
    %c0_64 = arith.constant 0 : index
    %c6 = arith.constant 6 : index
    %c0_65 = arith.constant 0 : index
    %55 = vector.load %arg10[%c0_64, %c6, %c0_65] : memref<6x8x128xf32, #tpu.memory_space<vmem>>, vector<4x1x128xf32>
    %56 = arith.mulf %54, %55 : vector<4x1x128xf32>
    %57 = arith.addf %53, %56 : vector<4x1x128xf32>
    %c0_66 = arith.constant 0 : index
    %c7_67 = arith.constant 7 : index
    %c0_68 = arith.constant 0 : index
    %58 = vector.load %arg11[%c0_66, %c7_67, %c0_68] : memref<4x8x128xf32, #tpu.memory_space<vmem>>, vector<4x1x128xf32>
    tpu.vector_store %arg11[%c0_66, %c7_67, %c0_68], %57 {strides = array<i32>} : memref<4x8x128xf32, #tpu.memory_space<vmem>>, vector<4x1x128xf32>,
    %59 = vector.extract_strided_slice %15 {offsets = [0, 8], sizes = [32, 4], strides = [1, 1]} : vector<32x36xf32> to vector<32x4xf32>
    %cst_69 = arith.constant dense<0.000000e+00> : vector<32x128xf32>
    %60 = tpu.matmul %59, %16, %cst_69 {dimension_numbers = #tpu.dot_dimension_numbers<[1], [0], [0], [1], [0, 0, 1, 1], [], []>} : vector<32x4xf32>, vector<4x128xf32>, vector<32x128xf32> -> vector<32x128xf32>
    %61 = vector.shape_cast %60 : vector<32x128xf32> to vector<4x8x128xf32>
    %c0_70 = arith.constant 0 : index
    %c1_71 = arith.constant 1 : index
    %c0_72 = arith.constant 0 : index
    %62 = vector.load %arg11[%c0_70, %c1_71, %c0_72] : memref<4x8x128xf32, #tpu.memory_space<vmem>>, vector<4x6x128xf32>
    %63 = vector.extract_strided_slice %61 {offsets = [0, 1, 0], sizes = [4, 6, 128], strides = [1, 1, 1]} : vector<4x8x128xf32> to vector<4x6x128xf32>
    %c0_73 = arith.constant 0 : index
    %c2 = arith.constant 2 : index
    %c0_74 = arith.constant 0 : index
    %64 = vector.load %arg10[%c0_73, %c2, %c0_74] : memref<6x8x128xf32, #tpu.memory_space<vmem>>, vector<4x6x128xf32>
    %65 = arith.mulf %63, %64 : vector<4x6x128xf32>
    %66 = arith.addf %62, %65 : vector<4x6x128xf32>
    %c0_75 = arith.constant 0 : index
    %c1_76 = arith.constant 1 : index
    %c0_77 = arith.constant 0 : index
    %67 = vector.load %arg11[%c0_75, %c1_76, %c0_77] : memref<4x8x128xf32, #tpu.memory_space<vmem>>, vector<4x6x128xf32>
    tpu.vector_store %arg11[%c0_75, %c1_76, %c0_77], %66 {strides = array<i32>} : memref<4x8x128xf32, #tpu.memory_space<vmem>>, vector<4x6x128xf32>,
    %c0_78 = arith.constant 0 : index
    %c0_79 = arith.constant 0 : index
    %c0_80 = arith.constant 0 : index
    %68 = vector.load %arg11[%c0_78, %c0_79, %c0_80] : memref<4x8x128xf32, #tpu.memory_space<vmem>>, vector<4x1x128xf32>
    %69 = vector.extract_strided_slice %61 {offsets = [0, 0, 0], sizes = [4, 1, 128], strides = [1, 1, 1]} : vector<4x8x128xf32> to vector<4x1x128xf32>
    %c0_81 = arith.constant 0 : index
    %c2_82 = arith.constant 2 : index
    %c0_83 = arith.constant 0 : index
    %70 = vector.load %arg10[%c0_81, %c2_82, %c0_83] : memref<6x8x128xf32, #tpu.memory_space<vmem>>, vector<4x1x128xf32>
    %71 = arith.mulf %69, %70 : vector<4x1x128xf32>
    %72 = arith.addf %68, %71 : vector<4x1x128xf32>
    %c0_84 = arith.constant 0 : index
    %c0_85 = arith.constant 0 : index
    %c0_86 = arith.constant 0 : index
    %73 = vector.load %arg11[%c0_84, %c0_85, %c0_86] : memref<4x8x128xf32, #tpu.memory_space<vmem>>, vector<4x1x128xf32>
    tpu.vector_store %arg11[%c0_84, %c0_85, %c0_86], %72 {strides = array<i32>} : memref<4x8x128xf32, #tpu.memory_space<vmem>>, vector<4x1x128xf32>,
    %c0_87 = arith.constant 0 : index
    %c7_88 = arith.constant 7 : index
    %c0_89 = arith.constant 0 : index
    %74 = vector.load %arg11[%c0_87, %c7_88, %c0_89] : memref<4x8x128xf32, #tpu.memory_space<vmem>>, vector<4x1x128xf32>
    %75 = vector.extract_strided_slice %61 {offsets = [0, 7, 0], sizes = [4, 1, 128], strides = [1, 1, 1]} : vector<4x8x128xf32> to vector<4x1x128xf32>
    %c0_90 = arith.constant 0 : index
    %c7_91 = arith.constant 7 : index
    %c0_92 = arith.constant 0 : index
    %76 = vector.load %arg10[%c0_90, %c7_91, %c0_92] : memref<6x8x128xf32, #tpu.memory_space<vmem>>, vector<4x1x128xf32>
    %77 = arith.mulf %75, %76 : vector<4x1x128xf32>
    %78 = arith.addf %74, %77 : vector<4x1x128xf32>
    %c0_93 = arith.constant 0 : index
    %c7_94 = arith.constant 7 : index
    %c0_95 = arith.constant 0 : index
    %79 = vector.load %arg11[%c0_93, %c7_94, %c0_95] : memref<4x8x128xf32, #tpu.memory_space<vmem>>, vector<4x1x128xf32>
    tpu.vector_store %arg11[%c0_93, %c7_94, %c0_95], %78 {strides = array<i32>} : memref<4x8x128xf32, #tpu.memory_space<vmem>>, vector<4x1x128xf32>,
    %80 = vector.extract_strided_slice %15 {offsets = [0, 12], sizes = [32, 4], strides = [1, 1]} : vector<32x36xf32> to vector<32x4xf32>
    %cst_96 = arith.constant dense<0.000000e+00> : vector<32x128xf32>
    %81 = tpu.matmul %80, %16, %cst_96 {dimension_numbers = #tpu.dot_dimension_numbers<[1], [0], [0], [1], [0, 0, 1, 1], [], []>} : vector<32x4xf32>, vector<4x128xf32>, vector<32x128xf32> -> vector<32x128xf32>
    %82 = vector.shape_cast %81 : vector<32x128xf32> to vector<4x8x128xf32>
    %c0_97 = arith.constant 0 : index
    %c1_98 = arith.constant 1 : index
    %c0_99 = arith.constant 0 : index
    %83 = vector.load %arg11[%c0_97, %c1_98, %c0_99] : memref<4x8x128xf32, #tpu.memory_space<vmem>>, vector<4x6x128xf32>
    %84 = vector.extract_strided_slice %82 {offsets = [0, 1, 0], sizes = [4, 6, 128], strides = [1, 1, 1]} : vector<4x8x128xf32> to vector<4x6x128xf32>
    %c1_100 = arith.constant 1 : index
    %c0_101 = arith.constant 0 : index
    %c0_102 = arith.constant 0 : index
    %85 = vector.load %arg10[%c1_100, %c0_101, %c0_102] : memref<6x8x128xf32, #tpu.memory_space<vmem>>, vector<4x6x128xf32>
    %86 = arith.mulf %84, %85 : vector<4x6x128xf32>
    %87 = arith.addf %83, %86 : vector<4x6x128xf32>
    %c0_103 = arith.constant 0 : index
    %c1_104 = arith.constant 1 : index
    %c0_105 = arith.constant 0 : index
    %88 = vector.load %arg11[%c0_103, %c1_104, %c0_105] : memref<4x8x128xf32, #tpu.memory_space<vmem>>, vector<4x6x128xf32>
    tpu.vector_store %arg11[%c0_103, %c1_104, %c0_105], %87 {strides = array<i32>} : memref<4x8x128xf32, #tpu.memory_space<vmem>>, vector<4x6x128xf32>,
    %c0_106 = arith.constant 0 : index
    %c0_107 = arith.constant 0 : index
    %c0_108 = arith.constant 0 : index
    %89 = vector.load %arg11[%c0_106, %c0_107, %c0_108] : memref<4x8x128xf32, #tpu.memory_space<vmem>>, vector<4x1x128xf32>
    %90 = vector.extract_strided_slice %82 {offsets = [0, 0, 0], sizes = [4, 1, 128], strides = [1, 1, 1]} : vector<4x8x128xf32> to vector<4x1x128xf32>
    %c1_109 = arith.constant 1 : index
    %c0_110 = arith.constant 0 : index
    %c0_111 = arith.constant 0 : index
    %91 = vector.load %arg10[%c1_109, %c0_110, %c0_111] : memref<6x8x128xf32, #tpu.memory_space<vmem>>, vector<4x1x128xf32>
    %92 = arith.mulf %90, %91 : vector<4x1x128xf32>
    %93 = arith.addf %89, %92 : vector<4x1x128xf32>
    %c0_112 = arith.constant 0 : index
    %c0_113 = arith.constant 0 : index
    %c0_114 = arith.constant 0 : index
    %94 = vector.load %arg11[%c0_112, %c0_113, %c0_114] : memref<4x8x128xf32, #tpu.memory_space<vmem>>, vector<4x1x128xf32>
    tpu.vector_store %arg11[%c0_112, %c0_113, %c0_114], %93 {strides = array<i32>} : memref<4x8x128xf32, #tpu.memory_space<vmem>>, vector<4x1x128xf32>,
    %c0_115 = arith.constant 0 : index
    %c7_116 = arith.constant 7 : index
    %c0_117 = arith.constant 0 : index
    %95 = vector.load %arg11[%c0_115, %c7_116, %c0_117] : memref<4x8x128xf32, #tpu.memory_space<vmem>>, vector<4x1x128xf32>
    %96 = vector.extract_strided_slice %82 {offsets = [0, 7, 0], sizes = [4, 1, 128], strides = [1, 1, 1]} : vector<4x8x128xf32> to vector<4x1x128xf32>
    %c1_118 = arith.constant 1 : index
    %c5_119 = arith.constant 5 : index
    %c0_120 = arith.constant 0 : index
    %97 = vector.load %arg10[%c1_118, %c5_119, %c0_120] : memref<6x8x128xf32, #tpu.memory_space<vmem>>, vector<4x1x128xf32>
    %98 = arith.mulf %96, %97 : vector<4x1x128xf32>
    %99 = arith.addf %95, %98 : vector<4x1x128xf32>
    %c0_121 = arith.constant 0 : index
    %c7_122 = arith.constant 7 : index
    %c0_123 = arith.constant 0 : index
    %100 = vector.load %arg11[%c0_121, %c7_122, %c0_123] : memref<4x8x128xf32, #tpu.memory_space<vmem>>, vector<4x1x128xf32>
    tpu.vector_store %arg11[%c0_121, %c7_122, %c0_123], %99 {strides = array<i32>} : memref<4x8x128xf32, #tpu.memory_space<vmem>>, vector<4x1x128xf32>,
    %101 = vector.extract_strided_slice %15 {offsets = [0, 16], sizes = [32, 4], strides = [1, 1]} : vector<32x36xf32> to vector<32x4xf32>
    %cst_124 = arith.constant dense<0.000000e+00> : vector<32x128xf32>
    %102 = tpu.matmul %101, %16, %cst_124 {dimension_numbers = #tpu.dot_dimension_numbers<[1], [0], [0], [1], [0, 0, 1, 1], [], []>} : vector<32x4xf32>, vector<4x128xf32>, vector<32x128xf32> -> vector<32x128xf32>
    %103 = vector.shape_cast %102 : vector<32x128xf32> to vector<4x8x128xf32>
    %c0_125 = arith.constant 0 : index
    %c1_126 = arith.constant 1 : index
    %c0_127 = arith.constant 0 : index
    %104 = vector.load %arg11[%c0_125, %c1_126, %c0_127] : memref<4x8x128xf32, #tpu.memory_space<vmem>>, vector<4x6x128xf32>
    %105 = vector.extract_strided_slice %103 {offsets = [0, 1, 0], sizes = [4, 6, 128], strides = [1, 1, 1]} : vector<4x8x128xf32> to vector<4x6x128xf32>
    %c1_128 = arith.constant 1 : index
    %c1_129 = arith.constant 1 : index
    %c0_130 = arith.constant 0 : index
    %106 = vector.load %arg10[%c1_128, %c1_129, %c0_130] : memref<6x8x128xf32, #tpu.memory_space<vmem>>, vector<4x6x128xf32>
    %107 = arith.mulf %105, %106 : vector<4x6x128xf32>
    %108 = arith.addf %104, %107 : vector<4x6x128xf32>
    %c0_131 = arith.constant 0 : index
    %c1_132 = arith.constant 1 : index
    %c0_133 = arith.constant 0 : index
    %109 = vector.load %arg11[%c0_131, %c1_132, %c0_133] : memref<4x8x128xf32, #tpu.memory_space<vmem>>, vector<4x6x128xf32>
    tpu.vector_store %arg11[%c0_131, %c1_132, %c0_133], %108 {strides = array<i32>} : memref<4x8x128xf32, #tpu.memory_space<vmem>>, vector<4x6x128xf32>,
    %c0_134 = arith.constant 0 : index
    %c0_135 = arith.constant 0 : index
    %c0_136 = arith.constant 0 : index
    %110 = vector.load %arg11[%c0_134, %c0_135, %c0_136] : memref<4x8x128xf32, #tpu.memory_space<vmem>>, vector<4x1x128xf32>
    %111 = vector.extract_strided_slice %103 {offsets = [0, 0, 0], sizes = [4, 1, 128], strides = [1, 1, 1]} : vector<4x8x128xf32> to vector<4x1x128xf32>
    %c1_137 = arith.constant 1 : index
    %c1_138 = arith.constant 1 : index
    %c0_139 = arith.constant 0 : index
    %112 = vector.load %arg10[%c1_137, %c1_138, %c0_139] : memref<6x8x128xf32, #tpu.memory_space<vmem>>, vector<4x1x128xf32>
    %113 = arith.mulf %111, %112 : vector<4x1x128xf32>
    %114 = arith.addf %110, %113 : vector<4x1x128xf32>
    %c0_140 = arith.constant 0 : index
    %c0_141 = arith.constant 0 : index
    %c0_142 = arith.constant 0 : index
    %115 = vector.load %arg11[%c0_140, %c0_141, %c0_142] : memref<4x8x128xf32, #tpu.memory_space<vmem>>, vector<4x1x128xf32>
    tpu.vector_store %arg11[%c0_140, %c0_141, %c0_142], %114 {strides = array<i32>} : memref<4x8x128xf32, #tpu.memory_space<vmem>>, vector<4x1x128xf32>,
    %c0_143 = arith.constant 0 : index
    %c7_144 = arith.constant 7 : index
    %c0_145 = arith.constant 0 : index
    %116 = vector.load %arg11[%c0_143, %c7_144, %c0_145] : memref<4x8x128xf32, #tpu.memory_space<vmem>>, vector<4x1x128xf32>
    %117 = vector.extract_strided_slice %103 {offsets = [0, 7, 0], sizes = [4, 1, 128], strides = [1, 1, 1]} : vector<4x8x128xf32> to vector<4x1x128xf32>
    %c1_146 = arith.constant 1 : index
    %c6_147 = arith.constant 6 : index
    %c0_148 = arith.constant 0 : index
    %118 = vector.load %arg10[%c1_146, %c6_147, %c0_148] : memref<6x8x128xf32, #tpu.memory_space<vmem>>, vector<4x1x128xf32>
    %119 = arith.mulf %117, %118 : vector<4x1x128xf32>
    %120 = arith.addf %116, %119 : vector<4x1x128xf32>
    %c0_149 = arith.constant 0 : index
    %c7_150 = arith.constant 7 : index
    %c0_151 = arith.constant 0 : index
    %121 = vector.load %arg11[%c0_149, %c7_150, %c0_151] : memref<4x8x128xf32, #tpu.memory_space<vmem>>, vector<4x1x128xf32>
    tpu.vector_store %arg11[%c0_149, %c7_150, %c0_151], %120 {strides = array<i32>} : memref<4x8x128xf32, #tpu.memory_space<vmem>>, vector<4x1x128xf32>,
    %122 = vector.extract_strided_slice %15 {offsets = [0, 20], sizes = [32, 4], strides = [1, 1]} : vector<32x36xf32> to vector<32x4xf32>
    %cst_152 = arith.constant dense<0.000000e+00> : vector<32x128xf32>
    %123 = tpu.matmul %122, %16, %cst_152 {dimension_numbers = #tpu.dot_dimension_numbers<[1], [0], [0], [1], [0, 0, 1, 1], [], []>} : vector<32x4xf32>, vector<4x128xf32>, vector<32x128xf32> -> vector<32x128xf32>
    %124 = vector.shape_cast %123 : vector<32x128xf32> to vector<4x8x128xf32>
    %c0_153 = arith.constant 0 : index
    %c1_154 = arith.constant 1 : index
    %c0_155 = arith.constant 0 : index
    %125 = vector.load %arg11[%c0_153, %c1_154, %c0_155] : memref<4x8x128xf32, #tpu.memory_space<vmem>>, vector<4x6x128xf32>
    %126 = vector.extract_strided_slice %124 {offsets = [0, 1, 0], sizes = [4, 6, 128], strides = [1, 1, 1]} : vector<4x8x128xf32> to vector<4x6x128xf32>
    %c1_156 = arith.constant 1 : index
    %c2_157 = arith.constant 2 : index
    %c0_158 = arith.constant 0 : index
    %127 = vector.load %arg10[%c1_156, %c2_157, %c0_158] : memref<6x8x128xf32, #tpu.memory_space<vmem>>, vector<4x6x128xf32>
    %128 = arith.mulf %126, %127 : vector<4x6x128xf32>
    %129 = arith.addf %125, %128 : vector<4x6x128xf32>
    %c0_159 = arith.constant 0 : index
    %c1_160 = arith.constant 1 : index
    %c0_161 = arith.constant 0 : index
    %130 = vector.load %arg11[%c0_159, %c1_160, %c0_161] : memref<4x8x128xf32, #tpu.memory_space<vmem>>, vector<4x6x128xf32>
    tpu.vector_store %arg11[%c0_159, %c1_160, %c0_161], %129 {strides = array<i32>} : memref<4x8x128xf32, #tpu.memory_space<vmem>>, vector<4x6x128xf32>,
    %c0_162 = arith.constant 0 : index
    %c0_163 = arith.constant 0 : index
    %c0_164 = arith.constant 0 : index
    %131 = vector.load %arg11[%c0_162, %c0_163, %c0_164] : memref<4x8x128xf32, #tpu.memory_space<vmem>>, vector<4x1x128xf32>
    %132 = vector.extract_strided_slice %124 {offsets = [0, 0, 0], sizes = [4, 1, 128], strides = [1, 1, 1]} : vector<4x8x128xf32> to vector<4x1x128xf32>
    %c1_165 = arith.constant 1 : index
    %c2_166 = arith.constant 2 : index
    %c0_167 = arith.constant 0 : index
    %133 = vector.load %arg10[%c1_165, %c2_166, %c0_167] : memref<6x8x128xf32, #tpu.memory_space<vmem>>, vector<4x1x128xf32>
    %134 = arith.mulf %132, %133 : vector<4x1x128xf32>
    %135 = arith.addf %131, %134 : vector<4x1x128xf32>
    %c0_168 = arith.constant 0 : index
    %c0_169 = arith.constant 0 : index
    %c0_170 = arith.constant 0 : index
    %136 = vector.load %arg11[%c0_168, %c0_169, %c0_170] : memref<4x8x128xf32, #tpu.memory_space<vmem>>, vector<4x1x128xf32>
    tpu.vector_store %arg11[%c0_168, %c0_169, %c0_170], %135 {strides = array<i32>} : memref<4x8x128xf32, #tpu.memory_space<vmem>>, vector<4x1x128xf32>,
    %c0_171 = arith.constant 0 : index
    %c7_172 = arith.constant 7 : index
    %c0_173 = arith.constant 0 : index
    %137 = vector.load %arg11[%c0_171, %c7_172, %c0_173] : memref<4x8x128xf32, #tpu.memory_space<vmem>>, vector<4x1x128xf32>
    %138 = vector.extract_strided_slice %124 {offsets = [0, 7, 0], sizes = [4, 1, 128], strides = [1, 1, 1]} : vector<4x8x128xf32> to vector<4x1x128xf32>
    %c1_174 = arith.constant 1 : index
    %c7_175 = arith.constant 7 : index
    %c0_176 = arith.constant 0 : index
    %139 = vector.load %arg10[%c1_174, %c7_175, %c0_176] : memref<6x8x128xf32, #tpu.memory_space<vmem>>, vector<4x1x128xf32>
    %140 = arith.mulf %138, %139 : vector<4x1x128xf32>
    %141 = arith.addf %137, %140 : vector<4x1x128xf32>
    %c0_177 = arith.constant 0 : index
    %c7_178 = arith.constant 7 : index
    %c0_179 = arith.constant 0 : index
    %142 = vector.load %arg11[%c0_177, %c7_178, %c0_179] : memref<4x8x128xf32, #tpu.memory_space<vmem>>, vector<4x1x128xf32>
    tpu.vector_store %arg11[%c0_177, %c7_178, %c0_179], %141 {strides = array<i32>} : memref<4x8x128xf32, #tpu.memory_space<vmem>>, vector<4x1x128xf32>,
    %143 = vector.extract_strided_slice %15 {offsets = [0, 24], sizes = [32, 4], strides = [1, 1]} : vector<32x36xf32> to vector<32x4xf32>
    %cst_180 = arith.constant dense<0.000000e+00> : vector<32x128xf32>
    %144 = tpu.matmul %143, %16, %cst_180 {dimension_numbers = #tpu.dot_dimension_numbers<[1], [0], [0], [1], [0, 0, 1, 1], [], []>} : vector<32x4xf32>, vector<4x128xf32>, vector<32x128xf32> -> vector<32x128xf32>
    %145 = vector.shape_cast %144 : vector<32x128xf32> to vector<4x8x128xf32>
    %c0_181 = arith.constant 0 : index
    %c1_182 = arith.constant 1 : index
    %c0_183 = arith.constant 0 : index
    %146 = vector.load %arg11[%c0_181, %c1_182, %c0_183] : memref<4x8x128xf32, #tpu.memory_space<vmem>>, vector<4x6x128xf32>
    %147 = vector.extract_strided_slice %145 {offsets = [0, 1, 0], sizes = [4, 6, 128], strides = [1, 1, 1]} : vector<4x8x128xf32> to vector<4x6x128xf32>
    %c2_184 = arith.constant 2 : index
    %c0_185 = arith.constant 0 : index
    %c0_186 = arith.constant 0 : index
    %148 = vector.load %arg10[%c2_184, %c0_185, %c0_186] : memref<6x8x128xf32, #tpu.memory_space<vmem>>, vector<4x6x128xf32>
    %149 = arith.mulf %147, %148 : vector<4x6x128xf32>
    %150 = arith.addf %146, %149 : vector<4x6x128xf32>
    %c0_187 = arith.constant 0 : index
    %c1_188 = arith.constant 1 : index
    %c0_189 = arith.constant 0 : index
    %151 = vector.load %arg11[%c0_187, %c1_188, %c0_189] : memref<4x8x128xf32, #tpu.memory_space<vmem>>, vector<4x6x128xf32>
    tpu.vector_store %arg11[%c0_187, %c1_188, %c0_189], %150 {strides = array<i32>} : memref<4x8x128xf32, #tpu.memory_space<vmem>>, vector<4x6x128xf32>,
    %c0_190 = arith.constant 0 : index
    %c0_191 = arith.constant 0 : index
    %c0_192 = arith.constant 0 : index
    %152 = vector.load %arg11[%c0_190, %c0_191, %c0_192] : memref<4x8x128xf32, #tpu.memory_space<vmem>>, vector<4x1x128xf32>
    %153 = vector.extract_strided_slice %145 {offsets = [0, 0, 0], sizes = [4, 1, 128], strides = [1, 1, 1]} : vector<4x8x128xf32> to vector<4x1x128xf32>
    %c2_193 = arith.constant 2 : index
    %c0_194 = arith.constant 0 : index
    %c0_195 = arith.constant 0 : index
    %154 = vector.load %arg10[%c2_193, %c0_194, %c0_195] : memref<6x8x128xf32, #tpu.memory_space<vmem>>, vector<4x1x128xf32>
    %155 = arith.mulf %153, %154 : vector<4x1x128xf32>
    %156 = arith.addf %152, %155 : vector<4x1x128xf32>
    %c0_196 = arith.constant 0 : index
    %c0_197 = arith.constant 0 : index
    %c0_198 = arith.constant 0 : index
    %157 = vector.load %arg11[%c0_196, %c0_197, %c0_198] : memref<4x8x128xf32, #tpu.memory_space<vmem>>, vector<4x1x128xf32>
    tpu.vector_store %arg11[%c0_196, %c0_197, %c0_198], %156 {strides = array<i32>} : memref<4x8x128xf32, #tpu.memory_space<vmem>>, vector<4x1x128xf32>,
    %c0_199 = arith.constant 0 : index
    %c7_200 = arith.constant 7 : index
    %c0_201 = arith.constant 0 : index
    %158 = vector.load %arg11[%c0_199, %c7_200, %c0_201] : memref<4x8x128xf32, #tpu.memory_space<vmem>>, vector<4x1x128xf32>
    %159 = vector.extract_strided_slice %145 {offsets = [0, 7, 0], sizes = [4, 1, 128], strides = [1, 1, 1]} : vector<4x8x128xf32> to vector<4x1x128xf32>
    %c2_202 = arith.constant 2 : index
    %c5_203 = arith.constant 5 : index
    %c0_204 = arith.constant 0 : index
    %160 = vector.load %arg10[%c2_202, %c5_203, %c0_204] : memref<6x8x128xf32, #tpu.memory_space<vmem>>, vector<4x1x128xf32>
    %161 = arith.mulf %159, %160 : vector<4x1x128xf32>
    %162 = arith.addf %158, %161 : vector<4x1x128xf32>
    %c0_205 = arith.constant 0 : index
    %c7_206 = arith.constant 7 : index
    %c0_207 = arith.constant 0 : index
    %163 = vector.load %arg11[%c0_205, %c7_206, %c0_207] : memref<4x8x128xf32, #tpu.memory_space<vmem>>, vector<4x1x128xf32>
    tpu.vector_store %arg11[%c0_205, %c7_206, %c0_207], %162 {strides = array<i32>} : memref<4x8x128xf32, #tpu.memory_space<vmem>>, vector<4x1x128xf32>,
    %164 = vector.extract_strided_slice %15 {offsets = [0, 28], sizes = [32, 4], strides = [1, 1]} : vector<32x36xf32> to vector<32x4xf32>
    %cst_208 = arith.constant dense<0.000000e+00> : vector<32x128xf32>
    %165 = tpu.matmul %164, %16, %cst_208 {dimension_numbers = #tpu.dot_dimension_numbers<[1], [0], [0], [1], [0, 0, 1, 1], [], []>} : vector<32x4xf32>, vector<4x128xf32>, vector<32x128xf32> -> vector<32x128xf32>
    %166 = vector.shape_cast %165 : vector<32x128xf32> to vector<4x8x128xf32>
    %c0_209 = arith.constant 0 : index
    %c1_210 = arith.constant 1 : index
    %c0_211 = arith.constant 0 : index
    %167 = vector.load %arg11[%c0_209, %c1_210, %c0_211] : memref<4x8x128xf32, #tpu.memory_space<vmem>>, vector<4x6x128xf32>
    %168 = vector.extract_strided_slice %166 {offsets = [0, 1, 0], sizes = [4, 6, 128], strides = [1, 1, 1]} : vector<4x8x128xf32> to vector<4x6x128xf32>
    %c2_212 = arith.constant 2 : index
    %c1_213 = arith.constant 1 : index
    %c0_214 = arith.constant 0 : index
    %169 = vector.load %arg10[%c2_212, %c1_213, %c0_214] : memref<6x8x128xf32, #tpu.memory_space<vmem>>, vector<4x6x128xf32>
    %170 = arith.mulf %168, %169 : vector<4x6x128xf32>
    %171 = arith.addf %167, %170 : vector<4x6x128xf32>
    %c0_215 = arith.constant 0 : index
    %c1_216 = arith.constant 1 : index
    %c0_217 = arith.constant 0 : index
    %172 = vector.load %arg11[%c0_215, %c1_216, %c0_217] : memref<4x8x128xf32, #tpu.memory_space<vmem>>, vector<4x6x128xf32>
    tpu.vector_store %arg11[%c0_215, %c1_216, %c0_217], %171 {strides = array<i32>} : memref<4x8x128xf32, #tpu.memory_space<vmem>>, vector<4x6x128xf32>,
    %c0_218 = arith.constant 0 : index
    %c0_219 = arith.constant 0 : index
    %c0_220 = arith.constant 0 : index
    %173 = vector.load %arg11[%c0_218, %c0_219, %c0_220] : memref<4x8x128xf32, #tpu.memory_space<vmem>>, vector<4x1x128xf32>
    %174 = vector.extract_strided_slice %166 {offsets = [0, 0, 0], sizes = [4, 1, 128], strides = [1, 1, 1]} : vector<4x8x128xf32> to vector<4x1x128xf32>
    %c2_221 = arith.constant 2 : index
    %c1_222 = arith.constant 1 : index
    %c0_223 = arith.constant 0 : index
    %175 = vector.load %arg10[%c2_221, %c1_222, %c0_223] : memref<6x8x128xf32, #tpu.memory_space<vmem>>, vector<4x1x128xf32>
    %176 = arith.mulf %174, %175 : vector<4x1x128xf32>
    %177 = arith.addf %173, %176 : vector<4x1x128xf32>
    %c0_224 = arith.constant 0 : index
    %c0_225 = arith.constant 0 : index
    %c0_226 = arith.constant 0 : index
    %178 = vector.load %arg11[%c0_224, %c0_225, %c0_226] : memref<4x8x128xf32, #tpu.memory_space<vmem>>, vector<4x1x128xf32>
    tpu.vector_store %arg11[%c0_224, %c0_225, %c0_226], %177 {strides = array<i32>} : memref<4x8x128xf32, #tpu.memory_space<vmem>>, vector<4x1x128xf32>,
    %c0_227 = arith.constant 0 : index
    %c7_228 = arith.constant 7 : index
    %c0_229 = arith.constant 0 : index
    %179 = vector.load %arg11[%c0_227, %c7_228, %c0_229] : memref<4x8x128xf32, #tpu.memory_space<vmem>>, vector<4x1x128xf32>
    %180 = vector.extract_strided_slice %166 {offsets = [0, 7, 0], sizes = [4, 1, 128], strides = [1, 1, 1]} : vector<4x8x128xf32> to vector<4x1x128xf32>
    %c2_230 = arith.constant 2 : index
    %c6_231 = arith.constant 6 : index
    %c0_232 = arith.constant 0 : index
    %181 = vector.load %arg10[%c2_230, %c6_231, %c0_232] : memref<6x8x128xf32, #tpu.memory_space<vmem>>, vector<4x1x128xf32>
    %182 = arith.mulf %180, %181 : vector<4x1x128xf32>
    %183 = arith.addf %179, %182 : vector<4x1x128xf32>
    %c0_233 = arith.constant 0 : index
    %c7_234 = arith.constant 7 : index
    %c0_235 = arith.constant 0 : index
    %184 = vector.load %arg11[%c0_233, %c7_234, %c0_235] : memref<4x8x128xf32, #tpu.memory_space<vmem>>, vector<4x1x128xf32>
    tpu.vector_store %arg11[%c0_233, %c7_234, %c0_235], %183 {strides = array<i32>} : memref<4x8x128xf32, #tpu.memory_space<vmem>>, vector<4x1x128xf32>,
    %185 = vector.extract_strided_slice %15 {offsets = [0, 32], sizes = [32, 4], strides = [1, 1]} : vector<32x36xf32> to vector<32x4xf32>
    %cst_236 = arith.constant dense<0.000000e+00> : vector<32x128xf32>
    %186 = tpu.matmul %185, %16, %cst_236 {dimension_numbers = #tpu.dot_dimension_numbers<[1], [0], [0], [1], [0, 0, 1, 1], [], []>} : vector<32x4xf32>, vector<4x128xf32>, vector<32x128xf32> -> vector<32x128xf32>
    %187 = vector.shape_cast %186 : vector<32x128xf32> to vector<4x8x128xf32>
    %c0_237 = arith.constant 0 : index
    %c1_238 = arith.constant 1 : index
    %c0_239 = arith.constant 0 : index
    %188 = vector.load %arg11[%c0_237, %c1_238, %c0_239] : memref<4x8x128xf32, #tpu.memory_space<vmem>>, vector<4x6x128xf32>
    %189 = vector.extract_strided_slice %187 {offsets = [0, 1, 0], sizes = [4, 6, 128], strides = [1, 1, 1]} : vector<4x8x128xf32> to vector<4x6x128xf32>
    %c2_240 = arith.constant 2 : index
    %c2_241 = arith.constant 2 : index
    %c0_242 = arith.constant 0 : index
    %190 = vector.load %arg10[%c2_240, %c2_241, %c0_242] : memref<6x8x128xf32, #tpu.memory_space<vmem>>, vector<4x6x128xf32>
    %191 = arith.mulf %189, %190 : vector<4x6x128xf32>
    %192 = arith.addf %188, %191 : vector<4x6x128xf32>
    %c0_243 = arith.constant 0 : index
    %c1_244 = arith.constant 1 : index
    %c0_245 = arith.constant 0 : index
    %193 = vector.load %arg11[%c0_243, %c1_244, %c0_245] : memref<4x8x128xf32, #tpu.memory_space<vmem>>, vector<4x6x128xf32>
    tpu.vector_store %arg11[%c0_243, %c1_244, %c0_245], %192 {strides = array<i32>} : memref<4x8x128xf32, #tpu.memory_space<vmem>>, vector<4x6x128xf32>,
    %c0_246 = arith.constant 0 : index
    %c0_247 = arith.constant 0 : index
    %c0_248 = arith.constant 0 : index
    %194 = vector.load %arg11[%c0_246, %c0_247, %c0_248] : memref<4x8x128xf32, #tpu.memory_space<vmem>>, vector<4x1x128xf32>
    %195 = vector.extract_strided_slice %187 {offsets = [0, 0, 0], sizes = [4, 1, 128], strides = [1, 1, 1]} : vector<4x8x128xf32> to vector<4x1x128xf32>
    %c2_249 = arith.constant 2 : index
    %c2_250 = arith.constant 2 : index
    %c0_251 = arith.constant 0 : index
    %196 = vector.load %arg10[%c2_249, %c2_250, %c0_251] : memref<6x8x128xf32, #tpu.memory_space<vmem>>, vector<4x1x128xf32>
    %197 = arith.mulf %195, %196 : vector<4x1x128xf32>
    %198 = arith.addf %194, %197 : vector<4x1x128xf32>
    %c0_252 = arith.constant 0 : index
    %c0_253 = arith.constant 0 : index
    %c0_254 = arith.constant 0 : index
    %199 = vector.load %arg11[%c0_252, %c0_253, %c0_254] : memref<4x8x128xf32, #tpu.memory_space<vmem>>, vector<4x1x128xf32>
    tpu.vector_store %arg11[%c0_252, %c0_253, %c0_254], %198 {strides = array<i32>} : memref<4x8x128xf32, #tpu.memory_space<vmem>>, vector<4x1x128xf32>,
    %c0_255 = arith.constant 0 : index
    %c7_256 = arith.constant 7 : index
    %c0_257 = arith.constant 0 : index
    %200 = vector.load %arg11[%c0_255, %c7_256, %c0_257] : memref<4x8x128xf32, #tpu.memory_space<vmem>>, vector<4x1x128xf32>
    %201 = vector.extract_strided_slice %187 {offsets = [0, 7, 0], sizes = [4, 1, 128], strides = [1, 1, 1]} : vector<4x8x128xf32> to vector<4x1x128xf32>
    %c2_258 = arith.constant 2 : index
    %c7_259 = arith.constant 7 : index
    %c0_260 = arith.constant 0 : index
    %202 = vector.load %arg10[%c2_258, %c7_259, %c0_260] : memref<6x8x128xf32, #tpu.memory_space<vmem>>, vector<4x1x128xf32>
    %203 = arith.mulf %201, %202 : vector<4x1x128xf32>
    %204 = arith.addf %200, %203 : vector<4x1x128xf32>
    %c0_261 = arith.constant 0 : index
    %c7_262 = arith.constant 7 : index
    %c0_263 = arith.constant 0 : index
    %205 = vector.load %arg11[%c0_261, %c7_262, %c0_263] : memref<4x8x128xf32, #tpu.memory_space<vmem>>, vector<4x1x128xf32>
    tpu.vector_store %arg11[%c0_261, %c7_262, %c0_263], %204 {strides = array<i32>} : memref<4x8x128xf32, #tpu.memory_space<vmem>>, vector<4x1x128xf32>,
    %c0_i32 = arith.constant 0 : i32
    %206 = arith.cmpi eq, %arg1, %c0_i32 : i32
    %207 = arith.extui %206 : i1 to i32
    %c0_i32_264 = arith.constant 0 : i32
    %208 = arith.cmpi ne, %207, %c0_i32_264 : i32
    scf.if %208 {
      %222 = vector.extract_strided_slice %15 {offsets = [0, 0], sizes = [8, 36], strides = [1, 1]} : vector<32x36xf32> to vector<8x36xf32>
      %cst_277 = arith.constant 0.000000e+00 : f32
      %223 = vector.broadcast %cst_277 : f32 to vector<1x8x128xf32>
      %c0_278 = arith.constant 0 : index
      %c0_279 = arith.constant 0 : index
      %c0_280 = arith.constant 0 : index
      %224 = vector.load %arg11[%c0_278, %c0_279, %c0_280] : memref<4x8x128xf32, #tpu.memory_space<vmem>>, vector<1x8x128xf32>
      tpu.vector_store %arg11[%c0_278, %c0_279, %c0_280], %223 {strides = array<i32>} : memref<4x8x128xf32, #tpu.memory_space<vmem>>, vector<1x8x128xf32>,
      %c1_281 = arith.constant 1 : index
      %c0_282 = arith.constant 0 : index
      %c0_283 = arith.constant 0 : index
      %225 = vector.load %arg10[%c1_281, %c0_282, %c0_283] : memref<6x8x128xf32, #tpu.memory_space<vmem>>, vector<1x8x128xf32>
      %226 = vector.shape_cast %225 : vector<1x8x128xf32> to vector<8x128xf32>
      %227 = vector.extract_strided_slice %222 {offsets = [0, 0], sizes = [8, 4], strides = [1, 1]} : vector<8x36xf32> to vector<8x4xf32>
      %cst_284 = arith.constant dense<0.000000e+00> : vector<8x128xf32>
      %228 = tpu.matmul %227, %16, %cst_284 {dimension_numbers = #tpu.dot_dimension_numbers<[1], [0], [0], [1], [0, 0, 1, 1], [], []>} : vector<8x4xf32>, vector<4x128xf32>, vector<8x128xf32> -> vector<8x128xf32>
      %229 = vector.shape_cast %228 : vector<8x128xf32> to vector<1x8x128xf32>
      %c0_285 = arith.constant 0 : index
      %c1_286 = arith.constant 1 : index
      %c0_287 = arith.constant 0 : index
      %230 = vector.load %arg11[%c0_285, %c1_286, %c0_287] : memref<4x8x128xf32, #tpu.memory_space<vmem>>, vector<1x6x128xf32>
      %231 = vector.extract_strided_slice %229 {offsets = [0, 1, 0], sizes = [1, 6, 128], strides = [1, 1, 1]} : vector<1x8x128xf32> to vector<1x6x128xf32>
      %232 = vector.extract_strided_slice %226 {offsets = [0, 0], sizes = [6, 128], strides = [1, 1]} : vector<8x128xf32> to vector<6x128xf32>
      %233 = vector.shape_cast %232 : vector<6x128xf32> to vector<1x6x128xf32>
      %234 = arith.mulf %231, %233 : vector<1x6x128xf32>
      %235 = arith.addf %230, %234 : vector<1x6x128xf32>
      %c0_288 = arith.constant 0 : index
      %c1_289 = arith.constant 1 : index
      %c0_290 = arith.constant 0 : index
      %236 = vector.load %arg11[%c0_288, %c1_289, %c0_290] : memref<4x8x128xf32, #tpu.memory_space<vmem>>, vector<1x6x128xf32>
      tpu.vector_store %arg11[%c0_288, %c1_289, %c0_290], %235 {strides = array<i32>} : memref<4x8x128xf32, #tpu.memory_space<vmem>>, vector<1x6x128xf32>,
      %c0_291 = arith.constant 0 : index
      %c0_292 = arith.constant 0 : index
      %c0_293 = arith.constant 0 : index
      %237 = vector.load %arg11[%c0_291, %c0_292, %c0_293] : memref<4x8x128xf32, #tpu.memory_space<vmem>>, vector<1x1x128xf32>
      %238 = vector.extract_strided_slice %229 {offsets = [0, 0, 0], sizes = [1, 1, 128], strides = [1, 1, 1]} : vector<1x8x128xf32> to vector<1x1x128xf32>
      %239 = vector.extract_strided_slice %226 {offsets = [0, 0], sizes = [1, 128], strides = [1, 1]} : vector<8x128xf32> to vector<1x128xf32>
      %240 = vector.shape_cast %239 : vector<1x128xf32> to vector<1x1x128xf32>
      %241 = arith.mulf %238, %240 : vector<1x1x128xf32>
      %242 = arith.addf %237, %241 : vector<1x1x128xf32>
      %c0_294 = arith.constant 0 : index
      %c0_295 = arith.constant 0 : index
      %c0_296 = arith.constant 0 : index
      %243 = vector.load %arg11[%c0_294, %c0_295, %c0_296] : memref<4x8x128xf32, #tpu.memory_space<vmem>>, vector<1x1x128xf32>
      tpu.vector_store %arg11[%c0_294, %c0_295, %c0_296], %242 {strides = array<i32>} : memref<4x8x128xf32, #tpu.memory_space<vmem>>, vector<1x1x128xf32>,
      %c0_297 = arith.constant 0 : index
      %c7_298 = arith.constant 7 : index
      %c0_299 = arith.constant 0 : index
      %244 = vector.load %arg11[%c0_297, %c7_298, %c0_299] : memref<4x8x128xf32, #tpu.memory_space<vmem>>, vector<1x1x128xf32>
      %245 = vector.extract_strided_slice %229 {offsets = [0, 7, 0], sizes = [1, 1, 128], strides = [1, 1, 1]} : vector<1x8x128xf32> to vector<1x1x128xf32>
      %246 = vector.extract_strided_slice %226 {offsets = [5, 0], sizes = [1, 128], strides = [1, 1]} : vector<8x128xf32> to vector<1x128xf32>
      %247 = vector.shape_cast %246 : vector<1x128xf32> to vector<1x1x128xf32>
      %248 = arith.mulf %245, %247 : vector<1x1x128xf32>
      %249 = arith.addf %244, %248 : vector<1x1x128xf32>
      %c0_300 = arith.constant 0 : index
      %c7_301 = arith.constant 7 : index
      %c0_302 = arith.constant 0 : index
      %250 = vector.load %arg11[%c0_300, %c7_301, %c0_302] : memref<4x8x128xf32, #tpu.memory_space<vmem>>, vector<1x1x128xf32>
      tpu.vector_store %arg11[%c0_300, %c7_301, %c0_302], %249 {strides = array<i32>} : memref<4x8x128xf32, #tpu.memory_space<vmem>>, vector<1x1x128xf32>,
      %251 = vector.extract_strided_slice %222 {offsets = [0, 4], sizes = [8, 4], strides = [1, 1]} : vector<8x36xf32> to vector<8x4xf32>
      %cst_303 = arith.constant dense<0.000000e+00> : vector<8x128xf32>
      %252 = tpu.matmul %251, %16, %cst_303 {dimension_numbers = #tpu.dot_dimension_numbers<[1], [0], [0], [1], [0, 0, 1, 1], [], []>} : vector<8x4xf32>, vector<4x128xf32>, vector<8x128xf32> -> vector<8x128xf32>
      %253 = vector.shape_cast %252 : vector<8x128xf32> to vector<1x8x128xf32>
      %c0_304 = arith.constant 0 : index
      %c1_305 = arith.constant 1 : index
      %c0_306 = arith.constant 0 : index
      %254 = vector.load %arg11[%c0_304, %c1_305, %c0_306] : memref<4x8x128xf32, #tpu.memory_space<vmem>>, vector<1x6x128xf32>
      %255 = vector.extract_strided_slice %253 {offsets = [0, 1, 0], sizes = [1, 6, 128], strides = [1, 1, 1]} : vector<1x8x128xf32> to vector<1x6x128xf32>
      %256 = vector.extract_strided_slice %226 {offsets = [1, 0], sizes = [6, 128], strides = [1, 1]} : vector<8x128xf32> to vector<6x128xf32>
      %257 = vector.shape_cast %256 : vector<6x128xf32> to vector<1x6x128xf32>
      %258 = arith.mulf %255, %257 : vector<1x6x128xf32>
      %259 = arith.addf %254, %258 : vector<1x6x128xf32>
      %c0_307 = arith.constant 0 : index
      %c1_308 = arith.constant 1 : index
      %c0_309 = arith.constant 0 : index
      %260 = vector.load %arg11[%c0_307, %c1_308, %c0_309] : memref<4x8x128xf32, #tpu.memory_space<vmem>>, vector<1x6x128xf32>
      tpu.vector_store %arg11[%c0_307, %c1_308, %c0_309], %259 {strides = array<i32>} : memref<4x8x128xf32, #tpu.memory_space<vmem>>, vector<1x6x128xf32>,
      %c0_310 = arith.constant 0 : index
      %c0_311 = arith.constant 0 : index
      %c0_312 = arith.constant 0 : index
      %261 = vector.load %arg11[%c0_310, %c0_311, %c0_312] : memref<4x8x128xf32, #tpu.memory_space<vmem>>, vector<1x1x128xf32>
      %262 = vector.extract_strided_slice %253 {offsets = [0, 0, 0], sizes = [1, 1, 128], strides = [1, 1, 1]} : vector<1x8x128xf32> to vector<1x1x128xf32>
      %263 = vector.extract_strided_slice %226 {offsets = [1, 0], sizes = [1, 128], strides = [1, 1]} : vector<8x128xf32> to vector<1x128xf32>
      %264 = vector.shape_cast %263 : vector<1x128xf32> to vector<1x1x128xf32>
      %265 = arith.mulf %262, %264 : vector<1x1x128xf32>
      %266 = arith.addf %261, %265 : vector<1x1x128xf32>
      %c0_313 = arith.constant 0 : index
      %c0_314 = arith.constant 0 : index
      %c0_315 = arith.constant 0 : index
      %267 = vector.load %arg11[%c0_313, %c0_314, %c0_315] : memref<4x8x128xf32, #tpu.memory_space<vmem>>, vector<1x1x128xf32>
      tpu.vector_store %arg11[%c0_313, %c0_314, %c0_315], %266 {strides = array<i32>} : memref<4x8x128xf32, #tpu.memory_space<vmem>>, vector<1x1x128xf32>,
      %c0_316 = arith.constant 0 : index
      %c7_317 = arith.constant 7 : index
      %c0_318 = arith.constant 0 : index
      %268 = vector.load %arg11[%c0_316, %c7_317, %c0_318] : memref<4x8x128xf32, #tpu.memory_space<vmem>>, vector<1x1x128xf32>
      %269 = vector.extract_strided_slice %253 {offsets = [0, 7, 0], sizes = [1, 1, 128], strides = [1, 1, 1]} : vector<1x8x128xf32> to vector<1x1x128xf32>
      %270 = vector.extract_strided_slice %226 {offsets = [6, 0], sizes = [1, 128], strides = [1, 1]} : vector<8x128xf32> to vector<1x128xf32>
      %271 = vector.shape_cast %270 : vector<1x128xf32> to vector<1x1x128xf32>
      %272 = arith.mulf %269, %271 : vector<1x1x128xf32>
      %273 = arith.addf %268, %272 : vector<1x1x128xf32>
      %c0_319 = arith.constant 0 : index
      %c7_320 = arith.constant 7 : index
      %c0_321 = arith.constant 0 : index
      %274 = vector.load %arg11[%c0_319, %c7_320, %c0_321] : memref<4x8x128xf32, #tpu.memory_space<vmem>>, vector<1x1x128xf32>
      tpu.vector_store %arg11[%c0_319, %c7_320, %c0_321], %273 {strides = array<i32>} : memref<4x8x128xf32, #tpu.memory_space<vmem>>, vector<1x1x128xf32>,
      %275 = vector.extract_strided_slice %222 {offsets = [0, 8], sizes = [8, 4], strides = [1, 1]} : vector<8x36xf32> to vector<8x4xf32>
      %cst_322 = arith.constant dense<0.000000e+00> : vector<8x128xf32>
      %276 = tpu.matmul %275, %16, %cst_322 {dimension_numbers = #tpu.dot_dimension_numbers<[1], [0], [0], [1], [0, 0, 1, 1], [], []>} : vector<8x4xf32>, vector<4x128xf32>, vector<8x128xf32> -> vector<8x128xf32>
      %277 = vector.shape_cast %276 : vector<8x128xf32> to vector<1x8x128xf32>
      %c0_323 = arith.constant 0 : index
      %c1_324 = arith.constant 1 : index
      %c0_325 = arith.constant 0 : index
      %278 = vector.load %arg11[%c0_323, %c1_324, %c0_325] : memref<4x8x128xf32, #tpu.memory_space<vmem>>, vector<1x6x128xf32>
      %279 = vector.extract_strided_slice %277 {offsets = [0, 1, 0], sizes = [1, 6, 128], strides = [1, 1, 1]} : vector<1x8x128xf32> to vector<1x6x128xf32>
      %280 = vector.extract_strided_slice %226 {offsets = [2, 0], sizes = [6, 128], strides = [1, 1]} : vector<8x128xf32> to vector<6x128xf32>
      %281 = vector.shape_cast %280 : vector<6x128xf32> to vector<1x6x128xf32>
      %282 = arith.mulf %279, %281 : vector<1x6x128xf32>
      %283 = arith.addf %278, %282 : vector<1x6x128xf32>
      %c0_326 = arith.constant 0 : index
      %c1_327 = arith.constant 1 : index
      %c0_328 = arith.constant 0 : index
      %284 = vector.load %arg11[%c0_326, %c1_327, %c0_328] : memref<4x8x128xf32, #tpu.memory_space<vmem>>, vector<1x6x128xf32>
      tpu.vector_store %arg11[%c0_326, %c1_327, %c0_328], %283 {strides = array<i32>} : memref<4x8x128xf32, #tpu.memory_space<vmem>>, vector<1x6x128xf32>,
      %c0_329 = arith.constant 0 : index
      %c0_330 = arith.constant 0 : index
      %c0_331 = arith.constant 0 : index
      %285 = vector.load %arg11[%c0_329, %c0_330, %c0_331] : memref<4x8x128xf32, #tpu.memory_space<vmem>>, vector<1x1x128xf32>
      %286 = vector.extract_strided_slice %277 {offsets = [0, 0, 0], sizes = [1, 1, 128], strides = [1, 1, 1]} : vector<1x8x128xf32> to vector<1x1x128xf32>
      %287 = vector.extract_strided_slice %226 {offsets = [2, 0], sizes = [1, 128], strides = [1, 1]} : vector<8x128xf32> to vector<1x128xf32>
      %288 = vector.shape_cast %287 : vector<1x128xf32> to vector<1x1x128xf32>
      %289 = arith.mulf %286, %288 : vector<1x1x128xf32>
      %290 = arith.addf %285, %289 : vector<1x1x128xf32>
      %c0_332 = arith.constant 0 : index
      %c0_333 = arith.constant 0 : index
      %c0_334 = arith.constant 0 : index
      %291 = vector.load %arg11[%c0_332, %c0_333, %c0_334] : memref<4x8x128xf32, #tpu.memory_space<vmem>>, vector<1x1x128xf32>
      tpu.vector_store %arg11[%c0_332, %c0_333, %c0_334], %290 {strides = array<i32>} : memref<4x8x128xf32, #tpu.memory_space<vmem>>, vector<1x1x128xf32>,
      %c0_335 = arith.constant 0 : index
      %c7_336 = arith.constant 7 : index
      %c0_337 = arith.constant 0 : index
      %292 = vector.load %arg11[%c0_335, %c7_336, %c0_337] : memref<4x8x128xf32, #tpu.memory_space<vmem>>, vector<1x1x128xf32>
      %293 = vector.extract_strided_slice %277 {offsets = [0, 7, 0], sizes = [1, 1, 128], strides = [1, 1, 1]} : vector<1x8x128xf32> to vector<1x1x128xf32>
      %294 = vector.extract_strided_slice %226 {offsets = [7, 0], sizes = [1, 128], strides = [1, 1]} : vector<8x128xf32> to vector<1x128xf32>
      %295 = vector.shape_cast %294 : vector<1x128xf32> to vector<1x1x128xf32>
      %296 = arith.mulf %293, %295 : vector<1x1x128xf32>
      %297 = arith.addf %292, %296 : vector<1x1x128xf32>
      %c0_338 = arith.constant 0 : index
      %c7_339 = arith.constant 7 : index
      %c0_340 = arith.constant 0 : index
      %298 = vector.load %arg11[%c0_338, %c7_339, %c0_340] : memref<4x8x128xf32, #tpu.memory_space<vmem>>, vector<1x1x128xf32>
      tpu.vector_store %arg11[%c0_338, %c7_339, %c0_340], %297 {strides = array<i32>} : memref<4x8x128xf32, #tpu.memory_space<vmem>>, vector<1x1x128xf32>,
      %c2_341 = arith.constant 2 : index
      %c0_342 = arith.constant 0 : index
      %c0_343 = arith.constant 0 : index
      %299 = vector.load %arg10[%c2_341, %c0_342, %c0_343] : memref<6x8x128xf32, #tpu.memory_space<vmem>>, vector<1x8x128xf32>
      %300 = vector.shape_cast %299 : vector<1x8x128xf32> to vector<8x128xf32>
      %301 = vector.extract_strided_slice %222 {offsets = [0, 12], sizes = [8, 4], strides = [1, 1]} : vector<8x36xf32> to vector<8x4xf32>
      %cst_344 = arith.constant dense<0.000000e+00> : vector<8x128xf32>
      %302 = tpu.matmul %301, %16, %cst_344 {dimension_numbers = #tpu.dot_dimension_numbers<[1], [0], [0], [1], [0, 0, 1, 1], [], []>} : vector<8x4xf32>, vector<4x128xf32>, vector<8x128xf32> -> vector<8x128xf32>
      %303 = vector.shape_cast %302 : vector<8x128xf32> to vector<1x8x128xf32>
      %c0_345 = arith.constant 0 : index
      %c1_346 = arith.constant 1 : index
      %c0_347 = arith.constant 0 : index
      %304 = vector.load %arg11[%c0_345, %c1_346, %c0_347] : memref<4x8x128xf32, #tpu.memory_space<vmem>>, vector<1x6x128xf32>
      %305 = vector.extract_strided_slice %303 {offsets = [0, 1, 0], sizes = [1, 6, 128], strides = [1, 1, 1]} : vector<1x8x128xf32> to vector<1x6x128xf32>
      %306 = vector.extract_strided_slice %300 {offsets = [0, 0], sizes = [6, 128], strides = [1, 1]} : vector<8x128xf32> to vector<6x128xf32>
      %307 = vector.shape_cast %306 : vector<6x128xf32> to vector<1x6x128xf32>
      %308 = arith.mulf %305, %307 : vector<1x6x128xf32>
      %309 = arith.addf %304, %308 : vector<1x6x128xf32>
      %c0_348 = arith.constant 0 : index
      %c1_349 = arith.constant 1 : index
      %c0_350 = arith.constant 0 : index
      %310 = vector.load %arg11[%c0_348, %c1_349, %c0_350] : memref<4x8x128xf32, #tpu.memory_space<vmem>>, vector<1x6x128xf32>
      tpu.vector_store %arg11[%c0_348, %c1_349, %c0_350], %309 {strides = array<i32>} : memref<4x8x128xf32, #tpu.memory_space<vmem>>, vector<1x6x128xf32>,
      %c0_351 = arith.constant 0 : index
      %c0_352 = arith.constant 0 : index
      %c0_353 = arith.constant 0 : index
      %311 = vector.load %arg11[%c0_351, %c0_352, %c0_353] : memref<4x8x128xf32, #tpu.memory_space<vmem>>, vector<1x1x128xf32>
      %312 = vector.extract_strided_slice %303 {offsets = [0, 0, 0], sizes = [1, 1, 128], strides = [1, 1, 1]} : vector<1x8x128xf32> to vector<1x1x128xf32>
      %313 = vector.extract_strided_slice %300 {offsets = [0, 0], sizes = [1, 128], strides = [1, 1]} : vector<8x128xf32> to vector<1x128xf32>
      %314 = vector.shape_cast %313 : vector<1x128xf32> to vector<1x1x128xf32>
      %315 = arith.mulf %312, %314 : vector<1x1x128xf32>
      %316 = arith.addf %311, %315 : vector<1x1x128xf32>
      %c0_354 = arith.constant 0 : index
      %c0_355 = arith.constant 0 : index
      %c0_356 = arith.constant 0 : index
      %317 = vector.load %arg11[%c0_354, %c0_355, %c0_356] : memref<4x8x128xf32, #tpu.memory_space<vmem>>, vector<1x1x128xf32>
      tpu.vector_store %arg11[%c0_354, %c0_355, %c0_356], %316 {strides = array<i32>} : memref<4x8x128xf32, #tpu.memory_space<vmem>>, vector<1x1x128xf32>,
      %c0_357 = arith.constant 0 : index
      %c7_358 = arith.constant 7 : index
      %c0_359 = arith.constant 0 : index
      %318 = vector.load %arg11[%c0_357, %c7_358, %c0_359] : memref<4x8x128xf32, #tpu.memory_space<vmem>>, vector<1x1x128xf32>
      %319 = vector.extract_strided_slice %303 {offsets = [0, 7, 0], sizes = [1, 1, 128], strides = [1, 1, 1]} : vector<1x8x128xf32> to vector<1x1x128xf32>
      %320 = vector.extract_strided_slice %300 {offsets = [5, 0], sizes = [1, 128], strides = [1, 1]} : vector<8x128xf32> to vector<1x128xf32>
      %321 = vector.shape_cast %320 : vector<1x128xf32> to vector<1x1x128xf32>
      %322 = arith.mulf %319, %321 : vector<1x1x128xf32>
      %323 = arith.addf %318, %322 : vector<1x1x128xf32>
      %c0_360 = arith.constant 0 : index
      %c7_361 = arith.constant 7 : index
      %c0_362 = arith.constant 0 : index
      %324 = vector.load %arg11[%c0_360, %c7_361, %c0_362] : memref<4x8x128xf32, #tpu.memory_space<vmem>>, vector<1x1x128xf32>
      tpu.vector_store %arg11[%c0_360, %c7_361, %c0_362], %323 {strides = array<i32>} : memref<4x8x128xf32, #tpu.memory_space<vmem>>, vector<1x1x128xf32>,
      %325 = vector.extract_strided_slice %222 {offsets = [0, 16], sizes = [8, 4], strides = [1, 1]} : vector<8x36xf32> to vector<8x4xf32>
      %cst_363 = arith.constant dense<0.000000e+00> : vector<8x128xf32>
      %326 = tpu.matmul %325, %16, %cst_363 {dimension_numbers = #tpu.dot_dimension_numbers<[1], [0], [0], [1], [0, 0, 1, 1], [], []>} : vector<8x4xf32>, vector<4x128xf32>, vector<8x128xf32> -> vector<8x128xf32>
      %327 = vector.shape_cast %326 : vector<8x128xf32> to vector<1x8x128xf32>
      %c0_364 = arith.constant 0 : index
      %c1_365 = arith.constant 1 : index
      %c0_366 = arith.constant 0 : index
      %328 = vector.load %arg11[%c0_364, %c1_365, %c0_366] : memref<4x8x128xf32, #tpu.memory_space<vmem>>, vector<1x6x128xf32>
      %329 = vector.extract_strided_slice %327 {offsets = [0, 1, 0], sizes = [1, 6, 128], strides = [1, 1, 1]} : vector<1x8x128xf32> to vector<1x6x128xf32>
      %330 = vector.extract_strided_slice %300 {offsets = [1, 0], sizes = [6, 128], strides = [1, 1]} : vector<8x128xf32> to vector<6x128xf32>
      %331 = vector.shape_cast %330 : vector<6x128xf32> to vector<1x6x128xf32>
      %332 = arith.mulf %329, %331 : vector<1x6x128xf32>
      %333 = arith.addf %328, %332 : vector<1x6x128xf32>
      %c0_367 = arith.constant 0 : index
      %c1_368 = arith.constant 1 : index
      %c0_369 = arith.constant 0 : index
      %334 = vector.load %arg11[%c0_367, %c1_368, %c0_369] : memref<4x8x128xf32, #tpu.memory_space<vmem>>, vector<1x6x128xf32>
      tpu.vector_store %arg11[%c0_367, %c1_368, %c0_369], %333 {strides = array<i32>} : memref<4x8x128xf32, #tpu.memory_space<vmem>>, vector<1x6x128xf32>,
      %c0_370 = arith.constant 0 : index
      %c0_371 = arith.constant 0 : index
      %c0_372 = arith.constant 0 : index
      %335 = vector.load %arg11[%c0_370, %c0_371, %c0_372] : memref<4x8x128xf32, #tpu.memory_space<vmem>>, vector<1x1x128xf32>
      %336 = vector.extract_strided_slice %327 {offsets = [0, 0, 0], sizes = [1, 1, 128], strides = [1, 1, 1]} : vector<1x8x128xf32> to vector<1x1x128xf32>
      %337 = vector.extract_strided_slice %300 {offsets = [1, 0], sizes = [1, 128], strides = [1, 1]} : vector<8x128xf32> to vector<1x128xf32>
      %338 = vector.shape_cast %337 : vector<1x128xf32> to vector<1x1x128xf32>
      %339 = arith.mulf %336, %338 : vector<1x1x128xf32>
      %340 = arith.addf %335, %339 : vector<1x1x128xf32>
      %c0_373 = arith.constant 0 : index
      %c0_374 = arith.constant 0 : index
      %c0_375 = arith.constant 0 : index
      %341 = vector.load %arg11[%c0_373, %c0_374, %c0_375] : memref<4x8x128xf32, #tpu.memory_space<vmem>>, vector<1x1x128xf32>
      tpu.vector_store %arg11[%c0_373, %c0_374, %c0_375], %340 {strides = array<i32>} : memref<4x8x128xf32, #tpu.memory_space<vmem>>, vector<1x1x128xf32>,
      %c0_376 = arith.constant 0 : index
      %c7_377 = arith.constant 7 : index
      %c0_378 = arith.constant 0 : index
      %342 = vector.load %arg11[%c0_376, %c7_377, %c0_378] : memref<4x8x128xf32, #tpu.memory_space<vmem>>, vector<1x1x128xf32>
      %343 = vector.extract_strided_slice %327 {offsets = [0, 7, 0], sizes = [1, 1, 128], strides = [1, 1, 1]} : vector<1x8x128xf32> to vector<1x1x128xf32>
      %344 = vector.extract_strided_slice %300 {offsets = [6, 0], sizes = [1, 128], strides = [1, 1]} : vector<8x128xf32> to vector<1x128xf32>
      %345 = vector.shape_cast %344 : vector<1x128xf32> to vector<1x1x128xf32>
      %346 = arith.mulf %343, %345 : vector<1x1x128xf32>
      %347 = arith.addf %342, %346 : vector<1x1x128xf32>
      %c0_379 = arith.constant 0 : index
      %c7_380 = arith.constant 7 : index
      %c0_381 = arith.constant 0 : index
      %348 = vector.load %arg11[%c0_379, %c7_380, %c0_381] : memref<4x8x128xf32, #tpu.memory_space<vmem>>, vector<1x1x128xf32>
      tpu.vector_store %arg11[%c0_379, %c7_380, %c0_381], %347 {strides = array<i32>} : memref<4x8x128xf32, #tpu.memory_space<vmem>>, vector<1x1x128xf32>,
      %349 = vector.extract_strided_slice %222 {offsets = [0, 20], sizes = [8, 4], strides = [1, 1]} : vector<8x36xf32> to vector<8x4xf32>
      %cst_382 = arith.constant dense<0.000000e+00> : vector<8x128xf32>
      %350 = tpu.matmul %349, %16, %cst_382 {dimension_numbers = #tpu.dot_dimension_numbers<[1], [0], [0], [1], [0, 0, 1, 1], [], []>} : vector<8x4xf32>, vector<4x128xf32>, vector<8x128xf32> -> vector<8x128xf32>
      %351 = vector.shape_cast %350 : vector<8x128xf32> to vector<1x8x128xf32>
      %c0_383 = arith.constant 0 : index
      %c1_384 = arith.constant 1 : index
      %c0_385 = arith.constant 0 : index
      %352 = vector.load %arg11[%c0_383, %c1_384, %c0_385] : memref<4x8x128xf32, #tpu.memory_space<vmem>>, vector<1x6x128xf32>
      %353 = vector.extract_strided_slice %351 {offsets = [0, 1, 0], sizes = [1, 6, 128], strides = [1, 1, 1]} : vector<1x8x128xf32> to vector<1x6x128xf32>
      %354 = vector.extract_strided_slice %300 {offsets = [2, 0], sizes = [6, 128], strides = [1, 1]} : vector<8x128xf32> to vector<6x128xf32>
      %355 = vector.shape_cast %354 : vector<6x128xf32> to vector<1x6x128xf32>
      %356 = arith.mulf %353, %355 : vector<1x6x128xf32>
      %357 = arith.addf %352, %356 : vector<1x6x128xf32>
      %c0_386 = arith.constant 0 : index
      %c1_387 = arith.constant 1 : index
      %c0_388 = arith.constant 0 : index
      %358 = vector.load %arg11[%c0_386, %c1_387, %c0_388] : memref<4x8x128xf32, #tpu.memory_space<vmem>>, vector<1x6x128xf32>
      tpu.vector_store %arg11[%c0_386, %c1_387, %c0_388], %357 {strides = array<i32>} : memref<4x8x128xf32, #tpu.memory_space<vmem>>, vector<1x6x128xf32>,
      %c0_389 = arith.constant 0 : index
      %c0_390 = arith.constant 0 : index
      %c0_391 = arith.constant 0 : index
      %359 = vector.load %arg11[%c0_389, %c0_390, %c0_391] : memref<4x8x128xf32, #tpu.memory_space<vmem>>, vector<1x1x128xf32>
      %360 = vector.extract_strided_slice %351 {offsets = [0, 0, 0], sizes = [1, 1, 128], strides = [1, 1, 1]} : vector<1x8x128xf32> to vector<1x1x128xf32>
      %361 = vector.extract_strided_slice %300 {offsets = [2, 0], sizes = [1, 128], strides = [1, 1]} : vector<8x128xf32> to vector<1x128xf32>
      %362 = vector.shape_cast %361 : vector<1x128xf32> to vector<1x1x128xf32>
      %363 = arith.mulf %360, %362 : vector<1x1x128xf32>
      %364 = arith.addf %359, %363 : vector<1x1x128xf32>
      %c0_392 = arith.constant 0 : index
      %c0_393 = arith.constant 0 : index
      %c0_394 = arith.constant 0 : index
      %365 = vector.load %arg11[%c0_392, %c0_393, %c0_394] : memref<4x8x128xf32, #tpu.memory_space<vmem>>, vector<1x1x128xf32>
      tpu.vector_store %arg11[%c0_392, %c0_393, %c0_394], %364 {strides = array<i32>} : memref<4x8x128xf32, #tpu.memory_space<vmem>>, vector<1x1x128xf32>,
      %c0_395 = arith.constant 0 : index
      %c7_396 = arith.constant 7 : index
      %c0_397 = arith.constant 0 : index
      %366 = vector.load %arg11[%c0_395, %c7_396, %c0_397] : memref<4x8x128xf32, #tpu.memory_space<vmem>>, vector<1x1x128xf32>
      %367 = vector.extract_strided_slice %351 {offsets = [0, 7, 0], sizes = [1, 1, 128], strides = [1, 1, 1]} : vector<1x8x128xf32> to vector<1x1x128xf32>
      %368 = vector.extract_strided_slice %300 {offsets = [7, 0], sizes = [1, 128], strides = [1, 1]} : vector<8x128xf32> to vector<1x128xf32>
      %369 = vector.shape_cast %368 : vector<1x128xf32> to vector<1x1x128xf32>
      %370 = arith.mulf %367, %369 : vector<1x1x128xf32>
      %371 = arith.addf %366, %370 : vector<1x1x128xf32>
      %c0_398 = arith.constant 0 : index
      %c7_399 = arith.constant 7 : index
      %c0_400 = arith.constant 0 : index
      %372 = vector.load %arg11[%c0_398, %c7_399, %c0_400] : memref<4x8x128xf32, #tpu.memory_space<vmem>>, vector<1x1x128xf32>
      tpu.vector_store %arg11[%c0_398, %c7_399, %c0_400], %371 {strides = array<i32>} : memref<4x8x128xf32, #tpu.memory_space<vmem>>, vector<1x1x128xf32>,
      %c3 = arith.constant 3 : index
      %c0_401 = arith.constant 0 : index
      %c0_402 = arith.constant 0 : index
      %373 = vector.load %arg10[%c3, %c0_401, %c0_402] : memref<6x8x128xf32, #tpu.memory_space<vmem>>, vector<1x8x128xf32>
      %374 = vector.shape_cast %373 : vector<1x8x128xf32> to vector<8x128xf32>
      %375 = vector.extract_strided_slice %222 {offsets = [0, 24], sizes = [8, 4], strides = [1, 1]} : vector<8x36xf32> to vector<8x4xf32>
      %cst_403 = arith.constant dense<0.000000e+00> : vector<8x128xf32>
      %376 = tpu.matmul %375, %16, %cst_403 {dimension_numbers = #tpu.dot_dimension_numbers<[1], [0], [0], [1], [0, 0, 1, 1], [], []>} : vector<8x4xf32>, vector<4x128xf32>, vector<8x128xf32> -> vector<8x128xf32>
      %377 = vector.shape_cast %376 : vector<8x128xf32> to vector<1x8x128xf32>
      %c0_404 = arith.constant 0 : index
      %c1_405 = arith.constant 1 : index
      %c0_406 = arith.constant 0 : index
      %378 = vector.load %arg11[%c0_404, %c1_405, %c0_406] : memref<4x8x128xf32, #tpu.memory_space<vmem>>, vector<1x6x128xf32>
      %379 = vector.extract_strided_slice %377 {offsets = [0, 1, 0], sizes = [1, 6, 128], strides = [1, 1, 1]} : vector<1x8x128xf32> to vector<1x6x128xf32>
      %380 = vector.extract_strided_slice %374 {offsets = [0, 0], sizes = [6, 128], strides = [1, 1]} : vector<8x128xf32> to vector<6x128xf32>
      %381 = vector.shape_cast %380 : vector<6x128xf32> to vector<1x6x128xf32>
      %382 = arith.mulf %379, %381 : vector<1x6x128xf32>
      %383 = arith.addf %378, %382 : vector<1x6x128xf32>
      %c0_407 = arith.constant 0 : index
      %c1_408 = arith.constant 1 : index
      %c0_409 = arith.constant 0 : index
      %384 = vector.load %arg11[%c0_407, %c1_408, %c0_409] : memref<4x8x128xf32, #tpu.memory_space<vmem>>, vector<1x6x128xf32>
      tpu.vector_store %arg11[%c0_407, %c1_408, %c0_409], %383 {strides = array<i32>} : memref<4x8x128xf32, #tpu.memory_space<vmem>>, vector<1x6x128xf32>,
      %c0_410 = arith.constant 0 : index
      %c0_411 = arith.constant 0 : index
      %c0_412 = arith.constant 0 : index
      %385 = vector.load %arg11[%c0_410, %c0_411, %c0_412] : memref<4x8x128xf32, #tpu.memory_space<vmem>>, vector<1x1x128xf32>
      %386 = vector.extract_strided_slice %377 {offsets = [0, 0, 0], sizes = [1, 1, 128], strides = [1, 1, 1]} : vector<1x8x128xf32> to vector<1x1x128xf32>
      %387 = vector.extract_strided_slice %374 {offsets = [0, 0], sizes = [1, 128], strides = [1, 1]} : vector<8x128xf32> to vector<1x128xf32>
      %388 = vector.shape_cast %387 : vector<1x128xf32> to vector<1x1x128xf32>
      %389 = arith.mulf %386, %388 : vector<1x1x128xf32>
      %390 = arith.addf %385, %389 : vector<1x1x128xf32>
      %c0_413 = arith.constant 0 : index
      %c0_414 = arith.constant 0 : index
      %c0_415 = arith.constant 0 : index
      %391 = vector.load %arg11[%c0_413, %c0_414, %c0_415] : memref<4x8x128xf32, #tpu.memory_space<vmem>>, vector<1x1x128xf32>
      tpu.vector_store %arg11[%c0_413, %c0_414, %c0_415], %390 {strides = array<i32>} : memref<4x8x128xf32, #tpu.memory_space<vmem>>, vector<1x1x128xf32>,
      %c0_416 = arith.constant 0 : index
      %c7_417 = arith.constant 7 : index
      %c0_418 = arith.constant 0 : index
      %392 = vector.load %arg11[%c0_416, %c7_417, %c0_418] : memref<4x8x128xf32, #tpu.memory_space<vmem>>, vector<1x1x128xf32>
      %393 = vector.extract_strided_slice %377 {offsets = [0, 7, 0], sizes = [1, 1, 128], strides = [1, 1, 1]} : vector<1x8x128xf32> to vector<1x1x128xf32>
      %394 = vector.extract_strided_slice %374 {offsets = [5, 0], sizes = [1, 128], strides = [1, 1]} : vector<8x128xf32> to vector<1x128xf32>
      %395 = vector.shape_cast %394 : vector<1x128xf32> to vector<1x1x128xf32>
      %396 = arith.mulf %393, %395 : vector<1x1x128xf32>
      %397 = arith.addf %392, %396 : vector<1x1x128xf32>
      %c0_419 = arith.constant 0 : index
      %c7_420 = arith.constant 7 : index
      %c0_421 = arith.constant 0 : index
      %398 = vector.load %arg11[%c0_419, %c7_420, %c0_421] : memref<4x8x128xf32, #tpu.memory_space<vmem>>, vector<1x1x128xf32>
      tpu.vector_store %arg11[%c0_419, %c7_420, %c0_421], %397 {strides = array<i32>} : memref<4x8x128xf32, #tpu.memory_space<vmem>>, vector<1x1x128xf32>,
      %399 = vector.extract_strided_slice %222 {offsets = [0, 28], sizes = [8, 4], strides = [1, 1]} : vector<8x36xf32> to vector<8x4xf32>
      %cst_422 = arith.constant dense<0.000000e+00> : vector<8x128xf32>
      %400 = tpu.matmul %399, %16, %cst_422 {dimension_numbers = #tpu.dot_dimension_numbers<[1], [0], [0], [1], [0, 0, 1, 1], [], []>} : vector<8x4xf32>, vector<4x128xf32>, vector<8x128xf32> -> vector<8x128xf32>
      %401 = vector.shape_cast %400 : vector<8x128xf32> to vector<1x8x128xf32>
      %c0_423 = arith.constant 0 : index
      %c1_424 = arith.constant 1 : index
      %c0_425 = arith.constant 0 : index
      %402 = vector.load %arg11[%c0_423, %c1_424, %c0_425] : memref<4x8x128xf32, #tpu.memory_space<vmem>>, vector<1x6x128xf32>
      %403 = vector.extract_strided_slice %401 {offsets = [0, 1, 0], sizes = [1, 6, 128], strides = [1, 1, 1]} : vector<1x8x128xf32> to vector<1x6x128xf32>
      %404 = vector.extract_strided_slice %374 {offsets = [1, 0], sizes = [6, 128], strides = [1, 1]} : vector<8x128xf32> to vector<6x128xf32>
      %405 = vector.shape_cast %404 : vector<6x128xf32> to vector<1x6x128xf32>
      %406 = arith.mulf %403, %405 : vector<1x6x128xf32>
      %407 = arith.addf %402, %406 : vector<1x6x128xf32>
      %c0_426 = arith.constant 0 : index
      %c1_427 = arith.constant 1 : index
      %c0_428 = arith.constant 0 : index
      %408 = vector.load %arg11[%c0_426, %c1_427, %c0_428] : memref<4x8x128xf32, #tpu.memory_space<vmem>>, vector<1x6x128xf32>
      tpu.vector_store %arg11[%c0_426, %c1_427, %c0_428], %407 {strides = array<i32>} : memref<4x8x128xf32, #tpu.memory_space<vmem>>, vector<1x6x128xf32>,
      %c0_429 = arith.constant 0 : index
      %c0_430 = arith.constant 0 : index
      %c0_431 = arith.constant 0 : index
      %409 = vector.load %arg11[%c0_429, %c0_430, %c0_431] : memref<4x8x128xf32, #tpu.memory_space<vmem>>, vector<1x1x128xf32>
      %410 = vector.extract_strided_slice %401 {offsets = [0, 0, 0], sizes = [1, 1, 128], strides = [1, 1, 1]} : vector<1x8x128xf32> to vector<1x1x128xf32>
      %411 = vector.extract_strided_slice %374 {offsets = [1, 0], sizes = [1, 128], strides = [1, 1]} : vector<8x128xf32> to vector<1x128xf32>
      %412 = vector.shape_cast %411 : vector<1x128xf32> to vector<1x1x128xf32>
      %413 = arith.mulf %410, %412 : vector<1x1x128xf32>
      %414 = arith.addf %409, %413 : vector<1x1x128xf32>
      %c0_432 = arith.constant 0 : index
      %c0_433 = arith.constant 0 : index
      %c0_434 = arith.constant 0 : index
      %415 = vector.load %arg11[%c0_432, %c0_433, %c0_434] : memref<4x8x128xf32, #tpu.memory_space<vmem>>, vector<1x1x128xf32>
      tpu.vector_store %arg11[%c0_432, %c0_433, %c0_434], %414 {strides = array<i32>} : memref<4x8x128xf32, #tpu.memory_space<vmem>>, vector<1x1x128xf32>,
      %c0_435 = arith.constant 0 : index
      %c7_436 = arith.constant 7 : index
      %c0_437 = arith.constant 0 : index
      %416 = vector.load %arg11[%c0_435, %c7_436, %c0_437] : memref<4x8x128xf32, #tpu.memory_space<vmem>>, vector<1x1x128xf32>
      %417 = vector.extract_strided_slice %401 {offsets = [0, 7, 0], sizes = [1, 1, 128], strides = [1, 1, 1]} : vector<1x8x128xf32> to vector<1x1x128xf32>
      %418 = vector.extract_strided_slice %374 {offsets = [6, 0], sizes = [1, 128], strides = [1, 1]} : vector<8x128xf32> to vector<1x128xf32>
      %419 = vector.shape_cast %418 : vector<1x128xf32> to vector<1x1x128xf32>
      %420 = arith.mulf %417, %419 : vector<1x1x128xf32>
      %421 = arith.addf %416, %420 : vector<1x1x128xf32>
      %c0_438 = arith.constant 0 : index
      %c7_439 = arith.constant 7 : index
      %c0_440 = arith.constant 0 : index
      %422 = vector.load %arg11[%c0_438, %c7_439, %c0_440] : memref<4x8x128xf32, #tpu.memory_space<vmem>>, vector<1x1x128xf32>
      tpu.vector_store %arg11[%c0_438, %c7_439, %c0_440], %421 {strides = array<i32>} : memref<4x8x128xf32, #tpu.memory_space<vmem>>, vector<1x1x128xf32>,
      %423 = vector.extract_strided_slice %222 {offsets = [0, 32], sizes = [8, 4], strides = [1, 1]} : vector<8x36xf32> to vector<8x4xf32>
      %cst_441 = arith.constant dense<0.000000e+00> : vector<8x128xf32>
      %424 = tpu.matmul %423, %16, %cst_441 {dimension_numbers = #tpu.dot_dimension_numbers<[1], [0], [0], [1], [0, 0, 1, 1], [], []>} : vector<8x4xf32>, vector<4x128xf32>, vector<8x128xf32> -> vector<8x128xf32>
      %425 = vector.shape_cast %424 : vector<8x128xf32> to vector<1x8x128xf32>
      %c0_442 = arith.constant 0 : index
      %c1_443 = arith.constant 1 : index
      %c0_444 = arith.constant 0 : index
      %426 = vector.load %arg11[%c0_442, %c1_443, %c0_444] : memref<4x8x128xf32, #tpu.memory_space<vmem>>, vector<1x6x128xf32>
      %427 = vector.extract_strided_slice %425 {offsets = [0, 1, 0], sizes = [1, 6, 128], strides = [1, 1, 1]} : vector<1x8x128xf32> to vector<1x6x128xf32>
      %428 = vector.extract_strided_slice %374 {offsets = [2, 0], sizes = [6, 128], strides = [1, 1]} : vector<8x128xf32> to vector<6x128xf32>
      %429 = vector.shape_cast %428 : vector<6x128xf32> to vector<1x6x128xf32>
      %430 = arith.mulf %427, %429 : vector<1x6x128xf32>
      %431 = arith.addf %426, %430 : vector<1x6x128xf32>
      %c0_445 = arith.constant 0 : index
      %c1_446 = arith.constant 1 : index
      %c0_447 = arith.constant 0 : index
      %432 = vector.load %arg11[%c0_445, %c1_446, %c0_447] : memref<4x8x128xf32, #tpu.memory_space<vmem>>, vector<1x6x128xf32>
      tpu.vector_store %arg11[%c0_445, %c1_446, %c0_447], %431 {strides = array<i32>} : memref<4x8x128xf32, #tpu.memory_space<vmem>>, vector<1x6x128xf32>,
      %c0_448 = arith.constant 0 : index
      %c0_449 = arith.constant 0 : index
      %c0_450 = arith.constant 0 : index
      %433 = vector.load %arg11[%c0_448, %c0_449, %c0_450] : memref<4x8x128xf32, #tpu.memory_space<vmem>>, vector<1x1x128xf32>
      %434 = vector.extract_strided_slice %425 {offsets = [0, 0, 0], sizes = [1, 1, 128], strides = [1, 1, 1]} : vector<1x8x128xf32> to vector<1x1x128xf32>
      %435 = vector.extract_strided_slice %374 {offsets = [2, 0], sizes = [1, 128], strides = [1, 1]} : vector<8x128xf32> to vector<1x128xf32>
      %436 = vector.shape_cast %435 : vector<1x128xf32> to vector<1x1x128xf32>
      %437 = arith.mulf %434, %436 : vector<1x1x128xf32>
      %438 = arith.addf %433, %437 : vector<1x1x128xf32>
      %c0_451 = arith.constant 0 : index
      %c0_452 = arith.constant 0 : index
      %c0_453 = arith.constant 0 : index
      %439 = vector.load %arg11[%c0_451, %c0_452, %c0_453] : memref<4x8x128xf32, #tpu.memory_space<vmem>>, vector<1x1x128xf32>
      tpu.vector_store %arg11[%c0_451, %c0_452, %c0_453], %438 {strides = array<i32>} : memref<4x8x128xf32, #tpu.memory_space<vmem>>, vector<1x1x128xf32>,
      %c0_454 = arith.constant 0 : index
      %c7_455 = arith.constant 7 : index
      %c0_456 = arith.constant 0 : index
      %440 = vector.load %arg11[%c0_454, %c7_455, %c0_456] : memref<4x8x128xf32, #tpu.memory_space<vmem>>, vector<1x1x128xf32>
      %441 = vector.extract_strided_slice %425 {offsets = [0, 7, 0], sizes = [1, 1, 128], strides = [1, 1, 1]} : vector<1x8x128xf32> to vector<1x1x128xf32>
      %442 = vector.extract_strided_slice %374 {offsets = [7, 0], sizes = [1, 128], strides = [1, 1]} : vector<8x128xf32> to vector<1x128xf32>
      %443 = vector.shape_cast %442 : vector<1x128xf32> to vector<1x1x128xf32>
      %444 = arith.mulf %441, %443 : vector<1x1x128xf32>
      %445 = arith.addf %440, %444 : vector<1x1x128xf32>
      %c0_457 = arith.constant 0 : index
      %c7_458 = arith.constant 7 : index
      %c0_459 = arith.constant 0 : index
      %446 = vector.load %arg11[%c0_457, %c7_458, %c0_459] : memref<4x8x128xf32, #tpu.memory_space<vmem>>, vector<1x1x128xf32>
      tpu.vector_store %arg11[%c0_457, %c7_458, %c0_459], %445 {strides = array<i32>} : memref<4x8x128xf32, #tpu.memory_space<vmem>>, vector<1x1x128xf32>,
    } else {
    }
    %c2_i32 = arith.constant 2 : i32
    %209 = arith.cmpi eq, %arg1, %c2_i32 : i32
    %210 = arith.extui %209 : i1 to i32
    %c0_i32_265 = arith.constant 0 : i32
    %211 = arith.cmpi ne, %210, %c0_i32_265 : i32
    scf.if %211 {
      %222 = vector.extract_strided_slice %15 {offsets = [24, 0], sizes = [8, 36], strides = [1, 1]} : vector<32x36xf32> to vector<8x36xf32>
      %cst_277 = arith.constant 0.000000e+00 : f32
      %223 = vector.broadcast %cst_277 : f32 to vector<1x8x128xf32>
      %c3 = arith.constant 3 : index
      %c0_278 = arith.constant 0 : index
      %c0_279 = arith.constant 0 : index
      %224 = vector.load %arg11[%c3, %c0_278, %c0_279] : memref<4x8x128xf32, #tpu.memory_space<vmem>>, vector<1x8x128xf32>
      tpu.vector_store %arg11[%c3, %c0_278, %c0_279], %223 {strides = array<i32>} : memref<4x8x128xf32, #tpu.memory_space<vmem>>, vector<1x8x128xf32>,
      %c2_280 = arith.constant 2 : index
      %c0_281 = arith.constant 0 : index
      %c0_282 = arith.constant 0 : index
      %225 = vector.load %arg10[%c2_280, %c0_281, %c0_282] : memref<6x8x128xf32, #tpu.memory_space<vmem>>, vector<1x8x128xf32>
      %226 = vector.shape_cast %225 : vector<1x8x128xf32> to vector<8x128xf32>
      %227 = vector.extract_strided_slice %222 {offsets = [0, 0], sizes = [8, 4], strides = [1, 1]} : vector<8x36xf32> to vector<8x4xf32>
      %cst_283 = arith.constant dense<0.000000e+00> : vector<8x128xf32>
      %228 = tpu.matmul %227, %16, %cst_283 {dimension_numbers = #tpu.dot_dimension_numbers<[1], [0], [0], [1], [0, 0, 1, 1], [], []>} : vector<8x4xf32>, vector<4x128xf32>, vector<8x128xf32> -> vector<8x128xf32>
      %229 = vector.shape_cast %228 : vector<8x128xf32> to vector<1x8x128xf32>
      %c3_284 = arith.constant 3 : index
      %c1_285 = arith.constant 1 : index
      %c0_286 = arith.constant 0 : index
      %230 = vector.load %arg11[%c3_284, %c1_285, %c0_286] : memref<4x8x128xf32, #tpu.memory_space<vmem>>, vector<1x6x128xf32>
      %231 = vector.extract_strided_slice %229 {offsets = [0, 1, 0], sizes = [1, 6, 128], strides = [1, 1, 1]} : vector<1x8x128xf32> to vector<1x6x128xf32>
      %232 = vector.extract_strided_slice %226 {offsets = [0, 0], sizes = [6, 128], strides = [1, 1]} : vector<8x128xf32> to vector<6x128xf32>
      %233 = vector.shape_cast %232 : vector<6x128xf32> to vector<1x6x128xf32>
      %234 = arith.mulf %231, %233 : vector<1x6x128xf32>
      %235 = arith.addf %230, %234 : vector<1x6x128xf32>
      %c3_287 = arith.constant 3 : index
      %c1_288 = arith.constant 1 : index
      %c0_289 = arith.constant 0 : index
      %236 = vector.load %arg11[%c3_287, %c1_288, %c0_289] : memref<4x8x128xf32, #tpu.memory_space<vmem>>, vector<1x6x128xf32>
      tpu.vector_store %arg11[%c3_287, %c1_288, %c0_289], %235 {strides = array<i32>} : memref<4x8x128xf32, #tpu.memory_space<vmem>>, vector<1x6x128xf32>,
      %c3_290 = arith.constant 3 : index
      %c0_291 = arith.constant 0 : index
      %c0_292 = arith.constant 0 : index
      %237 = vector.load %arg11[%c3_290, %c0_291, %c0_292] : memref<4x8x128xf32, #tpu.memory_space<vmem>>, vector<1x1x128xf32>
      %238 = vector.extract_strided_slice %229 {offsets = [0, 0, 0], sizes = [1, 1, 128], strides = [1, 1, 1]} : vector<1x8x128xf32> to vector<1x1x128xf32>
      %239 = vector.extract_strided_slice %226 {offsets = [0, 0], sizes = [1, 128], strides = [1, 1]} : vector<8x128xf32> to vector<1x128xf32>
      %240 = vector.shape_cast %239 : vector<1x128xf32> to vector<1x1x128xf32>
      %241 = arith.mulf %238, %240 : vector<1x1x128xf32>
      %242 = arith.addf %237, %241 : vector<1x1x128xf32>
      %c3_293 = arith.constant 3 : index
      %c0_294 = arith.constant 0 : index
      %c0_295 = arith.constant 0 : index
      %243 = vector.load %arg11[%c3_293, %c0_294, %c0_295] : memref<4x8x128xf32, #tpu.memory_space<vmem>>, vector<1x1x128xf32>
      tpu.vector_store %arg11[%c3_293, %c0_294, %c0_295], %242 {strides = array<i32>} : memref<4x8x128xf32, #tpu.memory_space<vmem>>, vector<1x1x128xf32>,
      %c3_296 = arith.constant 3 : index
      %c7_297 = arith.constant 7 : index
      %c0_298 = arith.constant 0 : index
      %244 = vector.load %arg11[%c3_296, %c7_297, %c0_298] : memref<4x8x128xf32, #tpu.memory_space<vmem>>, vector<1x1x128xf32>
      %245 = vector.extract_strided_slice %229 {offsets = [0, 7, 0], sizes = [1, 1, 128], strides = [1, 1, 1]} : vector<1x8x128xf32> to vector<1x1x128xf32>
      %246 = vector.extract_strided_slice %226 {offsets = [5, 0], sizes = [1, 128], strides = [1, 1]} : vector<8x128xf32> to vector<1x128xf32>
      %247 = vector.shape_cast %246 : vector<1x128xf32> to vector<1x1x128xf32>
      %248 = arith.mulf %245, %247 : vector<1x1x128xf32>
      %249 = arith.addf %244, %248 : vector<1x1x128xf32>
      %c3_299 = arith.constant 3 : index
      %c7_300 = arith.constant 7 : index
      %c0_301 = arith.constant 0 : index
      %250 = vector.load %arg11[%c3_299, %c7_300, %c0_301] : memref<4x8x128xf32, #tpu.memory_space<vmem>>, vector<1x1x128xf32>
      tpu.vector_store %arg11[%c3_299, %c7_300, %c0_301], %249 {strides = array<i32>} : memref<4x8x128xf32, #tpu.memory_space<vmem>>, vector<1x1x128xf32>,
      %251 = vector.extract_strided_slice %222 {offsets = [0, 4], sizes = [8, 4], strides = [1, 1]} : vector<8x36xf32> to vector<8x4xf32>
      %cst_302 = arith.constant dense<0.000000e+00> : vector<8x128xf32>
      %252 = tpu.matmul %251, %16, %cst_302 {dimension_numbers = #tpu.dot_dimension_numbers<[1], [0], [0], [1], [0, 0, 1, 1], [], []>} : vector<8x4xf32>, vector<4x128xf32>, vector<8x128xf32> -> vector<8x128xf32>
      %253 = vector.shape_cast %252 : vector<8x128xf32> to vector<1x8x128xf32>
      %c3_303 = arith.constant 3 : index
      %c1_304 = arith.constant 1 : index
      %c0_305 = arith.constant 0 : index
      %254 = vector.load %arg11[%c3_303, %c1_304, %c0_305] : memref<4x8x128xf32, #tpu.memory_space<vmem>>, vector<1x6x128xf32>
      %255 = vector.extract_strided_slice %253 {offsets = [0, 1, 0], sizes = [1, 6, 128], strides = [1, 1, 1]} : vector<1x8x128xf32> to vector<1x6x128xf32>
      %256 = vector.extract_strided_slice %226 {offsets = [1, 0], sizes = [6, 128], strides = [1, 1]} : vector<8x128xf32> to vector<6x128xf32>
      %257 = vector.shape_cast %256 : vector<6x128xf32> to vector<1x6x128xf32>
      %258 = arith.mulf %255, %257 : vector<1x6x128xf32>
      %259 = arith.addf %254, %258 : vector<1x6x128xf32>
      %c3_306 = arith.constant 3 : index
      %c1_307 = arith.constant 1 : index
      %c0_308 = arith.constant 0 : index
      %260 = vector.load %arg11[%c3_306, %c1_307, %c0_308] : memref<4x8x128xf32, #tpu.memory_space<vmem>>, vector<1x6x128xf32>
      tpu.vector_store %arg11[%c3_306, %c1_307, %c0_308], %259 {strides = array<i32>} : memref<4x8x128xf32, #tpu.memory_space<vmem>>, vector<1x6x128xf32>,
      %c3_309 = arith.constant 3 : index
      %c0_310 = arith.constant 0 : index
      %c0_311 = arith.constant 0 : index
      %261 = vector.load %arg11[%c3_309, %c0_310, %c0_311] : memref<4x8x128xf32, #tpu.memory_space<vmem>>, vector<1x1x128xf32>
      %262 = vector.extract_strided_slice %253 {offsets = [0, 0, 0], sizes = [1, 1, 128], strides = [1, 1, 1]} : vector<1x8x128xf32> to vector<1x1x128xf32>
      %263 = vector.extract_strided_slice %226 {offsets = [1, 0], sizes = [1, 128], strides = [1, 1]} : vector<8x128xf32> to vector<1x128xf32>
      %264 = vector.shape_cast %263 : vector<1x128xf32> to vector<1x1x128xf32>
      %265 = arith.mulf %262, %264 : vector<1x1x128xf32>
      %266 = arith.addf %261, %265 : vector<1x1x128xf32>
      %c3_312 = arith.constant 3 : index
      %c0_313 = arith.constant 0 : index
      %c0_314 = arith.constant 0 : index
      %267 = vector.load %arg11[%c3_312, %c0_313, %c0_314] : memref<4x8x128xf32, #tpu.memory_space<vmem>>, vector<1x1x128xf32>
      tpu.vector_store %arg11[%c3_312, %c0_313, %c0_314], %266 {strides = array<i32>} : memref<4x8x128xf32, #tpu.memory_space<vmem>>, vector<1x1x128xf32>,
      %c3_315 = arith.constant 3 : index
      %c7_316 = arith.constant 7 : index
      %c0_317 = arith.constant 0 : index
      %268 = vector.load %arg11[%c3_315, %c7_316, %c0_317] : memref<4x8x128xf32, #tpu.memory_space<vmem>>, vector<1x1x128xf32>
      %269 = vector.extract_strided_slice %253 {offsets = [0, 7, 0], sizes = [1, 1, 128], strides = [1, 1, 1]} : vector<1x8x128xf32> to vector<1x1x128xf32>
      %270 = vector.extract_strided_slice %226 {offsets = [6, 0], sizes = [1, 128], strides = [1, 1]} : vector<8x128xf32> to vector<1x128xf32>
      %271 = vector.shape_cast %270 : vector<1x128xf32> to vector<1x1x128xf32>
      %272 = arith.mulf %269, %271 : vector<1x1x128xf32>
      %273 = arith.addf %268, %272 : vector<1x1x128xf32>
      %c3_318 = arith.constant 3 : index
      %c7_319 = arith.constant 7 : index
      %c0_320 = arith.constant 0 : index
      %274 = vector.load %arg11[%c3_318, %c7_319, %c0_320] : memref<4x8x128xf32, #tpu.memory_space<vmem>>, vector<1x1x128xf32>
      tpu.vector_store %arg11[%c3_318, %c7_319, %c0_320], %273 {strides = array<i32>} : memref<4x8x128xf32, #tpu.memory_space<vmem>>, vector<1x1x128xf32>,
      %275 = vector.extract_strided_slice %222 {offsets = [0, 8], sizes = [8, 4], strides = [1, 1]} : vector<8x36xf32> to vector<8x4xf32>
      %cst_321 = arith.constant dense<0.000000e+00> : vector<8x128xf32>
      %276 = tpu.matmul %275, %16, %cst_321 {dimension_numbers = #tpu.dot_dimension_numbers<[1], [0], [0], [1], [0, 0, 1, 1], [], []>} : vector<8x4xf32>, vector<4x128xf32>, vector<8x128xf32> -> vector<8x128xf32>
      %277 = vector.shape_cast %276 : vector<8x128xf32> to vector<1x8x128xf32>
      %c3_322 = arith.constant 3 : index
      %c1_323 = arith.constant 1 : index
      %c0_324 = arith.constant 0 : index
      %278 = vector.load %arg11[%c3_322, %c1_323, %c0_324] : memref<4x8x128xf32, #tpu.memory_space<vmem>>, vector<1x6x128xf32>
      %279 = vector.extract_strided_slice %277 {offsets = [0, 1, 0], sizes = [1, 6, 128], strides = [1, 1, 1]} : vector<1x8x128xf32> to vector<1x6x128xf32>
      %280 = vector.extract_strided_slice %226 {offsets = [2, 0], sizes = [6, 128], strides = [1, 1]} : vector<8x128xf32> to vector<6x128xf32>
      %281 = vector.shape_cast %280 : vector<6x128xf32> to vector<1x6x128xf32>
      %282 = arith.mulf %279, %281 : vector<1x6x128xf32>
      %283 = arith.addf %278, %282 : vector<1x6x128xf32>
      %c3_325 = arith.constant 3 : index
      %c1_326 = arith.constant 1 : index
      %c0_327 = arith.constant 0 : index
      %284 = vector.load %arg11[%c3_325, %c1_326, %c0_327] : memref<4x8x128xf32, #tpu.memory_space<vmem>>, vector<1x6x128xf32>
      tpu.vector_store %arg11[%c3_325, %c1_326, %c0_327], %283 {strides = array<i32>} : memref<4x8x128xf32, #tpu.memory_space<vmem>>, vector<1x6x128xf32>,
      %c3_328 = arith.constant 3 : index
      %c0_329 = arith.constant 0 : index
      %c0_330 = arith.constant 0 : index
      %285 = vector.load %arg11[%c3_328, %c0_329, %c0_330] : memref<4x8x128xf32, #tpu.memory_space<vmem>>, vector<1x1x128xf32>
      %286 = vector.extract_strided_slice %277 {offsets = [0, 0, 0], sizes = [1, 1, 128], strides = [1, 1, 1]} : vector<1x8x128xf32> to vector<1x1x128xf32>
      %287 = vector.extract_strided_slice %226 {offsets = [2, 0], sizes = [1, 128], strides = [1, 1]} : vector<8x128xf32> to vector<1x128xf32>
      %288 = vector.shape_cast %287 : vector<1x128xf32> to vector<1x1x128xf32>
      %289 = arith.mulf %286, %288 : vector<1x1x128xf32>
      %290 = arith.addf %285, %289 : vector<1x1x128xf32>
      %c3_331 = arith.constant 3 : index
      %c0_332 = arith.constant 0 : index
      %c0_333 = arith.constant 0 : index
      %291 = vector.load %arg11[%c3_331, %c0_332, %c0_333] : memref<4x8x128xf32, #tpu.memory_space<vmem>>, vector<1x1x128xf32>
      tpu.vector_store %arg11[%c3_331, %c0_332, %c0_333], %290 {strides = array<i32>} : memref<4x8x128xf32, #tpu.memory_space<vmem>>, vector<1x1x128xf32>,
      %c3_334 = arith.constant 3 : index
      %c7_335 = arith.constant 7 : index
      %c0_336 = arith.constant 0 : index
      %292 = vector.load %arg11[%c3_334, %c7_335, %c0_336] : memref<4x8x128xf32, #tpu.memory_space<vmem>>, vector<1x1x128xf32>
      %293 = vector.extract_strided_slice %277 {offsets = [0, 7, 0], sizes = [1, 1, 128], strides = [1, 1, 1]} : vector<1x8x128xf32> to vector<1x1x128xf32>
      %294 = vector.extract_strided_slice %226 {offsets = [7, 0], sizes = [1, 128], strides = [1, 1]} : vector<8x128xf32> to vector<1x128xf32>
      %295 = vector.shape_cast %294 : vector<1x128xf32> to vector<1x1x128xf32>
      %296 = arith.mulf %293, %295 : vector<1x1x128xf32>
      %297 = arith.addf %292, %296 : vector<1x1x128xf32>
      %c3_337 = arith.constant 3 : index
      %c7_338 = arith.constant 7 : index
      %c0_339 = arith.constant 0 : index
      %298 = vector.load %arg11[%c3_337, %c7_338, %c0_339] : memref<4x8x128xf32, #tpu.memory_space<vmem>>, vector<1x1x128xf32>
      tpu.vector_store %arg11[%c3_337, %c7_338, %c0_339], %297 {strides = array<i32>} : memref<4x8x128xf32, #tpu.memory_space<vmem>>, vector<1x1x128xf32>,
      %c3_340 = arith.constant 3 : index
      %c0_341 = arith.constant 0 : index
      %c0_342 = arith.constant 0 : index
      %299 = vector.load %arg10[%c3_340, %c0_341, %c0_342] : memref<6x8x128xf32, #tpu.memory_space<vmem>>, vector<1x8x128xf32>
      %300 = vector.shape_cast %299 : vector<1x8x128xf32> to vector<8x128xf32>
      %301 = vector.extract_strided_slice %222 {offsets = [0, 12], sizes = [8, 4], strides = [1, 1]} : vector<8x36xf32> to vector<8x4xf32>
      %cst_343 = arith.constant dense<0.000000e+00> : vector<8x128xf32>
      %302 = tpu.matmul %301, %16, %cst_343 {dimension_numbers = #tpu.dot_dimension_numbers<[1], [0], [0], [1], [0, 0, 1, 1], [], []>} : vector<8x4xf32>, vector<4x128xf32>, vector<8x128xf32> -> vector<8x128xf32>
      %303 = vector.shape_cast %302 : vector<8x128xf32> to vector<1x8x128xf32>
      %c3_344 = arith.constant 3 : index
      %c1_345 = arith.constant 1 : index
      %c0_346 = arith.constant 0 : index
      %304 = vector.load %arg11[%c3_344, %c1_345, %c0_346] : memref<4x8x128xf32, #tpu.memory_space<vmem>>, vector<1x6x128xf32>
      %305 = vector.extract_strided_slice %303 {offsets = [0, 1, 0], sizes = [1, 6, 128], strides = [1, 1, 1]} : vector<1x8x128xf32> to vector<1x6x128xf32>
      %306 = vector.extract_strided_slice %300 {offsets = [0, 0], sizes = [6, 128], strides = [1, 1]} : vector<8x128xf32> to vector<6x128xf32>
      %307 = vector.shape_cast %306 : vector<6x128xf32> to vector<1x6x128xf32>
      %308 = arith.mulf %305, %307 : vector<1x6x128xf32>
      %309 = arith.addf %304, %308 : vector<1x6x128xf32>
      %c3_347 = arith.constant 3 : index
      %c1_348 = arith.constant 1 : index
      %c0_349 = arith.constant 0 : index
      %310 = vector.load %arg11[%c3_347, %c1_348, %c0_349] : memref<4x8x128xf32, #tpu.memory_space<vmem>>, vector<1x6x128xf32>
      tpu.vector_store %arg11[%c3_347, %c1_348, %c0_349], %309 {strides = array<i32>} : memref<4x8x128xf32, #tpu.memory_space<vmem>>, vector<1x6x128xf32>,
      %c3_350 = arith.constant 3 : index
      %c0_351 = arith.constant 0 : index
      %c0_352 = arith.constant 0 : index
      %311 = vector.load %arg11[%c3_350, %c0_351, %c0_352] : memref<4x8x128xf32, #tpu.memory_space<vmem>>, vector<1x1x128xf32>
      %312 = vector.extract_strided_slice %303 {offsets = [0, 0, 0], sizes = [1, 1, 128], strides = [1, 1, 1]} : vector<1x8x128xf32> to vector<1x1x128xf32>
      %313 = vector.extract_strided_slice %300 {offsets = [0, 0], sizes = [1, 128], strides = [1, 1]} : vector<8x128xf32> to vector<1x128xf32>
      %314 = vector.shape_cast %313 : vector<1x128xf32> to vector<1x1x128xf32>
      %315 = arith.mulf %312, %314 : vector<1x1x128xf32>
      %316 = arith.addf %311, %315 : vector<1x1x128xf32>
      %c3_353 = arith.constant 3 : index
      %c0_354 = arith.constant 0 : index
      %c0_355 = arith.constant 0 : index
      %317 = vector.load %arg11[%c3_353, %c0_354, %c0_355] : memref<4x8x128xf32, #tpu.memory_space<vmem>>, vector<1x1x128xf32>
      tpu.vector_store %arg11[%c3_353, %c0_354, %c0_355], %316 {strides = array<i32>} : memref<4x8x128xf32, #tpu.memory_space<vmem>>, vector<1x1x128xf32>,
      %c3_356 = arith.constant 3 : index
      %c7_357 = arith.constant 7 : index
      %c0_358 = arith.constant 0 : index
      %318 = vector.load %arg11[%c3_356, %c7_357, %c0_358] : memref<4x8x128xf32, #tpu.memory_space<vmem>>, vector<1x1x128xf32>
      %319 = vector.extract_strided_slice %303 {offsets = [0, 7, 0], sizes = [1, 1, 128], strides = [1, 1, 1]} : vector<1x8x128xf32> to vector<1x1x128xf32>
      %320 = vector.extract_strided_slice %300 {offsets = [5, 0], sizes = [1, 128], strides = [1, 1]} : vector<8x128xf32> to vector<1x128xf32>
      %321 = vector.shape_cast %320 : vector<1x128xf32> to vector<1x1x128xf32>
      %322 = arith.mulf %319, %321 : vector<1x1x128xf32>
      %323 = arith.addf %318, %322 : vector<1x1x128xf32>
      %c3_359 = arith.constant 3 : index
      %c7_360 = arith.constant 7 : index
      %c0_361 = arith.constant 0 : index
      %324 = vector.load %arg11[%c3_359, %c7_360, %c0_361] : memref<4x8x128xf32, #tpu.memory_space<vmem>>, vector<1x1x128xf32>
      tpu.vector_store %arg11[%c3_359, %c7_360, %c0_361], %323 {strides = array<i32>} : memref<4x8x128xf32, #tpu.memory_space<vmem>>, vector<1x1x128xf32>,
      %325 = vector.extract_strided_slice %222 {offsets = [0, 16], sizes = [8, 4], strides = [1, 1]} : vector<8x36xf32> to vector<8x4xf32>
      %cst_362 = arith.constant dense<0.000000e+00> : vector<8x128xf32>
      %326 = tpu.matmul %325, %16, %cst_362 {dimension_numbers = #tpu.dot_dimension_numbers<[1], [0], [0], [1], [0, 0, 1, 1], [], []>} : vector<8x4xf32>, vector<4x128xf32>, vector<8x128xf32> -> vector<8x128xf32>
      %327 = vector.shape_cast %326 : vector<8x128xf32> to vector<1x8x128xf32>
      %c3_363 = arith.constant 3 : index
      %c1_364 = arith.constant 1 : index
      %c0_365 = arith.constant 0 : index
      %328 = vector.load %arg11[%c3_363, %c1_364, %c0_365] : memref<4x8x128xf32, #tpu.memory_space<vmem>>, vector<1x6x128xf32>
      %329 = vector.extract_strided_slice %327 {offsets = [0, 1, 0], sizes = [1, 6, 128], strides = [1, 1, 1]} : vector<1x8x128xf32> to vector<1x6x128xf32>
      %330 = vector.extract_strided_slice %300 {offsets = [1, 0], sizes = [6, 128], strides = [1, 1]} : vector<8x128xf32> to vector<6x128xf32>
      %331 = vector.shape_cast %330 : vector<6x128xf32> to vector<1x6x128xf32>
      %332 = arith.mulf %329, %331 : vector<1x6x128xf32>
      %333 = arith.addf %328, %332 : vector<1x6x128xf32>
      %c3_366 = arith.constant 3 : index
      %c1_367 = arith.constant 1 : index
      %c0_368 = arith.constant 0 : index
      %334 = vector.load %arg11[%c3_366, %c1_367, %c0_368] : memref<4x8x128xf32, #tpu.memory_space<vmem>>, vector<1x6x128xf32>
      tpu.vector_store %arg11[%c3_366, %c1_367, %c0_368], %333 {strides = array<i32>} : memref<4x8x128xf32, #tpu.memory_space<vmem>>, vector<1x6x128xf32>,
      %c3_369 = arith.constant 3 : index
      %c0_370 = arith.constant 0 : index
      %c0_371 = arith.constant 0 : index
      %335 = vector.load %arg11[%c3_369, %c0_370, %c0_371] : memref<4x8x128xf32, #tpu.memory_space<vmem>>, vector<1x1x128xf32>
      %336 = vector.extract_strided_slice %327 {offsets = [0, 0, 0], sizes = [1, 1, 128], strides = [1, 1, 1]} : vector<1x8x128xf32> to vector<1x1x128xf32>
      %337 = vector.extract_strided_slice %300 {offsets = [1, 0], sizes = [1, 128], strides = [1, 1]} : vector<8x128xf32> to vector<1x128xf32>
      %338 = vector.shape_cast %337 : vector<1x128xf32> to vector<1x1x128xf32>
      %339 = arith.mulf %336, %338 : vector<1x1x128xf32>
      %340 = arith.addf %335, %339 : vector<1x1x128xf32>
      %c3_372 = arith.constant 3 : index
      %c0_373 = arith.constant 0 : index
      %c0_374 = arith.constant 0 : index
      %341 = vector.load %arg11[%c3_372, %c0_373, %c0_374] : memref<4x8x128xf32, #tpu.memory_space<vmem>>, vector<1x1x128xf32>
      tpu.vector_store %arg11[%c3_372, %c0_373, %c0_374], %340 {strides = array<i32>} : memref<4x8x128xf32, #tpu.memory_space<vmem>>, vector<1x1x128xf32>,
      %c3_375 = arith.constant 3 : index
      %c7_376 = arith.constant 7 : index
      %c0_377 = arith.constant 0 : index
      %342 = vector.load %arg11[%c3_375, %c7_376, %c0_377] : memref<4x8x128xf32, #tpu.memory_space<vmem>>, vector<1x1x128xf32>
      %343 = vector.extract_strided_slice %327 {offsets = [0, 7, 0], sizes = [1, 1, 128], strides = [1, 1, 1]} : vector<1x8x128xf32> to vector<1x1x128xf32>
      %344 = vector.extract_strided_slice %300 {offsets = [6, 0], sizes = [1, 128], strides = [1, 1]} : vector<8x128xf32> to vector<1x128xf32>
      %345 = vector.shape_cast %344 : vector<1x128xf32> to vector<1x1x128xf32>
      %346 = arith.mulf %343, %345 : vector<1x1x128xf32>
      %347 = arith.addf %342, %346 : vector<1x1x128xf32>
      %c3_378 = arith.constant 3 : index
      %c7_379 = arith.constant 7 : index
      %c0_380 = arith.constant 0 : index
      %348 = vector.load %arg11[%c3_378, %c7_379, %c0_380] : memref<4x8x128xf32, #tpu.memory_space<vmem>>, vector<1x1x128xf32>
      tpu.vector_store %arg11[%c3_378, %c7_379, %c0_380], %347 {strides = array<i32>} : memref<4x8x128xf32, #tpu.memory_space<vmem>>, vector<1x1x128xf32>,
      %349 = vector.extract_strided_slice %222 {offsets = [0, 20], sizes = [8, 4], strides = [1, 1]} : vector<8x36xf32> to vector<8x4xf32>
      %cst_381 = arith.constant dense<0.000000e+00> : vector<8x128xf32>
      %350 = tpu.matmul %349, %16, %cst_381 {dimension_numbers = #tpu.dot_dimension_numbers<[1], [0], [0], [1], [0, 0, 1, 1], [], []>} : vector<8x4xf32>, vector<4x128xf32>, vector<8x128xf32> -> vector<8x128xf32>
      %351 = vector.shape_cast %350 : vector<8x128xf32> to vector<1x8x128xf32>
      %c3_382 = arith.constant 3 : index
      %c1_383 = arith.constant 1 : index
      %c0_384 = arith.constant 0 : index
      %352 = vector.load %arg11[%c3_382, %c1_383, %c0_384] : memref<4x8x128xf32, #tpu.memory_space<vmem>>, vector<1x6x128xf32>
      %353 = vector.extract_strided_slice %351 {offsets = [0, 1, 0], sizes = [1, 6, 128], strides = [1, 1, 1]} : vector<1x8x128xf32> to vector<1x6x128xf32>
      %354 = vector.extract_strided_slice %300 {offsets = [2, 0], sizes = [6, 128], strides = [1, 1]} : vector<8x128xf32> to vector<6x128xf32>
      %355 = vector.shape_cast %354 : vector<6x128xf32> to vector<1x6x128xf32>
      %356 = arith.mulf %353, %355 : vector<1x6x128xf32>
      %357 = arith.addf %352, %356 : vector<1x6x128xf32>
      %c3_385 = arith.constant 3 : index
      %c1_386 = arith.constant 1 : index
      %c0_387 = arith.constant 0 : index
      %358 = vector.load %arg11[%c3_385, %c1_386, %c0_387] : memref<4x8x128xf32, #tpu.memory_space<vmem>>, vector<1x6x128xf32>
      tpu.vector_store %arg11[%c3_385, %c1_386, %c0_387], %357 {strides = array<i32>} : memref<4x8x128xf32, #tpu.memory_space<vmem>>, vector<1x6x128xf32>,
      %c3_388 = arith.constant 3 : index
      %c0_389 = arith.constant 0 : index
      %c0_390 = arith.constant 0 : index
      %359 = vector.load %arg11[%c3_388, %c0_389, %c0_390] : memref<4x8x128xf32, #tpu.memory_space<vmem>>, vector<1x1x128xf32>
      %360 = vector.extract_strided_slice %351 {offsets = [0, 0, 0], sizes = [1, 1, 128], strides = [1, 1, 1]} : vector<1x8x128xf32> to vector<1x1x128xf32>
      %361 = vector.extract_strided_slice %300 {offsets = [2, 0], sizes = [1, 128], strides = [1, 1]} : vector<8x128xf32> to vector<1x128xf32>
      %362 = vector.shape_cast %361 : vector<1x128xf32> to vector<1x1x128xf32>
      %363 = arith.mulf %360, %362 : vector<1x1x128xf32>
      %364 = arith.addf %359, %363 : vector<1x1x128xf32>
      %c3_391 = arith.constant 3 : index
      %c0_392 = arith.constant 0 : index
      %c0_393 = arith.constant 0 : index
      %365 = vector.load %arg11[%c3_391, %c0_392, %c0_393] : memref<4x8x128xf32, #tpu.memory_space<vmem>>, vector<1x1x128xf32>
      tpu.vector_store %arg11[%c3_391, %c0_392, %c0_393], %364 {strides = array<i32>} : memref<4x8x128xf32, #tpu.memory_space<vmem>>, vector<1x1x128xf32>,
      %c3_394 = arith.constant 3 : index
      %c7_395 = arith.constant 7 : index
      %c0_396 = arith.constant 0 : index
      %366 = vector.load %arg11[%c3_394, %c7_395, %c0_396] : memref<4x8x128xf32, #tpu.memory_space<vmem>>, vector<1x1x128xf32>
      %367 = vector.extract_strided_slice %351 {offsets = [0, 7, 0], sizes = [1, 1, 128], strides = [1, 1, 1]} : vector<1x8x128xf32> to vector<1x1x128xf32>
      %368 = vector.extract_strided_slice %300 {offsets = [7, 0], sizes = [1, 128], strides = [1, 1]} : vector<8x128xf32> to vector<1x128xf32>
      %369 = vector.shape_cast %368 : vector<1x128xf32> to vector<1x1x128xf32>
      %370 = arith.mulf %367, %369 : vector<1x1x128xf32>
      %371 = arith.addf %366, %370 : vector<1x1x128xf32>
      %c3_397 = arith.constant 3 : index
      %c7_398 = arith.constant 7 : index
      %c0_399 = arith.constant 0 : index
      %372 = vector.load %arg11[%c3_397, %c7_398, %c0_399] : memref<4x8x128xf32, #tpu.memory_space<vmem>>, vector<1x1x128xf32>
      tpu.vector_store %arg11[%c3_397, %c7_398, %c0_399], %371 {strides = array<i32>} : memref<4x8x128xf32, #tpu.memory_space<vmem>>, vector<1x1x128xf32>,
      %c4 = arith.constant 4 : index
      %c0_400 = arith.constant 0 : index
      %c0_401 = arith.constant 0 : index
      %373 = vector.load %arg10[%c4, %c0_400, %c0_401] : memref<6x8x128xf32, #tpu.memory_space<vmem>>, vector<1x8x128xf32>
      %374 = vector.shape_cast %373 : vector<1x8x128xf32> to vector<8x128xf32>
      %375 = vector.extract_strided_slice %222 {offsets = [0, 24], sizes = [8, 4], strides = [1, 1]} : vector<8x36xf32> to vector<8x4xf32>
      %cst_402 = arith.constant dense<0.000000e+00> : vector<8x128xf32>
      %376 = tpu.matmul %375, %16, %cst_402 {dimension_numbers = #tpu.dot_dimension_numbers<[1], [0], [0], [1], [0, 0, 1, 1], [], []>} : vector<8x4xf32>, vector<4x128xf32>, vector<8x128xf32> -> vector<8x128xf32>
      %377 = vector.shape_cast %376 : vector<8x128xf32> to vector<1x8x128xf32>
      %c3_403 = arith.constant 3 : index
      %c1_404 = arith.constant 1 : index
      %c0_405 = arith.constant 0 : index
      %378 = vector.load %arg11[%c3_403, %c1_404, %c0_405] : memref<4x8x128xf32, #tpu.memory_space<vmem>>, vector<1x6x128xf32>
      %379 = vector.extract_strided_slice %377 {offsets = [0, 1, 0], sizes = [1, 6, 128], strides = [1, 1, 1]} : vector<1x8x128xf32> to vector<1x6x128xf32>
      %380 = vector.extract_strided_slice %374 {offsets = [0, 0], sizes = [6, 128], strides = [1, 1]} : vector<8x128xf32> to vector<6x128xf32>
      %381 = vector.shape_cast %380 : vector<6x128xf32> to vector<1x6x128xf32>
      %382 = arith.mulf %379, %381 : vector<1x6x128xf32>
      %383 = arith.addf %378, %382 : vector<1x6x128xf32>
      %c3_406 = arith.constant 3 : index
      %c1_407 = arith.constant 1 : index
      %c0_408 = arith.constant 0 : index
      %384 = vector.load %arg11[%c3_406, %c1_407, %c0_408] : memref<4x8x128xf32, #tpu.memory_space<vmem>>, vector<1x6x128xf32>
      tpu.vector_store %arg11[%c3_406, %c1_407, %c0_408], %383 {strides = array<i32>} : memref<4x8x128xf32, #tpu.memory_space<vmem>>, vector<1x6x128xf32>,
      %c3_409 = arith.constant 3 : index
      %c0_410 = arith.constant 0 : index
      %c0_411 = arith.constant 0 : index
      %385 = vector.load %arg11[%c3_409, %c0_410, %c0_411] : memref<4x8x128xf32, #tpu.memory_space<vmem>>, vector<1x1x128xf32>
      %386 = vector.extract_strided_slice %377 {offsets = [0, 0, 0], sizes = [1, 1, 128], strides = [1, 1, 1]} : vector<1x8x128xf32> to vector<1x1x128xf32>
      %387 = vector.extract_strided_slice %374 {offsets = [0, 0], sizes = [1, 128], strides = [1, 1]} : vector<8x128xf32> to vector<1x128xf32>
      %388 = vector.shape_cast %387 : vector<1x128xf32> to vector<1x1x128xf32>
      %389 = arith.mulf %386, %388 : vector<1x1x128xf32>
      %390 = arith.addf %385, %389 : vector<1x1x128xf32>
      %c3_412 = arith.constant 3 : index
      %c0_413 = arith.constant 0 : index
      %c0_414 = arith.constant 0 : index
      %391 = vector.load %arg11[%c3_412, %c0_413, %c0_414] : memref<4x8x128xf32, #tpu.memory_space<vmem>>, vector<1x1x128xf32>
      tpu.vector_store %arg11[%c3_412, %c0_413, %c0_414], %390 {strides = array<i32>} : memref<4x8x128xf32, #tpu.memory_space<vmem>>, vector<1x1x128xf32>,
      %c3_415 = arith.constant 3 : index
      %c7_416 = arith.constant 7 : index
      %c0_417 = arith.constant 0 : index
      %392 = vector.load %arg11[%c3_415, %c7_416, %c0_417] : memref<4x8x128xf32, #tpu.memory_space<vmem>>, vector<1x1x128xf32>
      %393 = vector.extract_strided_slice %377 {offsets = [0, 7, 0], sizes = [1, 1, 128], strides = [1, 1, 1]} : vector<1x8x128xf32> to vector<1x1x128xf32>
      %394 = vector.extract_strided_slice %374 {offsets = [5, 0], sizes = [1, 128], strides = [1, 1]} : vector<8x128xf32> to vector<1x128xf32>
      %395 = vector.shape_cast %394 : vector<1x128xf32> to vector<1x1x128xf32>
      %396 = arith.mulf %393, %395 : vector<1x1x128xf32>
      %397 = arith.addf %392, %396 : vector<1x1x128xf32>
      %c3_418 = arith.constant 3 : index
      %c7_419 = arith.constant 7 : index
      %c0_420 = arith.constant 0 : index
      %398 = vector.load %arg11[%c3_418, %c7_419, %c0_420] : memref<4x8x128xf32, #tpu.memory_space<vmem>>, vector<1x1x128xf32>
      tpu.vector_store %arg11[%c3_418, %c7_419, %c0_420], %397 {strides = array<i32>} : memref<4x8x128xf32, #tpu.memory_space<vmem>>, vector<1x1x128xf32>,
      %399 = vector.extract_strided_slice %222 {offsets = [0, 28], sizes = [8, 4], strides = [1, 1]} : vector<8x36xf32> to vector<8x4xf32>
      %cst_421 = arith.constant dense<0.000000e+00> : vector<8x128xf32>
      %400 = tpu.matmul %399, %16, %cst_421 {dimension_numbers = #tpu.dot_dimension_numbers<[1], [0], [0], [1], [0, 0, 1, 1], [], []>} : vector<8x4xf32>, vector<4x128xf32>, vector<8x128xf32> -> vector<8x128xf32>
      %401 = vector.shape_cast %400 : vector<8x128xf32> to vector<1x8x128xf32>
      %c3_422 = arith.constant 3 : index
      %c1_423 = arith.constant 1 : index
      %c0_424 = arith.constant 0 : index
      %402 = vector.load %arg11[%c3_422, %c1_423, %c0_424] : memref<4x8x128xf32, #tpu.memory_space<vmem>>, vector<1x6x128xf32>
      %403 = vector.extract_strided_slice %401 {offsets = [0, 1, 0], sizes = [1, 6, 128], strides = [1, 1, 1]} : vector<1x8x128xf32> to vector<1x6x128xf32>
      %404 = vector.extract_strided_slice %374 {offsets = [1, 0], sizes = [6, 128], strides = [1, 1]} : vector<8x128xf32> to vector<6x128xf32>
      %405 = vector.shape_cast %404 : vector<6x128xf32> to vector<1x6x128xf32>
      %406 = arith.mulf %403, %405 : vector<1x6x128xf32>
      %407 = arith.addf %402, %406 : vector<1x6x128xf32>
      %c3_425 = arith.constant 3 : index
      %c1_426 = arith.constant 1 : index
      %c0_427 = arith.constant 0 : index
      %408 = vector.load %arg11[%c3_425, %c1_426, %c0_427] : memref<4x8x128xf32, #tpu.memory_space<vmem>>, vector<1x6x128xf32>
      tpu.vector_store %arg11[%c3_425, %c1_426, %c0_427], %407 {strides = array<i32>} : memref<4x8x128xf32, #tpu.memory_space<vmem>>, vector<1x6x128xf32>,
      %c3_428 = arith.constant 3 : index
      %c0_429 = arith.constant 0 : index
      %c0_430 = arith.constant 0 : index
      %409 = vector.load %arg11[%c3_428, %c0_429, %c0_430] : memref<4x8x128xf32, #tpu.memory_space<vmem>>, vector<1x1x128xf32>
      %410 = vector.extract_strided_slice %401 {offsets = [0, 0, 0], sizes = [1, 1, 128], strides = [1, 1, 1]} : vector<1x8x128xf32> to vector<1x1x128xf32>
      %411 = vector.extract_strided_slice %374 {offsets = [1, 0], sizes = [1, 128], strides = [1, 1]} : vector<8x128xf32> to vector<1x128xf32>
      %412 = vector.shape_cast %411 : vector<1x128xf32> to vector<1x1x128xf32>
      %413 = arith.mulf %410, %412 : vector<1x1x128xf32>
      %414 = arith.addf %409, %413 : vector<1x1x128xf32>
      %c3_431 = arith.constant 3 : index
      %c0_432 = arith.constant 0 : index
      %c0_433 = arith.constant 0 : index
      %415 = vector.load %arg11[%c3_431, %c0_432, %c0_433] : memref<4x8x128xf32, #tpu.memory_space<vmem>>, vector<1x1x128xf32>
      tpu.vector_store %arg11[%c3_431, %c0_432, %c0_433], %414 {strides = array<i32>} : memref<4x8x128xf32, #tpu.memory_space<vmem>>, vector<1x1x128xf32>,
      %c3_434 = arith.constant 3 : index
      %c7_435 = arith.constant 7 : index
      %c0_436 = arith.constant 0 : index
      %416 = vector.load %arg11[%c3_434, %c7_435, %c0_436] : memref<4x8x128xf32, #tpu.memory_space<vmem>>, vector<1x1x128xf32>
      %417 = vector.extract_strided_slice %401 {offsets = [0, 7, 0], sizes = [1, 1, 128], strides = [1, 1, 1]} : vector<1x8x128xf32> to vector<1x1x128xf32>
      %418 = vector.extract_strided_slice %374 {offsets = [6, 0], sizes = [1, 128], strides = [1, 1]} : vector<8x128xf32> to vector<1x128xf32>
      %419 = vector.shape_cast %418 : vector<1x128xf32> to vector<1x1x128xf32>
      %420 = arith.mulf %417, %419 : vector<1x1x128xf32>
      %421 = arith.addf %416, %420 : vector<1x1x128xf32>
      %c3_437 = arith.constant 3 : index
      %c7_438 = arith.constant 7 : index
      %c0_439 = arith.constant 0 : index
      %422 = vector.load %arg11[%c3_437, %c7_438, %c0_439] : memref<4x8x128xf32, #tpu.memory_space<vmem>>, vector<1x1x128xf32>
      tpu.vector_store %arg11[%c3_437, %c7_438, %c0_439], %421 {strides = array<i32>} : memref<4x8x128xf32, #tpu.memory_space<vmem>>, vector<1x1x128xf32>,
      %423 = vector.extract_strided_slice %222 {offsets = [0, 32], sizes = [8, 4], strides = [1, 1]} : vector<8x36xf32> to vector<8x4xf32>
      %cst_440 = arith.constant dense<0.000000e+00> : vector<8x128xf32>
      %424 = tpu.matmul %423, %16, %cst_440 {dimension_numbers = #tpu.dot_dimension_numbers<[1], [0], [0], [1], [0, 0, 1, 1], [], []>} : vector<8x4xf32>, vector<4x128xf32>, vector<8x128xf32> -> vector<8x128xf32>
      %425 = vector.shape_cast %424 : vector<8x128xf32> to vector<1x8x128xf32>
      %c3_441 = arith.constant 3 : index
      %c1_442 = arith.constant 1 : index
      %c0_443 = arith.constant 0 : index
      %426 = vector.load %arg11[%c3_441, %c1_442, %c0_443] : memref<4x8x128xf32, #tpu.memory_space<vmem>>, vector<1x6x128xf32>
      %427 = vector.extract_strided_slice %425 {offsets = [0, 1, 0], sizes = [1, 6, 128], strides = [1, 1, 1]} : vector<1x8x128xf32> to vector<1x6x128xf32>
      %428 = vector.extract_strided_slice %374 {offsets = [2, 0], sizes = [6, 128], strides = [1, 1]} : vector<8x128xf32> to vector<6x128xf32>
      %429 = vector.shape_cast %428 : vector<6x128xf32> to vector<1x6x128xf32>
      %430 = arith.mulf %427, %429 : vector<1x6x128xf32>
      %431 = arith.addf %426, %430 : vector<1x6x128xf32>
      %c3_444 = arith.constant 3 : index
      %c1_445 = arith.constant 1 : index
      %c0_446 = arith.constant 0 : index
      %432 = vector.load %arg11[%c3_444, %c1_445, %c0_446] : memref<4x8x128xf32, #tpu.memory_space<vmem>>, vector<1x6x128xf32>
      tpu.vector_store %arg11[%c3_444, %c1_445, %c0_446], %431 {strides = array<i32>} : memref<4x8x128xf32, #tpu.memory_space<vmem>>, vector<1x6x128xf32>,
      %c3_447 = arith.constant 3 : index
      %c0_448 = arith.constant 0 : index
      %c0_449 = arith.constant 0 : index
      %433 = vector.load %arg11[%c3_447, %c0_448, %c0_449] : memref<4x8x128xf32, #tpu.memory_space<vmem>>, vector<1x1x128xf32>
      %434 = vector.extract_strided_slice %425 {offsets = [0, 0, 0], sizes = [1, 1, 128], strides = [1, 1, 1]} : vector<1x8x128xf32> to vector<1x1x128xf32>
      %435 = vector.extract_strided_slice %374 {offsets = [2, 0], sizes = [1, 128], strides = [1, 1]} : vector<8x128xf32> to vector<1x128xf32>
      %436 = vector.shape_cast %435 : vector<1x128xf32> to vector<1x1x128xf32>
      %437 = arith.mulf %434, %436 : vector<1x1x128xf32>
      %438 = arith.addf %433, %437 : vector<1x1x128xf32>
      %c3_450 = arith.constant 3 : index
      %c0_451 = arith.constant 0 : index
      %c0_452 = arith.constant 0 : index
      %439 = vector.load %arg11[%c3_450, %c0_451, %c0_452] : memref<4x8x128xf32, #tpu.memory_space<vmem>>, vector<1x1x128xf32>
      tpu.vector_store %arg11[%c3_450, %c0_451, %c0_452], %438 {strides = array<i32>} : memref<4x8x128xf32, #tpu.memory_space<vmem>>, vector<1x1x128xf32>,
      %c3_453 = arith.constant 3 : index
      %c7_454 = arith.constant 7 : index
      %c0_455 = arith.constant 0 : index
      %440 = vector.load %arg11[%c3_453, %c7_454, %c0_455] : memref<4x8x128xf32, #tpu.memory_space<vmem>>, vector<1x1x128xf32>
      %441 = vector.extract_strided_slice %425 {offsets = [0, 7, 0], sizes = [1, 1, 128], strides = [1, 1, 1]} : vector<1x8x128xf32> to vector<1x1x128xf32>
      %442 = vector.extract_strided_slice %374 {offsets = [7, 0], sizes = [1, 128], strides = [1, 1]} : vector<8x128xf32> to vector<1x128xf32>
      %443 = vector.shape_cast %442 : vector<1x128xf32> to vector<1x1x128xf32>
      %444 = arith.mulf %441, %443 : vector<1x1x128xf32>
      %445 = arith.addf %440, %444 : vector<1x1x128xf32>
      %c3_456 = arith.constant 3 : index
      %c7_457 = arith.constant 7 : index
      %c0_458 = arith.constant 0 : index
      %446 = vector.load %arg11[%c3_456, %c7_457, %c0_458] : memref<4x8x128xf32, #tpu.memory_space<vmem>>, vector<1x1x128xf32>
      tpu.vector_store %arg11[%c3_456, %c7_457, %c0_458], %445 {strides = array<i32>} : memref<4x8x128xf32, #tpu.memory_space<vmem>>, vector<1x1x128xf32>,
    } else {
    }
    %c0_266 = arith.constant 0 : index
    %c0_267 = arith.constant 0 : index
    %c0_268 = arith.constant 0 : index
    %212 = vector.load %arg11[%c0_266, %c0_267, %c0_268] : memref<4x8x128xf32, #tpu.memory_space<vmem>>, vector<4x8x128xf32>
    %213 = vector.shape_cast %212 : vector<4x8x128xf32> to vector<32x128xf32>
    %c0_269 = arith.constant 0 : index
    %c0_270 = arith.constant 0 : index
    %214 = vector.load %arg6[%c0_269, %c0_270] : memref<128x128xf32, #tpu.memory_space<vmem>>, vector<128x128xf32>
    %cst_271 = arith.constant dense<0.000000e+00> : vector<32x128xf32>
    %215 = tpu.matmul %213, %214, %cst_271 {dimension_numbers = #tpu.dot_dimension_numbers<[1], [0], [0], [1], [0, 0, 1, 1], [], []>} : vector<32x128xf32>, vector<128x128xf32>, vector<32x128xf32> -> vector<32x128xf32>
    %c0_272 = arith.constant 0 : index
    %c0_273 = arith.constant 0 : index
    %216 = vector.load %arg7[%c0_272, %c0_273] : memref<1x128xf32, #tpu.memory_space<vmem>>, vector<1x128xf32>
    %217 = vector.broadcast %216 : vector<1x128xf32> to vector<32x128xf32>
    %218 = arith.addf %215, %217 : vector<32x128xf32>
    %c0_274 = arith.constant 0 : index
    %c0_275 = arith.constant 0 : index
    %c0_276 = arith.constant 0 : index
    %219 = vector.load %arg9[%c0_274, %c0_275, %c0_276] : memref<1x32x128xf32, #tpu.memory_space<vmem>>, vector<1x32x128xf32>
    %220 = vector.shape_cast %219 : vector<1x32x128xf32> to vector<32x128xf32>
    %221 = vector.shape_cast %218 : vector<32x128xf32> to vector<1x32x128xf32>
    tpu.vector_store %arg9[%c0_274, %c0_275, %c0_276], %221 {strides = array<i32>} : memref<1x32x128xf32, #tpu.memory_space<vmem>>, vector<1x32x128xf32>,
    return
  }
  func.func @transform_0(%arg0: i32, %arg1: i32) -> (i32, i32, i32) {
    %c0_i32 = arith.constant 0 : i32
    %c0_i32_0 = arith.constant 0 : i32
    return %arg0, %arg1, %c0_i32 : i32, i32, i32
  }
  func.func @transform_1(%arg0: i32, %arg1: i32) -> (i32, i32, i32) {
    %c0_i32 = arith.constant 0 : i32
    %c0_i32_0 = arith.constant 0 : i32
    %c0_i32_1 = arith.constant 0 : i32
    return %arg0, %c0_i32, %c0_i32_0 : i32, i32, i32
  }
  func.func @transform_2(%arg0: i32, %arg1: i32) -> (i32, i32) {
    %c0_i32 = arith.constant 0 : i32
    %c0_i32_0 = arith.constant 0 : i32
    %c0_i32_1 = arith.constant 0 : i32
    return %c0_i32, %c0_i32_0 : i32, i32
  }
  func.func @transform_3(%arg0: i32, %arg1: i32) -> (i32, i32) {
    %c0_i32 = arith.constant 0 : i32
    %c0_i32_0 = arith.constant 0 : i32
    %c0_i32_1 = arith.constant 0 : i32
    return %c0_i32, %c0_i32_0 : i32, i32
  }
  func.func @transform_4(%arg0: i32, %arg1: i32) -> (i32, i32) {
    %c0_i32 = arith.constant 0 : i32
    %c0_i32_0 = arith.constant 0 : i32
    %c0_i32_1 = arith.constant 0 : i32
    return %c0_i32, %c0_i32_0 : i32, i32
  }
  func.func @transform_5(%arg0: i32, %arg1: i32) -> (i32, i32) {
    %c0_i32 = arith.constant 0 : i32
    %c0_i32_0 = arith.constant 0 : i32
    %c0_i32_1 = arith.constant 0 : i32
    return %c0_i32, %c0_i32_0 : i32, i32
  }
  func.func @transform_6(%arg0: i32, %arg1: i32) -> (i32, i32) {
    %c0_i32 = arith.constant 0 : i32
    %c0_i32_0 = arith.constant 0 : i32
    %c0_i32_1 = arith.constant 0 : i32
    return %c0_i32, %c0_i32_0 : i32, i32
  }
  func.func @transform_7(%arg0: i32, %arg1: i32) -> (i32, i32, i32) {
    %c0_i32 = arith.constant 0 : i32
    %c0_i32_0 = arith.constant 0 : i32
    return %arg0, %arg1, %c0_i32 : i32, i32, i32
  }
}

</mosaic_0001>

<bundles_post_ra>
// kernel: neigh_superpixel_agg_forward.1
= control target key start
LH: loop header
LB: loop body
LE: loop exit
PB: predicated region body
PF: predicated region fallthrough
CT: control target
= control target key end

     0   :  { %s5947_s0 = inlined_call_operand.vmem [shape: f32[2,96,36], index: 0, kind: input, shape index: {}]   ;;  %s5948_s1 = inlined_call_operand.vmem [shape: f32[2,112,128], index: 1, kind: input, shape index: {}]   ;;  %s5949_s2 = inlined_call_operand.vmem [shape: f32[128,128], index: 2, kind: input, shape index: {}]   ;;  %s5950_s3 = inlined_call_operand.vmem [shape: f32[1,128], index: 3, kind: input, shape index: {}]   ;;  %s5951_s4 = inlined_call_operand.vmem [shape: f32[128,128], index: 4, kind: input, shape index: {}]   ;;  %s5952_s5 = inlined_call_operand.vmem [shape: f32[1,128], index: 5, kind: input, shape index: {}]   ;;  %s5953_s6 = inlined_call_operand.vmem [shape: f32[4,128], index: 6, kind: input, shape index: {}]   ;;  %s5954_s7 = inlined_call_operand.hbm [shape: f32[2,96,128], index: 7, kind: output, shape index: {}]  }
   0x1   :  { %5968 = sst [smem:[#allocation19_spill]] %s5947_s0 }
   0x2   :  { %5969 = sst [smem:[#allocation20_spill]] %s5953_s6 }
   0x3   :  { %12 = vsyncpa [#allocation5], 0 }
   0x4   :  { %14 = vsyncpa [#allocation5 + $0x1], 0  ;;  %s5024_s24 = smov 0   ;;  %s5026_s25 = smov 0  }
   0x5   :  { %s5028_s26 = smov 0   ;;  %s5030_s27 = smov 0  }
   0x6   :  { %s5032_s28 = smov 0   ;;  %s5034_s29 = smov 0  }
   0x7   :  { %s5036_s30 = smov 0   ;;  %s5038_s8 = smov 0  }
   0x8 LB: > { %s4239_s9 = sadd.s32 4294967295, %s4966_s8   ;;  %s4240_s10 = sadd.s32 4294967294, %s4966_s8   ;;  %s4966_s8 = sphi %s5038_s8, %s20_s8   ;;  %s4962_s30 = sphi %s5036_s30, %s6033_s30   ;;  %s4958_s29 = sphi %s5034_s29, %s6032_s29   ;;  %s4954_s28 = sphi %s5032_s28, %s6031_s28   ;;  %s4950_s27 = sphi %s5030_s27, %s6030_s27   ;;  %s4946_s26 = sphi %s5028_s26, %s6029_s26   ;;  %s4942_s25 = sphi %s5026_s25, %s6028_s25   ;;  %s4938_s24 = sphi %s5024_s24, %s6027_s24  }
   0x9   : > { %s29_s11 = sadd.s32 1, %s4958_s29  ;;  %s32_s12 = sadd.s32 1, %s4962_s30 }
   0xa   : > { %p30_p0 = scmp.ge.s32.totalorder %s29_s11, 3  ;;  %p210_p1 = scmp.ne.s32.totalorder %s4946_s26, %s4942_s25 }
   0xb   : > { %p211_p2 = scmp.eq.s32.totalorder %s4239_s9, 5  ;;  %p216_p5 = scmp.ne.s32.totalorder %s4942_s25, %s4938_s24 }
   0xc   : > { %s6035_s11 = smov (%p30_p0, %s29_s11), 0  ;;  %s6037_s12 = smov (!%p30_p0, %s32_s12), %s4962_s30 }
   0xd   : > { %5970 = sst [smem:[#allocation7_spill]] %s6035_s11  ;;  %s196_s13 = ssub.s32 %s4958_s29, %s6035_s11 }
   0xe   : > { %p5075_p3 = por %p211_p2, %p210_p1  ;;  %p34_p4 = scmp.ge.s32.totalorder %s6037_s12, 2 }
   0xf   : > { %p217_p6 = scmp.eq.s32.totalorder %s4240_s10, 5  ;;  %p4243_p7 = scmp.ge.s32.totalorder %s4966_s8, 1 }
  0x10   : > { %s6039_s12 = smov (%p34_p4, %s6037_s12), 0  ;;  %p271_p9 = scmp.lt.s32.totalorder %s4966_s8, 7 }
  0x11   : > { %5972 = sst [smem:[#allocation8_spill]] %s6039_s12  ;;  %p5084_p8 = por %p217_p6, %p216_p5 }
  0x12   : > { %s195_s16 = ssub.s32 %s4962_s30, %s6039_s12  ;;  %s200_s17 = sadd.s32 1, %s4946_s26 }
  0x13   : > { %s197_s18 = sor.u32 %s196_s13, %s195_s16  ;;  %p272_p10 = pnand %p4243_p7, %p271_p9 }
  0x14   : > { %p198_p11 = scmp.eq.s32.totalorder %s197_s18, 0 }
  0x15   : > { %275 = sbr.rel (%p272_p10) target bundleno = 1350 (0x546), region = 48 }
  0x16   : > { %s5093_s19 = scalar_select %p198_p11, %s4946_s26, %s200_s17  }
  0x1c   : > { %s5096_s20 = sshll.u32 %s4950_s27, 2  ;;  %p313_p12 = scmp.lt.s32.totalorder %s4954_s28, 1  ;;  %v336_v0 = vld [vmem:[%s5949_s2] sm:$0xff]  ;;  %v337_v1 = vld [vmem:[%s5949_s2 + $0x8] sm:$0xff]  ;;  %v338_v2 = vld [vmem:[%s5949_s2 + $0x10] sm:$0xff]  ;;  %vm482_vm0 = vcmask 1043456  }
  0x1d   : > { %p315_p13 = scmp.lt.s32.totalorder %s5096_s20, 11  ;;  %v4703_v3 = vpack.c.bf16 %v337_v1, %v336_v0  ;;  %v339_v4 = vld [vmem:[%s5949_s2 + $0x18] sm:$0xff]  ;;  %v340_v6 = vld [vmem:[%s5949_s2 + $0x20] sm:$0xff]  ;;  %v341_v7 = vld [vmem:[%s5949_s2 + $0x28] sm:$0xff]  ;;  %s5974_s6 = sld [smem:[#allocation20_spill]]  ;;  %vm469_vm1 = vcmask 31744  }
  0x1e   : > { %s5113_s18 = scalar_select %p313_p12, %s4954_s28, 1  ;;  %v4707_v5 = vpack.c.bf16 %v339_v4, %v338_v2  ;;  %v4711_v8 = vpack.c.bf16 %v341_v7, %v340_v6  ;;  %v342_v10 = vld [vmem:[%s5949_s2 + $0x30] sm:$0xff]  ;;  %v343_v11 = vld [vmem:[%s5949_s2 + $0x38] sm:$0xff]  ;;  %v344_v15 = vld [vmem:[%s5949_s2 + $0x40] sm:$0xff]  ;;  %v4976_v37 = vmov 0.0  }
  0x1f   : > { %s316_s10 = scalar_select %p315_p13, %s5096_s20, 11  ;;  %4704 = vmatprep.subr.bf16.mxu0 %v4703_v3  ;;  %v4715_v14 = vpack.c.bf16 %v343_v11, %v342_v10  ;;  %v345_v16 = vld [vmem:[%s5949_s2 + $0x48] sm:$0xff]  ;;  %v346_v20 = vld [vmem:[%s5949_s2 + $0x50] sm:$0xff]  ;;  %v347_v21 = vld [vmem:[%s5949_s2 + $0x58] sm:$0xff]  ;;  %461 = vst [vmem:[#allocation3 + $0x8] sm:$0xff] %v4976_v37 }
  0x20   : > { %s4783_s13 = smul.u32 12, %s5113_s18  ;;  %4706 = vmatpush3.bf16.msra.mxu0 %v4703_v3  ;;  %s5975_s0 = sld [smem:[#allocation19_spill]]  ;;  %v4719_v19 = vpack.c.bf16 %v345_v16, %v344_v15  ;;  %v4723_v23 = vpack.c.bf16 %v347_v21, %v346_v20  ;;  %v348_v24 = vld [vmem:[%s5949_s2 + $0x60] sm:$0xff]  ;;  %v349_v25 = vld [vmem:[%s5949_s2 + $0x68] sm:$0xff]  ;;  %v350_v27 = vld [vmem:[%s5949_s2 + $0x70] sm:$0xff]  ;;  %460 = vst [vmem:[#allocation3] sm:$0xff] %v4976_v37 }
  0x21   : > { %4708 = vmatprep.subr.bf16.mxu0 %v4707_v5  ;;  %s4784_s16 = smul.u32 112, %s5113_s18  ;;  %s4248_s17 = sshll.u32 %s4950_s27, 5  ;;  %v4727_v26 = vpack.c.bf16 %v349_v25, %v348_v24  ;;  %v351_v28 = vld [vmem:[%s5949_s2 + $0x78] sm:$0xff]  ;;  %462 = vst [vmem:[#allocation3 + $0x10] sm:$0xff] %v4976_v37  ;;  %463 = vst [vmem:[#allocation3 + $0x18] sm:$0xff] %v4976_v37 }
  0x22   : > { %s318_s12 = sadd.s32 %s4783_s13, %s316_s10  ;;  %s5957_s13 = sand.u32 1, %s4942_s25   ;;  %v4731_v29 = vpack.c.bf16 %v351_v28, %v350_v27 }
  0x23   : > { %v5126_v9 = vld [vmem:[%s5974_s6] sm:$0xf]  ;;  %s4246_s11 = sshll.u32 %s318_s12, 3  ;;  %s4968_s12 = smov 124  }
  0x24   : > { %4503 = vmatprep.subr.msk.mxu1 %vm482_vm0, %v5126_v9  ;;  %4710 = vmatpush3.bf16.msra.mxu0 %v4707_v5  ;;  %s326_s6 = scalar_lea.vmem %s5948_s1, %s4784_s16  ;;  %s4975_s22 = smov 96  }
  0x25   : > { %4504 = vmatpush3.msk.msra.mxu1 %vm482_vm0, %v5126_v9  ;;  %4712 = vmatprep.subr.bf16.mxu0 %v4711_v8  ;;  %p4295_p0 = scmp.ne.s32.totalorder %s4950_s27, 0 }
  0x26   : > { %s320_s10 = scalar_lea.vmem %s5975_s0, %s4246_s11  ;;  %4511 = vmatprep.subr.msk.mxu1 %vm482_vm0, %v5126_v9  ;;  %s5152_s11 = sshll.u32 %s5957_s13, 5  ;;  %v616_v21 = vld [vmem:[#allocation3 + $0x8] sm:$0x1]  ;;  %vm4978_vm2 = vmmov (!%p4295_p0), 0  }
  0x27   : > { %v5143_v12 = vld [vmem:[%s320_s10] sm:$0xff]  ;;  %v5145_v13 = vld [vmem:[%s320_s10 + $0x10] sm:$0xff]  ;;  %v5161_v17 = vld [vmem:[%s320_s10 + $0x8] sm:$0xff]  ;;  %s4970_s0 = smov 116   ;;  %s4971_s13 = smov 112  }
  0x28   : > { %679 = vrot.lane.b32.xlu0 %v5143_v12, %s4968_s12  ;;  %683 = vrot.lane.b32.xlu1 %v5145_v13, %s4968_s12  ;;  %v5163_v18 = vld [vmem:[%s320_s10 + $0x18] sm:$0xff]  ;;  %s5176_s10 = scalar_lea.vmem %s326_s6, %s4248_s17  ;;  %s4969_s6 = smov 120  }
  0x29   : > { %5976 = vst [vmem:[#allocation9_spill] sm:$0xff] %v5163_v18  ;;  %4505 = vmatprep.mubr.msk.f32.mxu1 %vm469_vm1, %v5143_v12  ;;  %4714 = vmatpush3.bf16.msra.mxu0 %v4711_v8  ;;  %v330_v22 = vld [vmem:[%s5176_s10] sm:$0xff]  ;;  %v331_v30 = vld [vmem:[%s5176_s10 + $0x8] sm:$0xff]  ;;  %v332_v31 = vld [vmem:[%s5176_s10 + $0x10] sm:$0xff]  ;;  %s5694_s16 = scalar_lea.vmem [#allocation4], %s5152_s11 }
  0x2a   : > { %4506 = vmatmul.mubr.msk.f32.vlgmr.msra.gmra.mrb[0].mxu1 %vm469_vm1, %v5161_v17  ;;  %4716 = vmatprep.subr.bf16.mxu0 %v4715_v14  ;;  %v333_v32 = vld [vmem:[%s5176_s10 + $0x18] sm:$0xff]  ;;  %v334_v33 = vld [vmem:[%s5176_s10 + $0x20] sm:$0xff]  ;;  %v335_v34 = vld [vmem:[%s5176_s10 + $0x28] sm:$0xff]  ;;  %s4974_s10 = smov 100  }
  0x2b   : > { %4508 = vmatprep.mubr.msk.f32.mxu1 %vm469_vm1, %v5145_v13  ;;  %4494 = vmatprep.mubr.f32.mxu0 %v330_v22  ;;  %v4249_v8 = vld [vmem:[%s5950_s3] ss:$0 sm:$0xff]  ;;  %v615_v22 = vld [vmem:[#allocation3] sm:$0x1] }
  0x2c   : > { %681 = vrot.lane.b32.xlu0 %v5161_v17, %s4968_s12  ;;  %685 = vrot.lane.b32.xlu1 %v5163_v18, %s4968_s12  ;;  %s4973_s12 = smov 104  }
  0x2d   : > { %4512 = vmatpush3.msk.msra.mxu1 %vm482_vm0, %v5126_v9  ;;  %4718 = vmatpush3.bf16.msra.mxu0 %v4715_v14 }
  0x2e   : > { %4509 = vmatmul.mubr.msk.f32.gmra.mrb[2].mxu1 %vm469_vm1, %v5163_v18  ;;  %4720 = vmatprep.subr.bf16.mxu0 %v4719_v19 }
  0x2f   : > { %4519 = vmatprep.subr.msk.mxu1 %vm482_vm0, %v5126_v9 }
  0x30   : > { %888 = vrot.lane.b32.xlu0 %v5143_v12, %s4969_s6  ;;  %890 = vrot.lane.b32.xlu1 %v5161_v17, %s4969_s6 }
  0x31   : > { %4722 = vmatpush3.bf16.msra.mxu0 %v4719_v19 }
  0x32   : > { %4724 = vmatprep.subr.bf16.mxu0 %v4723_v23 }
  0x34   : > { %892 = vrot.lane.b32.xlu0 %v5145_v13, %s4969_s6  ;;  %894 = vrot.lane.b32.xlu1 %v5163_v18, %s4969_s6  ;;  %s4972_s6 = smov 108  }
  0x35   : > { %4726 = vmatpush3.bf16.msra.mxu0 %v4723_v23 }
  0x36   : > { %4728 = vmatprep.subr.bf16.mxu0 %v4727_v26 }
  0x38   : > { %1097 = vrot.lane.b32.xlu0 %v5143_v12, %s4970_s0  ;;  %1099 = vrot.lane.b32.xlu1 %v5161_v17, %s4970_s0 }
  0x39   : > { %4730 = vmatpush3.bf16.msra.mxu0 %v4727_v26 }
  0x3a   : > { %4732 = vmatprep.subr.bf16.mxu0 %v4731_v29 }
  0x3c   : > { %1101 = vrot.lane.b32.xlu0 %v5145_v13, %s4970_s0  ;;  %1103 = vrot.lane.b32.xlu1 %v5163_v18, %s4970_s0 }
  0x3d   : > { %4734 = vmatpush3.bf16.msra.mxu0 %v4731_v29 }
  0x3e   : > { %4551 = vmatprep.subr.msk.mxu0 %vm482_vm0, %v5126_v9 }
  0x40   : > { %1307 = vrot.lane.b32.xlu0 %v5143_v12, %s4971_s13  ;;  %1309 = vrot.lane.b32.xlu1 %v5161_v17, %s4971_s13 }
  0x41   : > { %4495 = vmatmul.mubr.f32.vlgmr.msra.gmra.mrb[0].mxu0 %v331_v30 }
  0x42   : > { %4497 = vmatprep.mubr.f32.mxu0 %v332_v31  ;;  %4552 = vmatpush3.msk.msra.mxu0 %vm482_vm0, %v5126_v9 }
  0x43   : > { %4567 = vmatprep.subr.msk.mxu0 %vm482_vm0, %v5126_v9 }
  0x44   : > { %1311 = vrot.lane.b32.xlu0 %v5145_v13, %s4971_s13  ;;  %1313 = vrot.lane.b32.xlu1 %v5163_v18, %s4971_s13 }
  0x45   : > { %4498 = vmatmul.mubr.f32.gmra.mrb[2].mxu0 %v333_v32 }
  0x46   : > { %4500 = vmatprep.mubr.f32.mxu0 %v334_v33 }
  0x48   : > { %1516 = vrot.lane.b32.xlu0 %v5143_v12, %s4972_s6  ;;  %1518 = vrot.lane.b32.xlu1 %v5161_v17, %s4972_s6 }
  0x49   : > { %4501 = vmatmul.mubr.f32.gmra.mrb[4].mxu0 %v335_v34  ;;  %v572_v34 = vld [vmem:[#allocation3 + $0x9] sm:$0x3f] }
  0x4c   : > { %1520 = vrot.lane.b32.xlu0 %v5145_v13, %s4972_s6  ;;  %1522 = vrot.lane.b32.xlu1 %v5163_v18, %s4972_s6 }
  0x50   : > { %1725 = vrot.lane.b32.xlu0 %v5143_v12, %s4973_s12  ;;  %1727 = vrot.lane.b32.xlu1 %v5161_v17, %s4973_s12 }
  0x54   : > { %1729 = vrot.lane.b32.xlu0 %v5145_v13, %s4973_s12  ;;  %1731 = vrot.lane.b32.xlu1 %v5163_v18, %s4973_s12 }
  0x58   : > { %1935 = vrot.lane.b32.xlu0 %v5143_v12, %s4974_s10  ;;  %1937 = vrot.lane.b32.xlu1 %v5161_v17, %s4974_s10 }
  0x5c   : > { %1939 = vrot.lane.b32.xlu0 %v5145_v13, %s4974_s10  ;;  %1941 = vrot.lane.b32.xlu1 %v5163_v18, %s4974_s10 }
  0x60   : > { %2144 = vrot.lane.b32.xlu0 %v5143_v12, %s4975_s22  ;;  %2146 = vrot.lane.b32.xlu1 %v5161_v17, %s4975_s22 }
  0x64   : > { %2148 = vrot.lane.b32.xlu0 %v5145_v13, %s4975_s22  ;;  %2150 = vrot.lane.b32.xlu1 %v5163_v18, %s4975_s22 }
  0x9a   : > { %v5243_v35 = vpop.permute.xlu0 %679  ;;  %v684_v36 = vpop.permute.xlu1 %683 }
  0x9b   : > { %4513 = vmatprep.mubr.msk.f32.mxu1 %vm469_vm1, %v5243_v35 }
  0x9e   : > { %v682_v38 = vpop.permute.xlu0 %681  ;;  %v5247_v39 = vpop.permute.xlu1 %685 }
  0x9f   : > { %5977 = vst [vmem:[#allocation10_spill] sm:$0xff] %v5247_v39  ;;  %4514 = vmatmul.mubr.msk.f32.vlgmr.msra.gmra.mrb[4].mxu1 %vm469_vm1, %v682_v38 }
  0xa0   : > { %4516 = vmatprep.mubr.msk.f32.mxu1 %vm469_vm1, %v684_v36  ;;  %4520 = vmatpush3.msk.msra.mxu1 %vm482_vm0, %v5126_v9  ;;  %v636_v36 = vld [vmem:[#allocation3 + $0xf] sm:$0x1] }
  0xa1   : > { %4527 = vmatprep.subr.msk.mxu1 %vm482_vm0, %v5126_v9 }
  0xa2   : > { %v5255_v40 = vpop.permute.xlu0 %888  ;;  %v891_v41 = vpop.permute.xlu1 %890 }
  0xa3   : > { %4517 = vmatmul.mubr.msk.f32.gmra.mrb[6].mxu1 %vm469_vm1, %v5247_v39 }
  0xa4   : > { %4521 = vmatprep.mubr.msk.f32.mxu1 %vm469_vm1, %v5255_v40 }
  0xa6   : > { %v893_v42 = vpop.permute.xlu0 %892  ;;  %v5261_v43 = vpop.permute.xlu1 %894 }
  0xa7   : > { %5978 = vst [vmem:[#allocation11_spill] sm:$0xff] %v5261_v43  ;;  %4522 = vmatmul.mubr.msk.f32.vlgmr.msra.gmra.mrb[8].mxu1 %vm469_vm1, %v891_v41 }
  0xa8   : > { %4524 = vmatprep.mubr.msk.f32.mxu1 %vm469_vm1, %v893_v42  ;;  %4528 = vmatpush3.msk.msra.mxu1 %vm482_vm0, %v5126_v9 }
  0xa9   : > { %4535 = vmatprep.subr.msk.mxu1 %vm482_vm0, %v5126_v9 }
  0xaa   : > { %v5269_v44 = vpop.permute.xlu0 %1097  ;;  %v1100_v45 = vpop.permute.xlu1 %1099 }
  0xab   : > { %4525 = vmatmul.mubr.msk.f32.gmra.mrb[10].mxu1 %vm469_vm1, %v5261_v43 }
  0xac   : > { %4529 = vmatprep.mubr.msk.f32.mxu1 %vm469_vm1, %v5269_v44 }
  0xae   : > { %v1102_v46 = vpop.permute.xlu0 %1101  ;;  %v5275_v47 = vpop.permute.xlu1 %1103 }
  0xaf   : > { %5979 = vst [vmem:[#allocation12_spill] sm:$0xff] %v5275_v47  ;;  %4530 = vmatmul.mubr.msk.f32.vlgmr.msra.gmra.mrb[12].mxu1 %vm469_vm1, %v1100_v45 }
  0xb0   : > { %4532 = vmatprep.mubr.msk.f32.mxu1 %vm469_vm1, %v1102_v46  ;;  %4536 = vmatpush3.msk.msra.mxu1 %vm482_vm0, %v5126_v9 }
  0xb1   : > { %4543 = vmatprep.subr.msk.mxu1 %vm482_vm0, %v5126_v9 }
  0xb2   : > { %v5283_v48 = vpop.permute.xlu0 %1307  ;;  %v1310_v49 = vpop.permute.xlu1 %1309 }
  0xb3   : > { %4533 = vmatmul.mubr.msk.f32.gmra.mrb[14].mxu1 %vm469_vm1, %v5275_v47 }
  0xb4   : > { %4537 = vmatprep.mubr.msk.f32.mxu1 %vm469_vm1, %v5283_v48 }
  0xb6   : > { %v1312_v50 = vpop.permute.xlu0 %1311  ;;  %v5289_v51 = vpop.permute.xlu1 %1313 }
  0xb7   : > { %5980 = vst [vmem:[#allocation13_spill] sm:$0xff] %v5289_v51  ;;  %4538 = vmatmul.mubr.msk.f32.vlgmr.msra.gmra.mrb[16].mxu1 %vm469_vm1, %v1310_v49  ;;  %v571_v49 = vld [vmem:[#allocation3 + $0x1] sm:$0x3f] }
  0xb8   : > { %4540 = vmatprep.mubr.msk.f32.mxu1 %vm469_vm1, %v1312_v50  ;;  %4544 = vmatpush3.msk.msra.mxu1 %vm482_vm0, %v5126_v9 }
  0xb9   : > { %4559 = vmatprep.subr.msk.mxu1 %vm482_vm0, %v5126_v9 }
  0xba   : > { %v5297_v52 = vpop.permute.xlu0 %1516  ;;  %v1519_v53 = vpop.permute.xlu1 %1518 }
  0xbb   : > { %4541 = vmatmul.mubr.msk.f32.gmra.mrb[18].mxu1 %vm469_vm1, %v5289_v51 }
  0xbc   : > { %4545 = vmatprep.mubr.msk.f32.mxu1 %vm469_vm1, %v5297_v52 }
  0xbe   : > { %v1521_v54 = vpop.permute.xlu0 %1520  ;;  %v5303_v55 = vpop.permute.xlu1 %1522 }
  0xbf   : > { %5981 = vst [vmem:[#allocation14_spill] sm:$0xff] %v5303_v55  ;;  %4546 = vmatmul.mubr.msk.f32.vlgmr.msra.gmra.mrb[20].mxu1 %vm469_vm1, %v1519_v53  ;;  %v618_v53 = vld [vmem:[#allocation3 + $0x18] sm:$0x1] }
  0xc0   : > { %4548 = vmatprep.mubr.msk.f32.mxu1 %vm469_vm1, %v1521_v54  ;;  %4560 = vmatpush3.msk.msra.mxu1 %vm482_vm0, %v5126_v9 }
  0xc2   : > { %v5309_v56 = vpop.permute.xlu0 %1725  ;;  %v1728_v57 = vpop.permute.xlu1 %1727 }
  0xc3   : > { %4549 = vmatmul.mubr.msk.f32.gmra.mrb[22].mxu1 %vm469_vm1, %v5303_v55  ;;  %4553 = vmatprep.mubr.msk.f32.mxu0 %vm469_vm1, %v5309_v56 }
  0xc4   : > { %4554 = vmatmul.mubr.msk.f32.vlgmr.msra.gmra.mrb[6].mxu0 %vm469_vm1, %v1728_v57 }
  0xc5   : > { %4568 = vmatpush3.msk.msra.mxu0 %vm482_vm0, %v5126_v9 }
  0xc6   : > { %v1730_v58 = vpop.permute.xlu0 %1729  ;;  %v5318_v59 = vpop.permute.xlu1 %1731 }
  0xc7   : > { %5982 = vst [vmem:[#allocation15_spill] sm:$0xff] %v5318_v59  ;;  %4556 = vmatprep.mubr.msk.f32.mxu0 %vm469_vm1, %v1730_v58  ;;  %v635_v58 = vld [vmem:[#allocation3 + $0x7] sm:$0x1] }
  0xc8   : > { %4557 = vmatmul.mubr.msk.f32.gmra.mrb[8].mxu0 %vm469_vm1, %v5318_v59 }
  0xca   : > { %v5323_v60 = vpop.permute.xlu0 %1935  ;;  %v1938_v61 = vpop.permute.xlu1 %1937 }
  0xcb   : > { %4561 = vmatprep.mubr.msk.f32.mxu1 %vm469_vm1, %v5323_v60 }
  0xcc   : > { %4562 = vmatmul.mubr.msk.f32.vlgmr.msra.gmra.mrb[24].mxu1 %vm469_vm1, %v1938_v61 }
  0xce   : > { %v1940_v62 = vpop.permute.xlu0 %1939  ;;  %v5328_v63 = vpop.permute.xlu1 %1941 }
  0xcf   : > { %5983 = vst [vmem:[#allocation16_spill] sm:$0xff] %v5328_v63  ;;  %4564 = vmatprep.mubr.msk.f32.mxu1 %vm469_vm1, %v1940_v62 }
  0xd0   : > { %4565 = vmatmul.mubr.msk.f32.gmra.mrb[26].mxu1 %vm469_vm1, %v5328_v63 }
  0xd2   : > { %v5333_v0 = vpop.permute.xlu0 %2144  ;;  %v2147_v1 = vpop.permute.xlu1 %2146 }
  0xd3   : > { %5984 = vst [vmem:[#allocation17_spill] sm:$0xff] %v5333_v0  ;;  %4569 = vmatprep.mubr.msk.f32.mxu0 %vm469_vm1, %v5333_v0 }
  0xd4   : > { %4570 = vmatmul.mubr.msk.f32.vlgmr.msra.gmra.mrb[10].mxu0 %vm469_vm1, %v2147_v1 }
  0xd6   : > { %v2149_v2 = vpop.permute.xlu0 %2148  ;;  %v5338_v3 = vpop.permute.xlu1 %2150 }
  0xd7   : > { %5985 = vst [vmem:[#allocation18_spill] sm:$0xff] %v5338_v3  ;;  %4572 = vmatprep.mubr.msk.f32.mxu0 %vm469_vm1, %v2149_v2 }
  0xd8   : > { %4573 = vmatmul.mubr.msk.f32.gmra.mrb[12].mxu0 %vm469_vm1, %v5338_v3 }
  0xfd   : > { %v4507_v4 = vpop.f32.mrb[0].mxu1 }
  0xfe   : > { %v552_v5 = vpop.f32.mrb[1].mxu1 }
 0x101   : > { %v5343_v6 = vpop.f32.mrb[2].mxu1 }
 0x102   : > { %v5345_v7 = vpop.f32.mrb[3].mxu1 }
 0x114   : > { %v4496_v10 = vpop.f32.mrb[0].mxu0 }
 0x115   : > { %v431_v11 = vadd.f32 %v4496_v10, %v4249_v8  ;;  %v425_v13 = vpop.f32.mrb[1].mxu0 }
 0x116   : > { %v426_v14 = vadd.f32 %v4249_v8, %v425_v13 }
 0x117   : > { %455 = vst [vmem:[#allocation2 + $0x8] sm:$0xff] %v431_v11 }
 0x118   : > { %454 = vst [vmem:[#allocation2] sm:$0xff] %v426_v14  ;;  %v4499_v15 = vpop.f32.mrb[2].mxu0 }
 0x119   : > { %v441_v16 = vadd.f32 %v4499_v15, %v4249_v8  ;;  %v435_v17 = vpop.f32.mrb[3].mxu0 }
 0x11a   : > { %v436_v19 = vadd.f32 %v4249_v8, %v435_v17 }
 0x11b   : > { %457 = vst [vmem:[#allocation2 + $0x18] sm:$0xff] %v441_v16 }
 0x11c   : > { %456 = vst [vmem:[#allocation2 + $0x10] sm:$0xff] %v436_v19  ;;  %v4502_v20 = vpop.f32.mrb[4].mxu0 }
 0x11d   : > { %v451_v23 = vadd.f32 %v4502_v20, %v4249_v8  ;;  %v445_v24 = vpop.f32.mrb[5].mxu0 }
 0x11e   : > { %v576_v25 = vld [vmem:[#allocation2 + $0x8] sm:$0x3f]  ;;  %v446_v28 = vadd.f32 %v4249_v8, %v445_v24 }
 0x11f   : > { %v620_v26 = vld [vmem:[#allocation2 + $0x8] sm:$0x1]  ;;  %v640_v27 = vld [vmem:[#allocation2 + $0xd] sm:$0x1]  ;;  %v584_v29 = vrot.slane %v576_v25, 7  ;;  %459 = vst [vmem:[#allocation2 + $0x28] sm:$0xff] %v451_v23 }
 0x120   : > { %v624_v30 = vmul.f32 %v4507_v4, %v620_v26  ;;  %v648_v31 = vrot.slane %v640_v27, 1  ;;  %v575_v32 = vld [vmem:[#allocation2] sm:$0x3f]  ;;  %458 = vst [vmem:[#allocation2 + $0x20] sm:$0xff] %v446_v28  ;;  %v574_v25 = vld [vmem:[#allocation3 + $0x19] sm:$0x3f] }
 0x121   : > { %v619_v33 = vld [vmem:[#allocation2] sm:$0x1]  ;;  %v583_v37 = vrot.slane %v575_v32, 7  ;;  %v639_v41 = vld [vmem:[#allocation2 + $0x5] sm:$0x1]  ;;  %v592_v42 = vmul.f32 %v4507_v4, %v584_v29 }
 0x122   : > { %v623_v38 = vmul.f32 %v619_v33, %v552_v5  ;;  %v628_v45 = vadd.f32 %v624_v30, %v616_v21  ;;  %v656_v46 = vmul.f32 %v4507_v4, %v648_v31  ;;  %v647_v50 = vrot.slane %v639_v41, 1  ;;  %v578_v61 = vld [vmem:[#allocation2 + $0x18] sm:$0x3f]  ;;  %v617_v28 = vld [vmem:[#allocation3 + $0x10] sm:$0x1] }
 0x123   : > { %v591_v54 = vmul.f32 %v583_v37, %v552_v5  ;;  %v622_v62 = vld [vmem:[#allocation2 + $0x18] sm:$0x1]  ;;  %v642_v1 = vld [vmem:[#allocation2 + $0x1d] sm:$0x1]  ;;  %v600_v2 = vrot.slane %v592_v42, 1  ;;  %v586_v11 = vrot.slane %v578_v61, 7 }
 0x124   : > { %v627_v57 = vadd.f32 %v623_v38, %v615_v22  ;;  %632 = vst [vmem:[#allocation3 + $0x8] sm:$0x1] %v628_v45  ;;  %v664_v8 = vrot.slane %v656_v46, 7  ;;  %v655_v10 = vmul.f32 %v647_v50, %v552_v5  ;;  %v577_v13 = vld [vmem:[#allocation2 + $0x10] sm:$0x3f]  ;;  %v626_v15 = vmul.f32 %v5343_v6, %v622_v62 }
 0x125   : > { %v599_v14 = vrot.slane %v591_v54, 1  ;;  %v650_v4 = vrot.slane %v642_v1, 1  ;;  %v585_v16 = vrot.slane %v577_v13, 7  ;;  %v621_v17 = vld [vmem:[#allocation2 + $0x10] sm:$0x1]  ;;  %v608_v19 = vadd.f32 %v600_v2, %v572_v34 }
 0x126   : > { %631 = vst [vmem:[#allocation3] sm:$0x1] %v627_v57  ;;  %v672_v20 = vadd.f32 %v664_v8, %v636_v36  ;;  %v663_v21 = vrot.slane %v655_v10, 7  ;;  %v594_v22 = vmul.f32 %v5343_v6, %v586_v11  ;;  %v641_v23 = vld [vmem:[#allocation2 + $0x15] sm:$0x1]  ;;  %v630_v26 = vadd.f32 %v626_v15, %v618_v53 }
 0x127   : > { %v607_v24 = vadd.f32 %v599_v14, %v571_v49  ;;  %v658_v5 = vmul.f32 %v5343_v6, %v650_v4  ;;  %v593_v27 = vmul.f32 %v585_v16, %v5345_v7  ;;  %612 = vst [vmem:[#allocation3 + $0x9] sm:$0x3f] %v608_v19  ;;  %v638_v31 = vld [vmem:[#allocation3 + $0x1f] sm:$0x1]  ;;  %v573_v32 = vld [vmem:[#allocation3 + $0x11] sm:$0x3f]  ;;  %v625_v33 = vmul.f32 %v621_v17, %v5345_v7 }
 0x128   : > { %676 = vst [vmem:[#allocation3 + $0xf] sm:$0x1] %v672_v20  ;;  %v671_v29 = vadd.f32 %v663_v21, %v635_v58  ;;  %v602_v30 = vrot.slane %v594_v22, 1  ;;  %v649_v34 = vrot.slane %v641_v23, 1  ;;  %634 = vst [vmem:[#allocation3 + $0x18] sm:$0x1] %v630_v26 }
 0x129   : > { %611 = vst [vmem:[#allocation3 + $0x1] sm:$0x3f] %v607_v24  ;;  %v666_v36 = vrot.slane %v658_v5, 7  ;;  %v601_v37 = vrot.slane %v593_v27, 1  ;;  %v629_v41 = vadd.f32 %v625_v33, %v617_v28  ;;  %v637_v46 = vld [vmem:[#allocation3 + $0x17] sm:$0x1] }
 0x12a   : > { %675 = vst [vmem:[#allocation3 + $0x7] sm:$0x1] %v671_v29  ;;  %v610_v38 = vadd.f32 %v602_v30, %v574_v25  ;;  %v657_v6 = vmul.f32 %v649_v34, %v5345_v7  ;;  %v785_v53 = vld [vmem:[#allocation2 + $0x9] sm:$0x3f]  ;;  %v5356_v57 = vld [vmem:[#allocation2 + $0x1] sm:$0x3f] }
 0x12b   : > { %v674_v42 = vadd.f32 %v666_v36, %v638_v31  ;;  %v609_v45 = vadd.f32 %v601_v37, %v573_v32  ;;  %633 = vst [vmem:[#allocation3 + $0x10] sm:$0x1] %v629_v41  ;;  %v849_v54 = vld [vmem:[#allocation2 + $0xe] sm:$0x1]  ;;  %v5358_v58 = vld [vmem:[#allocation2 + $0x6] sm:$0x1] }
 0x12c   : > { %614 = vst [vmem:[#allocation3 + $0x19] sm:$0x3f] %v610_v38  ;;  %v665_v49 = vrot.slane %v657_v6, 7  ;;  %v5360_v61 = vld [vmem:[#allocation2 + $0x19] sm:$0x3f]  ;;  %v793_v7 = vrot.slane %v785_v53, 7 }
 0x12d   : > { %678 = vst [vmem:[#allocation3 + $0x1f] sm:$0x1] %v674_v42  ;;  %613 = vst [vmem:[#allocation3 + $0x11] sm:$0x3f] %v609_v45  ;;  %v5362_v62 = vld [vmem:[#allocation2 + $0x1e] sm:$0x1] }
 0x12e   : > { %v673_v50 = vadd.f32 %v665_v49, %v637_v46  ;;  %v857_v1 = vrot.slane %v849_v54, 1  ;;  %v792_v2 = vrot.slane %v5356_v57, 7  ;;  %v5365_v8 = vld [vmem:[#allocation2 + $0x11] sm:$0x3f]  ;;  %v5369_v11 = vld [vmem:[#allocation2 + $0xa] sm:$0x3f] }
 0x12f   : > { %v5367_v10 = vld [vmem:[#allocation2 + $0x16] sm:$0x1]  ;;  %v5371_v13 = vld [vmem:[#allocation2 + $0xf] sm:$0x1]  ;;  %v5373_v14 = vld [vmem:[#allocation2 + $0x2] sm:$0x3f] }
 0x130   : > { %677 = vst [vmem:[#allocation3 + $0x17] sm:$0x1] %v673_v50  ;;  %v5375_v15 = vld [vmem:[#allocation2 + $0x7] sm:$0x1]  ;;  %v5377_v4 = vld [vmem:[#allocation2 + $0x1a] sm:$0x3f] }
 0x131   : > { %v856_v16 = vrot.slane %v5358_v58, 1  ;;  %v5381_v19 = vld [vmem:[#allocation2 + $0x1f] sm:$0x1]  ;;  %v5383_v20 = vld [vmem:[#allocation2 + $0x12] sm:$0x3f] }
 0x132   : > { %v5395_v30 = vld [vmem:[#allocation2 + $0x17] sm:$0x1]  ;;  %v5397_v31 = vld [vmem:[#allocation2 + $0x10] sm:$0x3f]  ;;  %v5401_v33 = vld [vmem:[#allocation2 + $0x8] sm:$0x3f] }
 0x133   : > { %v5399_v32 = vld [vmem:[#allocation2 + $0x15] sm:$0x1]  ;;  %v5403_v34 = vld [vmem:[#allocation2 + $0xd] sm:$0x1]  ;;  %v5405_v36 = vld [vmem:[#allocation2 + $0x20] sm:$0x3f] }
 0x134   : > { %v5407_v37 = vld [vmem:[#allocation2 + $0x25] sm:$0x1]  ;;  %v5409_v38 = vld [vmem:[#allocation2 + $0x18] sm:$0x3f]  ;;  %v5413_v6 = vld [vmem:[#allocation2 + $0x11] sm:$0x3f] }
 0x135   : > { %v5411_v41 = vld [vmem:[#allocation2 + $0x1d] sm:$0x1]  ;;  %v5415_v42 = vld [vmem:[#allocation2 + $0x16] sm:$0x1]  ;;  %v829_v45 = vld [vmem:[#allocation2 + $0x9] sm:$0x1] }
 0x136   : > { %v5421_v54 = vld [vmem:[#allocation2 + $0x9] sm:$0x3f]  ;;  %v828_v57 = vld [vmem:[#allocation2 + $0x1] sm:$0x1]  ;;  %v825_v26 = vld [vmem:[#allocation3 + $0x8] sm:$0x1] }
 0x137   : > { %v5427_v5 = vld [vmem:[#allocation2 + $0xe] sm:$0x1]  ;;  %v5432_v25 = vld [vmem:[#allocation2 + $0x21] sm:$0x3f]  ;;  %v781_v24 = vld [vmem:[#allocation3 + $0x9] sm:$0x3f] }
 0x138   : > { %v824_v28 = vld [vmem:[#allocation3] sm:$0x1]  ;;  %v5435_v21 = vld [vmem:[#allocation2 + $0x26] sm:$0x1]  ;;  %v845_v17 = vld [vmem:[#allocation3 + $0xf] sm:$0x1] }
 0x139   : > { %v780_v3 = vld [vmem:[#allocation3 + $0x1] sm:$0x3f]  ;;  %v831_v50 = vld [vmem:[#allocation2 + $0x19] sm:$0x1]  ;;  %v827_v39 = vld [vmem:[#allocation3 + $0x18] sm:$0x1] }
 0x13a   : > { %v830_v18 = vld [vmem:[#allocation2 + $0x11] sm:$0x1]  ;;  %v1487_v0 = vrot.slane %v5435_v21, 1  ;;  %v782_v53 = vld [vmem:[#allocation3 + $0x11] sm:$0x3f] }
 0x172   : > { %v4515_v46 = vpop.f32.mrb[4].mxu1 }
 0x173   : > { %v801_v58 = vmul.f32 %v4515_v46, %v793_v7  ;;  %v833_v23 = vmul.f32 %v4515_v46, %v829_v45  ;;  %v865_v29 = vmul.f32 %v4515_v46, %v857_v1  ;;  %v761_v22 = vpop.f32.mrb[5].mxu1  ;;  %v844_v7 = vld [vmem:[#allocation3 + $0x7] sm:$0x1] }
 0x174   : > { %v800_v63 = vmul.f32 %v792_v2, %v761_v22  ;;  %v832_v49 = vmul.f32 %v828_v57, %v761_v22  ;;  %v864_v59 = vmul.f32 %v856_v16, %v761_v22  ;;  %v783_v22 = vld [vmem:[#allocation3 + $0x19] sm:$0x3f]  ;;  %v5986_v57 = vrot.slane %v5360_v61, 7 }
 0x175   : > { %v809_v55 = vrot.slane %v801_v58, 1  ;;  %v837_v51 = vadd.f32 %v833_v23, %v825_v26  ;;  %v873_v47 = vrot.slane %v865_v29, 7  ;;  %v5442_v29 = vld [vmem:[#allocation2 + $0x19] sm:$0x3f] }
 0x176   : > { %v808_v45 = vrot.slane %v800_v63, 1  ;;  %v836_v46 = vadd.f32 %v832_v49, %v824_v28  ;;  %v872_v43 = vrot.slane %v864_v59, 7  ;;  %v4518_v27 = vpop.f32.mrb[6].mxu1  ;;  %v847_v59 = vld [vmem:[#allocation3 + $0x1f] sm:$0x1]  ;;  %v5987_v28 = vrot.slane %v5362_v62, 1 }
 0x177   : > { %v817_v2 = vadd.f32 %v809_v55, %v781_v24  ;;  %841 = vst [vmem:[#allocation3 + $0x8] sm:$0x1] %v837_v51  ;;  %v881_v16 = vadd.f32 %v873_v47, %v845_v17  ;;  %v803_v58 = vmul.f32 %v4518_v27, %v5986_v57  ;;  %v835_v23 = vmul.f32 %v4518_v27, %v831_v50  ;;  %v771_v26 = vpop.f32.mrb[7].mxu1  ;;  %v826_v47 = vld [vmem:[#allocation3 + $0x10] sm:$0x1] }
 0x178   : > { %v816_v1 = vadd.f32 %v808_v45, %v780_v3  ;;  %840 = vst [vmem:[#allocation3] sm:$0x1] %v836_v46  ;;  %v880_v63 = vadd.f32 %v872_v43, %v844_v7  ;;  %v867_v49 = vmul.f32 %v4518_v27, %v5987_v28  ;;  %v5988_v55 = vrot.slane %v5365_v8, 7  ;;  %v846_v50 = vld [vmem:[#allocation3 + $0x17] sm:$0x1] }
 0x179   : > { %821 = vst [vmem:[#allocation3 + $0x9] sm:$0x3f] %v817_v2  ;;  %885 = vst [vmem:[#allocation3 + $0xf] sm:$0x1] %v881_v16  ;;  %v811_v61 = vrot.slane %v803_v58, 1  ;;  %v839_v17 = vadd.f32 %v835_v23, %v827_v39  ;;  %v834_v24 = vmul.f32 %v830_v18, %v771_v26  ;;  %v5989_v57 = vrot.slane %v5367_v10, 1 }
 0x17a   : > { %v802_v51 = vmul.f32 %v5988_v55, %v771_v26  ;;  %v5450_v45 = vld [vmem:[#allocation2 + $0x1e] sm:$0x1]  ;;  %820 = vst [vmem:[#allocation3 + $0x1] sm:$0x3f] %v816_v1  ;;  %884 = vst [vmem:[#allocation3 + $0x7] sm:$0x1] %v880_v63 }
 0x17b   : > { %v866_v3 = vmul.f32 %v5989_v57, %v771_v26  ;;  %v875_v43 = vrot.slane %v867_v49, 7  ;;  %v4523_v27 = vpop.f32.mrb[8].mxu1  ;;  %v1422_v8 = vrot.slane %v5442_v29, 7  ;;  %v5453_v7 = vld [vmem:[#allocation2 + $0x12] sm:$0x3f]  ;;  %v819_v46 = vadd.f32 %v811_v61, %v783_v22 }
 0x17c   : > { %v810_v62 = vrot.slane %v802_v51, 1  ;;  %843 = vst [vmem:[#allocation3 + $0x18] sm:$0x1] %v839_v17  ;;  %v838_v2 = vadd.f32 %v834_v24, %v826_v47  ;;  %v5990_v18 = vrot.slane %v5369_v11, 7  ;;  %v970_v10 = vpop.f32.mrb[9].mxu1  ;;  %v5991_v1 = vrot.slane %v5371_v13, 1 }
 0x17d   : > { %v874_v39 = vrot.slane %v866_v3, 7  ;;  %v883_v58 = vadd.f32 %v875_v43, %v847_v59  ;;  %v1038_v26 = vld [vmem:[#allocation2 + $0xa] sm:$0x1]  ;;  %v1037_v28 = vld [vmem:[#allocation2 + $0x2] sm:$0x1]  ;;  %v1486_v49 = vrot.slane %v5450_v45, 1 }
 0x17e   : > { %v1010_v16 = vmul.f32 %v4523_v27, %v5990_v18  ;;  %v818_v23 = vadd.f32 %v810_v62, %v782_v53  ;;  %v1074_v63 = vmul.f32 %v4523_v27, %v5991_v1  ;;  %823 = vst [vmem:[#allocation3 + $0x19] sm:$0x3f] %v819_v46  ;;  %842 = vst [vmem:[#allocation3 + $0x10] sm:$0x1] %v838_v2  ;;  %v5992_v51 = vrot.slane %v5373_v14, 7  ;;  %v4526_v3 = vpop.f32.mrb[10].mxu1 }
 0x17f   : > { %v882_v55 = vadd.f32 %v874_v39, %v846_v50  ;;  %v1042_v22 = vmul.f32 %v4523_v27, %v1038_v26  ;;  %v1630_v11 = vrot.slane %v5453_v7, 7  ;;  %v5463_v61 = vld [vmem:[#allocation2 + $0x17] sm:$0x1]  ;;  %v5465_v59 = vld [vmem:[#allocation2 + $0xa] sm:$0x3f]  ;;  %v1041_v17 = vmul.f32 %v1037_v28, %v970_v10  ;;  %v980_v18 = vpop.f32.mrb[11].mxu1 }
 0x180   : > { %v1009_v47 = vmul.f32 %v5992_v51, %v970_v10  ;;  %887 = vst [vmem:[#allocation3 + $0x1f] sm:$0x1] %v883_v58  ;;  %822 = vst [vmem:[#allocation3 + $0x11] sm:$0x3f] %v818_v23  ;;  %v1018_v13 = vrot.slane %v1010_v16, 1  ;;  %v5993_v24 = vrot.slane %v5375_v15, 1 }
 0x181   : > { %v1034_v53 = vld [vmem:[#allocation3 + $0x8] sm:$0x1]  ;;  %v1040_v50 = vld [vmem:[#allocation2 + $0x1a] sm:$0x1]  ;;  %v5469_v43 = vld [vmem:[#allocation2 + $0xf] sm:$0x1] }
 0x182   : > { %v1073_v57 = vmul.f32 %v5993_v24, %v970_v10  ;;  %886 = vst [vmem:[#allocation3 + $0x17] sm:$0x1] %v882_v55  ;;  %v1046_v14 = vadd.f32 %v1042_v22, %v1034_v53  ;;  %v1082_v62 = vrot.slane %v1074_v63, 7  ;;  %v1017_v27 = vrot.slane %v1009_v47, 1  ;;  %v1033_v46 = vld [vmem:[#allocation3] sm:$0x1] }
 0x183   : > { %v5994_v2 = vrot.slane %v5377_v4, 7  ;;  %v990_v58 = vld [vmem:[#allocation3 + $0x9] sm:$0x3f]  ;;  %v1054_v16 = vld [vmem:[#allocation3 + $0xf] sm:$0x1]  ;;  %v1045_v23 = vadd.f32 %v1041_v17, %v1033_v46  ;;  %v5995_v15 = vrot.slane %v5381_v19, 1  ;;  %v1044_v53 = vmul.f32 %v4526_v3, %v1040_v50 }
 0x184   : > { %v1081_v26 = vrot.slane %v1073_v57, 7  ;;  %v5996_v1 = vrot.slane %v5383_v20, 7  ;;  %v1039_v51 = vld [vmem:[#allocation2 + $0x12] sm:$0x1]  ;;  %v1026_v55 = vadd.f32 %v1018_v13, %v990_v58  ;;  %1050 = vst [vmem:[#allocation3 + $0x8] sm:$0x1] %v1046_v14  ;;  %v1090_v63 = vadd.f32 %v1082_v62, %v1054_v16 }
 0x185   : > { %v1012_v39 = vmul.f32 %v4526_v3, %v5994_v2  ;;  %v1076_v10 = vmul.f32 %v4526_v3, %v5995_v15  ;;  %v989_v22 = vld [vmem:[#allocation3 + $0x1] sm:$0x3f]  ;;  %v1053_v47 = vld [vmem:[#allocation3 + $0x7] sm:$0x1]  ;;  %v1694_v4 = vrot.slane %v5463_v61, 1  ;;  %v4531_v57 = vpop.f32.mrb[12].mxu1  ;;  %v1043_v14 = vmul.f32 %v1039_v51, %v980_v18 }
 0x186   : > { %v1011_v28 = vmul.f32 %v5996_v1, %v980_v18  ;;  %v1025_v24 = vadd.f32 %v1017_v27, %v989_v22  ;;  %1049 = vst [vmem:[#allocation3] sm:$0x1] %v1045_v23  ;;  %v1089_v2 = vadd.f32 %v1081_v26, %v1053_v47  ;;  %v1036_v17 = vld [vmem:[#allocation3 + $0x18] sm:$0x1]  ;;  %v1629_v19 = vrot.slane %v5465_v59, 7  ;;  %v1179_v3 = vpop.f32.mrb[13].mxu1 }
 0x187   : > { %1030 = vst [vmem:[#allocation3 + $0x9] sm:$0x3f] %v1026_v55  ;;  %1094 = vst [vmem:[#allocation3 + $0xf] sm:$0x1] %v1090_v63  ;;  %v1020_v20 = vrot.slane %v1012_v39, 1  ;;  %v1048_v13 = vadd.f32 %v1044_v53, %v1036_v17  ;;  %v5997_v62 = vrot.slane %v5395_v30, 1 }
 0x188   : > { %v5482_v50 = vld [vmem:[#allocation2 + $0x22] sm:$0x3f]  ;;  %1029 = vst [vmem:[#allocation3 + $0x1] sm:$0x3f] %v1025_v24  ;;  %1093 = vst [vmem:[#allocation3 + $0x7] sm:$0x1] %v1089_v2 }
 0x189   : > { %v1075_v58 = vmul.f32 %v5997_v62, %v980_v18  ;;  %v5484_v27 = vld [vmem:[#allocation2 + $0x27] sm:$0x1]  ;;  %v992_v16 = vld [vmem:[#allocation3 + $0x19] sm:$0x3f]  ;;  %v1084_v23 = vrot.slane %v1076_v10, 7  ;;  %v1019_v26 = vrot.slane %v1011_v28, 1 }
 0x18a   : > { %v1035_v15 = vld [vmem:[#allocation3 + $0x10] sm:$0x1]  ;;  %v5998_v1 = vrot.slane %v5397_v31, 7  ;;  %v1248_v39 = vld [vmem:[#allocation2 + $0x10] sm:$0x1]  ;;  %v5999_v51 = vrot.slane %v5399_v32, 1  ;;  %v1028_v30 = vadd.f32 %v1020_v20, %v992_v16 }
 0x18b   : > { %1052 = vst [vmem:[#allocation3 + $0x18] sm:$0x1] %v1048_v13  ;;  %v1056_v18 = vld [vmem:[#allocation3 + $0x1f] sm:$0x1]  ;;  %v991_v22 = vld [vmem:[#allocation3 + $0x11] sm:$0x3f]  ;;  %v1047_v47 = vadd.f32 %v1043_v14, %v1035_v15  ;;  %v1252_v13 = vmul.f32 %v4531_v57, %v1248_v39 }
 0x18c   : > { %v1220_v55 = vmul.f32 %v4531_v57, %v5998_v1  ;;  %v1284_v63 = vmul.f32 %v4531_v57, %v5999_v51  ;;  %v1083_v53 = vrot.slane %v1075_v58, 7  ;;  %v6000_v24 = vrot.slane %v5401_v33, 7  ;;  %v1055_v28 = vld [vmem:[#allocation3 + $0x17] sm:$0x1]  ;;  %v1247_v62 = vld [vmem:[#allocation2 + $0x8] sm:$0x1] }
 0x18d   : > { %v1092_v17 = vadd.f32 %v1084_v23, %v1056_v18  ;;  %v1027_v10 = vadd.f32 %v1019_v26, %v991_v22  ;;  %v6001_v31 = vrot.slane %v5403_v34, 1  ;;  %v4534_v46 = vpop.f32.mrb[14].mxu1  ;;  %1032 = vst [vmem:[#allocation3 + $0x19] sm:$0x3f] %v1028_v30  ;;  %1051 = vst [vmem:[#allocation3 + $0x10] sm:$0x1] %v1047_v47  ;;  %v1251_v15 = vmul.f32 %v1247_v62, %v1179_v3 }
 0x18e   : > { %v1219_v2 = vmul.f32 %v6000_v24, %v1179_v3  ;;  %v1091_v20 = vadd.f32 %v1083_v53, %v1055_v28  ;;  %v6002_v14 = vrot.slane %v5405_v36, 7  ;;  %v1250_v16 = vld [vmem:[#allocation2 + $0x20] sm:$0x1]  ;;  %v1189_v33 = vpop.f32.mrb[15].mxu1  ;;  %v5498_v26 = vld [vmem:[#allocation2 + $0x1a] sm:$0x3f] }
 0x18f   : > { %v1283_v1 = vmul.f32 %v6001_v31, %v1179_v3  ;;  %1096 = vst [vmem:[#allocation3 + $0x1f] sm:$0x1] %v1092_v17  ;;  %1031 = vst [vmem:[#allocation3 + $0x11] sm:$0x3f] %v1027_v10  ;;  %v1244_v34 = vld [vmem:[#allocation3 + $0x8] sm:$0x1]  ;;  %v1254_v10 = vmul.f32 %v4534_v46, %v1250_v16 }
 0x190   : > { %v1222_v58 = vmul.f32 %v4534_v46, %v6002_v14  ;;  %v6003_v51 = vrot.slane %v5407_v37, 1  ;;  %v5502_v30 = vld [vmem:[#allocation2 + $0x1f] sm:$0x1]  ;;  %v5504_v22 = vld [vmem:[#allocation2 + $0x18] sm:$0x3f]  ;;  %v1228_v36 = vrot.slane %v1220_v55, 1  ;;  %v1256_v57 = vadd.f32 %v1252_v13, %v1244_v34 }
 0x191   : > { %1095 = vst [vmem:[#allocation3 + $0x17] sm:$0x1] %v1091_v20  ;;  %v1292_v39 = vrot.slane %v1284_v63, 7  ;;  %v1227_v47 = vrot.slane %v1219_v2, 1  ;;  %v1243_v53 = vld [vmem:[#allocation3] sm:$0x1] }
 0x192   : > { %v1286_v18 = vmul.f32 %v4534_v46, %v6003_v51  ;;  %v1199_v24 = vld [vmem:[#allocation3 + $0x9] sm:$0x3f]  ;;  %v1264_v28 = vld [vmem:[#allocation3 + $0xf] sm:$0x1]  ;;  %v1255_v31 = vadd.f32 %v1251_v15, %v1243_v53  ;;  %v1291_v17 = vrot.slane %v1283_v1, 7  ;;  %v6004_v3 = vrot.slane %v5409_v38, 7 }
 0x193   : > { %v1249_v37 = vld [vmem:[#allocation2 + $0x18] sm:$0x1]  ;;  %v1236_v14 = vadd.f32 %v1228_v36, %v1199_v24  ;;  %1260 = vst [vmem:[#allocation3 + $0x8] sm:$0x1] %v1256_v57  ;;  %v1300_v51 = vadd.f32 %v1292_v39, %v1264_v28  ;;  %v1198_v23 = vld [vmem:[#allocation3 + $0x1] sm:$0x3f] }
 0x194   : > { %v1221_v62 = vmul.f32 %v6004_v3, %v1189_v33  ;;  %v1263_v32 = vld [vmem:[#allocation3 + $0x7] sm:$0x1]  ;;  %v1230_v20 = vrot.slane %v1222_v58, 1  ;;  %v6005_v55 = vrot.slane %v5411_v41, 1  ;;  %v4539_v2 = vpop.f32.mrb[16].mxu1  ;;  %v1235_v13 = vadd.f32 %v1227_v47, %v1198_v23 }
 0x195   : > { %1259 = vst [vmem:[#allocation3] sm:$0x1] %v1255_v31  ;;  %v1299_v34 = vadd.f32 %v1291_v17, %v1263_v32  ;;  %v1246_v15 = vld [vmem:[#allocation3 + $0x18] sm:$0x1]  ;;  %v1294_v1 = vrot.slane %v1286_v18, 7  ;;  %v1389_v46 = vpop.f32.mrb[17].mxu1  ;;  %v1253_v36 = vmul.f32 %v1249_v37, %v1189_v33 }
 0x196   : > { %v1285_v63 = vmul.f32 %v6005_v55, %v1189_v33  ;;  %v1631_v38 = vrot.slane %v5498_v26, 7  ;;  %1240 = vst [vmem:[#allocation3 + $0x9] sm:$0x3f] %v1236_v14  ;;  %1304 = vst [vmem:[#allocation3 + $0xf] sm:$0x1] %v1300_v51  ;;  %v1258_v16 = vadd.f32 %v1254_v10, %v1246_v15  ;;  %v1695_v57 = vrot.slane %v5502_v30, 1 }
 0x197   : > { %v1840_v58 = vrot.slane %v5504_v22, 7  ;;  %v5513_v39 = vld [vmem:[#allocation2 + $0x1d] sm:$0x1]  ;;  %v5515_v41 = vld [vmem:[#allocation2 + $0x10] sm:$0x3f]  ;;  %v1229_v23 = vrot.slane %v1221_v62, 1 }
 0x198   : > { %1239 = vst [vmem:[#allocation3 + $0x1] sm:$0x3f] %v1235_v13  ;;  %1303 = vst [vmem:[#allocation3 + $0x7] sm:$0x1] %v1299_v34  ;;  %v1201_v32 = vld [vmem:[#allocation3 + $0x19] sm:$0x3f] }
 0x199   : > { %v1245_v18 = vld [vmem:[#allocation3 + $0x10] sm:$0x1]  ;;  %v6006_v47 = vrot.slane %v5413_v6, 7  ;;  %v4542_v24 = vpop.f32.mrb[18].mxu1  ;;  %v1238_v28 = vadd.f32 %v1230_v20, %v1201_v32  ;;  %1262 = vst [vmem:[#allocation3 + $0x18] sm:$0x1] %v1258_v16 }
 0x19a   : > { %v1266_v33 = vld [vmem:[#allocation3 + $0x1f] sm:$0x1]  ;;  %v1200_v31 = vld [vmem:[#allocation3 + $0x11] sm:$0x3f]  ;;  %v1257_v17 = vadd.f32 %v1253_v36, %v1245_v18  ;;  %v1293_v10 = vrot.slane %v1285_v63, 7  ;;  %v6007_v3 = vrot.slane %v5415_v42, 1 }
 0x19b   : > { %v1429_v53 = vmul.f32 %v4539_v2, %v6006_v47  ;;  %v1302_v14 = vadd.f32 %v1294_v1, %v1266_v33  ;;  %v1237_v51 = vadd.f32 %v1229_v23, %v1200_v31  ;;  %v1265_v55 = vld [vmem:[#allocation3 + $0x17] sm:$0x1]  ;;  %v1457_v13 = vld [vmem:[#allocation2 + $0x11] sm:$0x1]  ;;  %v6008_v62 = vrot.slane %v5421_v54, 7  ;;  %v1399_v47 = vpop.f32.mrb[19].mxu1 }
 0x19c   : > { %v1493_v37 = vmul.f32 %v4539_v2, %v6007_v3  ;;  %v6009_v6 = vrot.slane %v5427_v5, 1  ;;  %1242 = vst [vmem:[#allocation3 + $0x19] sm:$0x3f] %v1238_v28  ;;  %1261 = vst [vmem:[#allocation3 + $0x10] sm:$0x1] %v1257_v17  ;;  %v1301_v20 = vadd.f32 %v1293_v10, %v1265_v55  ;;  %v1461_v16 = vmul.f32 %v4539_v2, %v1457_v13  ;;  %v5529_v5 = vpop.f32.mrb[20].mxu1 }
 0x19d   : > { %v1428_v34 = vmul.f32 %v6008_v62, %v1389_v46  ;;  %v1456_v36 = vld [vmem:[#allocation2 + $0x9] sm:$0x1]  ;;  %v1904_v63 = vrot.slane %v5513_v39, 1  ;;  %v1839_v42 = vrot.slane %v5515_v41, 7  ;;  %1306 = vst [vmem:[#allocation3 + $0x1f] sm:$0x1] %v1302_v14  ;;  %v1495_v10 = vmul.f32 %v4542_v24, %v1487_v0 }
 0x19e   : > { %v1492_v15 = vmul.f32 %v6009_v6, %v1389_v46  ;;  %1241 = vst [vmem:[#allocation3 + $0x11] sm:$0x3f] %v1237_v51  ;;  %v1437_v1 = vrot.slane %v1429_v53, 1  ;;  %v1453_v32 = vld [vmem:[#allocation3 + $0x8] sm:$0x1]  ;;  %v1460_v23 = vmul.f32 %v1456_v36, %v1389_v46  ;;  %v6010_v54 = vrot.slane %v5432_v25, 7 }
 0x19f   : > { %v5531_v33 = vld [vmem:[#allocation2 + $0x15] sm:$0x1]  ;;  %1305 = vst [vmem:[#allocation3 + $0x17] sm:$0x1] %v1301_v20  ;;  %v1465_v28 = vadd.f32 %v1461_v16, %v1453_v32  ;;  %v1501_v2 = vrot.slane %v1493_v37, 7  ;;  %v1430_v53 = vmul.f32 %v1422_v8, %v1399_v47  ;;  %v5537_v3 = vpop.f32.mrb[21].mxu1  ;;  %v1494_v62 = vmul.f32 %v1486_v49, %v1399_v47 }
 0x1a0   : > { %v1431_v18 = vmul.f32 %v4542_v24, %v6010_v54  ;;  %v1452_v31 = vld [vmem:[#allocation3] sm:$0x1]  ;;  %v1459_v17 = vld [vmem:[#allocation2 + $0x21] sm:$0x1]  ;;  %v1409_v46 = vld [vmem:[#allocation3 + $0x9] sm:$0x3f] }
 0x1a1   : > { %v1473_v25 = vld [vmem:[#allocation3 + $0xf] sm:$0x1]  ;;  %v1436_v14 = vrot.slane %v1428_v34, 1  ;;  %v1464_v51 = vadd.f32 %v1460_v23, %v1452_v31  ;;  %v1500_v55 = vrot.slane %v1492_v15, 7  ;;  %v1458_v13 = vld [vmem:[#allocation2 + $0x19] sm:$0x1]  ;;  %v1445_v37 = vadd.f32 %v1437_v1, %v1409_v46 }
 0x1a2   : > { %1469 = vst [vmem:[#allocation3 + $0x8] sm:$0x1] %v1465_v28  ;;  %v1509_v6 = vadd.f32 %v1501_v2, %v1473_v25  ;;  %v1408_v20 = vld [vmem:[#allocation3 + $0x1] sm:$0x3f]  ;;  %v1472_v21 = vld [vmem:[#allocation3 + $0x7] sm:$0x1]  ;;  %v1463_v0 = vmul.f32 %v4542_v24, %v1459_v17  ;;  %v1462_v54 = vmul.f32 %v1458_v13, %v1399_v47  ;;  %v1638_v25 = vmul.f32 %v5529_v5, %v1630_v11 }
 0x1a3   : > { %v1903_v29 = vrot.slane %v5531_v33, 1  ;;  %v5542_v8 = vld [vmem:[#allocation2 + $0x28] sm:$0x3f]  ;;  %v1444_v16 = vadd.f32 %v1436_v14, %v1408_v20  ;;  %1468 = vst [vmem:[#allocation3] sm:$0x1] %v1464_v51  ;;  %v1508_v36 = vadd.f32 %v1500_v55, %v1472_v21  ;;  %v1439_v34 = vrot.slane %v1431_v18, 1 }
 0x1a4   : > { %v1455_v32 = vld [vmem:[#allocation3 + $0x18] sm:$0x1]  ;;  %v5544_v15 = vpop.f32.mrb[22].mxu1  ;;  %v5546_v23 = vld [vmem:[#allocation2 + $0x2d] sm:$0x1]  ;;  %v1503_v1 = vrot.slane %v1495_v10, 7  ;;  %v1702_v55 = vmul.f32 %v5529_v5, %v1694_v4  ;;  %v1637_v13 = vmul.f32 %v1629_v19, %v5537_v3 }
 0x1a5   : > { %v5548_v45 = vld [vmem:[#allocation2 + $0x20] sm:$0x3f]  ;;  %1449 = vst [vmem:[#allocation3 + $0x9] sm:$0x3f] %v1445_v37  ;;  %1513 = vst [vmem:[#allocation3 + $0xf] sm:$0x1] %v1509_v6  ;;  %v1467_v49 = vadd.f32 %v1463_v0, %v1455_v32 }
 0x1a6   : > { %v1438_v24 = vrot.slane %v1430_v53, 1  ;;  %v5550_v28 = vpop.f32.mrb[23].mxu1  ;;  %v5552_v2 = vpop.f32.mrb[6].mxu0  ;;  %v5554_v31 = vld [vmem:[#allocation2 + $0x25] sm:$0x1]  ;;  %v1502_v46 = vrot.slane %v1494_v62, 7 }
 0x1a7   : > { %1448 = vst [vmem:[#allocation3 + $0x1] sm:$0x3f] %v1444_v16  ;;  %1512 = vst [vmem:[#allocation3 + $0x7] sm:$0x1] %v1508_v36  ;;  %v1411_v18 = vld [vmem:[#allocation3 + $0x19] sm:$0x3f] }
 0x1a8   : > { %v1454_v17 = vld [vmem:[#allocation3 + $0x10] sm:$0x1]  ;;  %v5559_v14 = vpop.f32.mrb[7].mxu0  ;;  %v1447_v10 = vadd.f32 %v1439_v34, %v1411_v18  ;;  %1471 = vst [vmem:[#allocation3 + $0x18] sm:$0x1] %v1467_v49  ;;  %v6011_v20 = vrot.slane %v5469_v43, 1 }
 0x1a9   : > { %v1475_v47 = vld [vmem:[#allocation3 + $0x1f] sm:$0x1]  ;;  %v1410_v53 = vld [vmem:[#allocation3 + $0x11] sm:$0x3f]  ;;  %v1466_v51 = vadd.f32 %v1462_v54, %v1454_v17  ;;  %v5567_v62 = vld [vmem:[#allocation2 + $0x19] sm:$0x3f]  ;;  %v1847_v22 = vmul.f32 %v1839_v42, %v5559_v14 }
 0x1aa   : > { %v1511_v7 = vadd.f32 %v1503_v1, %v1475_v47  ;;  %v1446_v37 = vadd.f32 %v1438_v24, %v1410_v53  ;;  %v1474_v11 = vld [vmem:[#allocation3 + $0x17] sm:$0x1]  ;;  %v1666_v6 = vld [vmem:[#allocation2 + $0x12] sm:$0x1]  ;;  %v1701_v21 = vmul.f32 %v6011_v20, %v5537_v3  ;;  %v1842_v0 = vrot.slane %v5542_v8, 7  ;;  %v5574_v59 = vpop.f32.mrb[8].mxu0 }
 0x1ab   : > { %1451 = vst [vmem:[#allocation3 + $0x19] sm:$0x3f] %v1447_v10  ;;  %1470 = vst [vmem:[#allocation3 + $0x10] sm:$0x1] %v1466_v51  ;;  %v1510_v61 = vadd.f32 %v1502_v46, %v1474_v11  ;;  %v1670_v4 = vmul.f32 %v5529_v5, %v1666_v6  ;;  %v1665_v16 = vld [vmem:[#allocation2 + $0xa] sm:$0x1] }
 0x1ac   : > { %v1906_v19 = vrot.slane %v5546_v23, 1  ;;  %v1841_v36 = vrot.slane %v5548_v45, 7  ;;  %1515 = vst [vmem:[#allocation3 + $0x1f] sm:$0x1] %v1511_v7  ;;  %1450 = vst [vmem:[#allocation3 + $0x11] sm:$0x3f] %v1446_v37  ;;  %v1669_v43 = vmul.f32 %v1665_v16, %v5537_v3 }
 0x1ad   : > { %v1646_v34 = vrot.slane %v1638_v25, 1  ;;  %v1662_v32 = vld [vmem:[#allocation3 + $0x8] sm:$0x1]  ;;  %v1668_v49 = vld [vmem:[#allocation2 + $0x22] sm:$0x1]  ;;  %v5579_v1 = vpop.f32.mrb[9].mxu0 }
 0x1ae   : > { %v1905_v24 = vrot.slane %v5554_v31, 1  ;;  %v2049_v5 = vrot.slane %v5567_v62, 7  ;;  %1514 = vst [vmem:[#allocation3 + $0x17] sm:$0x1] %v1510_v61  ;;  %v1674_v54 = vadd.f32 %v1670_v4, %v1662_v32  ;;  %v1710_v18 = vrot.slane %v1702_v55, 7 }
 0x1af   : > { %v1645_v17 = vrot.slane %v1637_v13, 1  ;;  %v1661_v46 = vld [vmem:[#allocation3] sm:$0x1]  ;;  %v6012_v10 = vrot.slane %v5482_v50, 7  ;;  %v5586_v25 = vld [vmem:[#allocation2 + $0x1e] sm:$0x1]  ;;  %v1639_v55 = vmul.f32 %v1631_v38, %v5550_v28  ;;  %v1672_v61 = vmul.f32 %v5544_v15, %v1668_v49 }
 0x1b0   : > { %v1618_v53 = vld [vmem:[#allocation3 + $0x9] sm:$0x3f]  ;;  %v1682_v3 = vld [vmem:[#allocation3 + $0xf] sm:$0x1]  ;;  %v1673_v51 = vadd.f32 %v1669_v43, %v1661_v46  ;;  %v1709_v7 = vrot.slane %v1701_v21, 7  ;;  %v6013_v37 = vrot.slane %v5484_v27, 1  ;;  %v1703_v21 = vmul.f32 %v1695_v57, %v5550_v28 }
 0x1b1   : > { %v1640_v47 = vmul.f32 %v5544_v15, %v6012_v10  ;;  %v1654_v13 = vadd.f32 %v1646_v34, %v1618_v53  ;;  %1678 = vst [vmem:[#allocation3 + $0x8] sm:$0x1] %v1674_v54  ;;  %v1718_v6 = vadd.f32 %v1710_v18, %v1682_v3  ;;  %v1617_v50 = vld [vmem:[#allocation3 + $0x1] sm:$0x3f]  ;;  %v1681_v20 = vld [vmem:[#allocation3 + $0x7] sm:$0x1]  ;;  %v1848_v3 = vmul.f32 %v5552_v2, %v1840_v58 }
 0x1b2   : > { %v1704_v11 = vmul.f32 %v5544_v15, %v6013_v37  ;;  %v1667_v4 = vld [vmem:[#allocation2 + $0x1a] sm:$0x1]  ;;  %v1653_v16 = vadd.f32 %v1645_v17, %v1617_v50  ;;  %1677 = vst [vmem:[#allocation3] sm:$0x1] %v1673_v51  ;;  %v1717_v27 = vadd.f32 %v1709_v7, %v1681_v20  ;;  %v1664_v32 = vld [vmem:[#allocation3 + $0x18] sm:$0x1]  ;;  %v1911_v58 = vmul.f32 %v1903_v29, %v5559_v14 }
 0x1b3   : > { %v5598_v43 = vpop.f32.mrb[24].mxu1  ;;  %v2113_v26 = vrot.slane %v5586_v25, 1  ;;  %v5601_v38 = vld [vmem:[#allocation2 + $0x11] sm:$0x3f]  ;;  %1658 = vst [vmem:[#allocation3 + $0x9] sm:$0x3f] %v1654_v13  ;;  %v1676_v49 = vadd.f32 %v1672_v61, %v1664_v32  ;;  %v1671_v54 = vmul.f32 %v1667_v4, %v5550_v28  ;;  %v1912_v13 = vmul.f32 %v5552_v2, %v1904_v63 }
 0x1b4   : > { %v5603_v34 = vld [vmem:[#allocation2 + $0x16] sm:$0x1]  ;;  %1722 = vst [vmem:[#allocation3 + $0xf] sm:$0x1] %v1718_v6  ;;  %v1648_v15 = vrot.slane %v1640_v47, 1  ;;  %v5606_v30 = vpop.f32.mrb[25].mxu1 }
 0x1b5   : > { %v5608_v57 = vld [vmem:[#allocation2 + $0x29] sm:$0x3f]  ;;  %1657 = vst [vmem:[#allocation3 + $0x1] sm:$0x3f] %v1653_v16  ;;  %1721 = vst [vmem:[#allocation3 + $0x7] sm:$0x1] %v1717_v27 }
 0x1b6   : > { %v5610_v18 = vld [vmem:[#allocation2 + $0x2e] sm:$0x1]  ;;  %v1712_v46 = vrot.slane %v1704_v11, 7  ;;  %v1647_v10 = vrot.slane %v1639_v55, 1  ;;  %v1663_v53 = vld [vmem:[#allocation3 + $0x10] sm:$0x1] }
 0x1b7   : > { %v1620_v17 = vld [vmem:[#allocation3 + $0x19] sm:$0x3f]  ;;  %1680 = vst [vmem:[#allocation3 + $0x18] sm:$0x1] %v1676_v49  ;;  %v1684_v51 = vld [vmem:[#allocation3 + $0x1f] sm:$0x1]  ;;  %v1675_v7 = vadd.f32 %v1671_v54, %v1663_v53  ;;  %v1914_v54 = vmul.f32 %v5574_v59, %v1906_v19  ;;  %v1913_v19 = vmul.f32 %v1905_v24, %v5579_v1 }
 0x1b8   : > { %v1656_v47 = vadd.f32 %v1648_v15, %v1620_v17  ;;  %v1619_v28 = vld [vmem:[#allocation3 + $0x11] sm:$0x3f]  ;;  %v1711_v37 = vrot.slane %v1703_v21, 7  ;;  %v1720_v6 = vadd.f32 %v1712_v46, %v1684_v51  ;;  %v1683_v20 = vld [vmem:[#allocation3 + $0x17] sm:$0x1]  ;;  %v5624_v55 = vpop.f32.mrb[26].mxu1 }
 0x1b9   : > { %v1655_v50 = vadd.f32 %v1647_v10, %v1619_v28  ;;  %v1876_v11 = vld [vmem:[#allocation2 + $0x18] sm:$0x1]  ;;  %1679 = vst [vmem:[#allocation3 + $0x10] sm:$0x1] %v1675_v7  ;;  %v1875_v63 = vld [vmem:[#allocation2 + $0x10] sm:$0x1] }
 0x1ba   : > { %1660 = vst [vmem:[#allocation3 + $0x19] sm:$0x3f] %v1656_v47  ;;  %v1719_v61 = vadd.f32 %v1711_v37, %v1683_v20  ;;  %v1880_v39 = vmul.f32 %v5552_v2, %v1876_v11  ;;  %v2048_v4 = vrot.slane %v5601_v38, 7  ;;  %v2112_v21 = vrot.slane %v5603_v34, 1  ;;  %v5629_v16 = vpop.f32.mrb[27].mxu1  ;;  %v5640_v17 = vpop.f32.mrb[10].mxu0 }
 0x1bb   : > { %1724 = vst [vmem:[#allocation3 + $0x1f] sm:$0x1] %v1720_v6  ;;  %1659 = vst [vmem:[#allocation3 + $0x11] sm:$0x3f] %v1655_v50  ;;  %v1856_v41 = vrot.slane %v1848_v3, 1  ;;  %v1879_v33 = vmul.f32 %v1875_v63, %v5559_v14  ;;  %v2051_v29 = vrot.slane %v5608_v57, 7  ;;  %v1850_v38 = vmul.f32 %v5574_v59, %v1842_v0 }
 0x1bc   : > { %v1872_v42 = vld [vmem:[#allocation3 + $0x8] sm:$0x1]  ;;  %v2115_v27 = vrot.slane %v5610_v18, 1  ;;  %1723 = vst [vmem:[#allocation3 + $0x17] sm:$0x1] %v1719_v61  ;;  %v1920_v2 = vrot.slane %v1912_v13, 7  ;;  %v1849_v47 = vmul.f32 %v1841_v36, %v5579_v1  ;;  %v2057_v63 = vmul.f32 %v5598_v43, %v2049_v5 }
 0x1bd   : > { %v1884_v32 = vadd.f32 %v1880_v39, %v1872_v42  ;;  %v1871_v15 = vld [vmem:[#allocation3] sm:$0x1]  ;;  %v1878_v49 = vld [vmem:[#allocation2 + $0x28] sm:$0x1]  ;;  %v1827_v14 = vld [vmem:[#allocation3 + $0x9] sm:$0x3f]  ;;  %v2120_v5 = vmul.f32 %v2112_v21, %v5606_v30 }
 0x1be   : > { %v1892_v46 = vld [vmem:[#allocation3 + $0xf] sm:$0x1]  ;;  %v1855_v10 = vrot.slane %v1847_v22, 1  ;;  %v1883_v53 = vadd.f32 %v1879_v33, %v1871_v15  ;;  %v1919_v3 = vrot.slane %v1911_v58, 7  ;;  %v1877_v51 = vld [vmem:[#allocation2 + $0x20] sm:$0x1]  ;;  %v1864_v8 = vadd.f32 %v1856_v41, %v1827_v14 }
 0x1bf   : > { %1888 = vst [vmem:[#allocation3 + $0x8] sm:$0x1] %v1884_v32  ;;  %v1928_v0 = vadd.f32 %v1920_v2, %v1892_v46  ;;  %v1826_v28 = vld [vmem:[#allocation3 + $0x1] sm:$0x3f]  ;;  %v1891_v7 = vld [vmem:[#allocation3 + $0x7] sm:$0x1]  ;;  %v1882_v23 = vmul.f32 %v5574_v59, %v1878_v49  ;;  %v1881_v58 = vmul.f32 %v1877_v51, %v5579_v1  ;;  %v2121_v41 = vmul.f32 %v5598_v43, %v2113_v26 }
 0x1c0   : > { %v5649_v37 = vpop.f32.mrb[11].mxu0  ;;  %v1863_v13 = vadd.f32 %v1855_v10, %v1826_v28  ;;  %1887 = vst [vmem:[#allocation3] sm:$0x1] %v1883_v53  ;;  %v1927_v6 = vadd.f32 %v1919_v3, %v1891_v7  ;;  %v1874_v50 = vld [vmem:[#allocation3 + $0x18] sm:$0x1]  ;;  %v1858_v20 = vrot.slane %v1850_v38, 1  ;;  %v2056_v38 = vmul.f32 %v2048_v4, %v5606_v30 }
 0x1c1   : > { %v2042_v45 = vld [vmem:[#allocation2 + $0x21] sm:$0x3f]  ;;  %1868 = vst [vmem:[#allocation3 + $0x9] sm:$0x3f] %v1864_v8  ;;  %1932 = vst [vmem:[#allocation3 + $0xf] sm:$0x1] %v1928_v0  ;;  %v1886_v11 = vadd.f32 %v1882_v23, %v1874_v50 }
 0x1c2   : > { %v2106_v36 = vld [vmem:[#allocation2 + $0x26] sm:$0x1]  ;;  %v1922_v22 = vrot.slane %v1914_v54, 7  ;;  %v5652_v59 = vld [vmem:[#allocation2 + $0x1a] sm:$0x3f]  ;;  %v5654_v61 = vpop.f32.mrb[12].mxu0 }
 0x1c3   : > { %1867 = vst [vmem:[#allocation3 + $0x1] sm:$0x3f] %v1863_v13  ;;  %1931 = vst [vmem:[#allocation3 + $0x7] sm:$0x1] %v1927_v6  ;;  %v1829_v31 = vld [vmem:[#allocation3 + $0x19] sm:$0x3f] }
 0x1c4   : > { %v1857_v24 = vrot.slane %v1849_v47, 1  ;;  %v1873_v39 = vld [vmem:[#allocation3 + $0x10] sm:$0x1]  ;;  %v5662_v42 = vpop.f32.mrb[13].mxu0  ;;  %v1866_v1 = vadd.f32 %v1858_v20, %v1829_v31  ;;  %1890 = vst [vmem:[#allocation3 + $0x18] sm:$0x1] %v1886_v11 }
 0x1c5   : > { %v1894_v33 = vld [vmem:[#allocation3 + $0x1f] sm:$0x1]  ;;  %v1828_v32 = vld [vmem:[#allocation3 + $0x11] sm:$0x3f]  ;;  %v1885_v2 = vadd.f32 %v1881_v58, %v1873_v39  ;;  %v1921_v15 = vrot.slane %v1913_v19, 7  ;;  %v2050_v25 = vrot.slane %v2042_v45, 7  ;;  %v2123_v19 = vmul.f32 %v5624_v55, %v2115_v27 }
 0x1c6   : > { %v1930_v49 = vadd.f32 %v1922_v22, %v1894_v33  ;;  %v1865_v54 = vadd.f32 %v1857_v24, %v1828_v32  ;;  %v1893_v14 = vld [vmem:[#allocation3 + $0x17] sm:$0x1]  ;;  %v2085_v62 = vld [vmem:[#allocation2 + $0x19] sm:$0x1]  ;;  %1870 = vst [vmem:[#allocation3 + $0x19] sm:$0x3f] %v1866_v1 }
 0x1c7   : > { %1889 = vst [vmem:[#allocation3 + $0x10] sm:$0x1] %v1885_v2  ;;  %v1929_v26 = vadd.f32 %v1921_v15, %v1893_v14  ;;  %v2089_v46 = vmul.f32 %v5598_v43, %v2085_v62  ;;  %v2084_v10 = vld [vmem:[#allocation2 + $0x11] sm:$0x1]  ;;  %v2114_v53 = vrot.slane %v2106_v36, 1  ;;  %v2258_v3 = vrot.slane %v5652_v59, 7 }
 0x1c8   : > { %v2314_v47 = vld [vmem:[#allocation2 + $0x1f] sm:$0x1]  ;;  %1934 = vst [vmem:[#allocation3 + $0x1f] sm:$0x1] %v1930_v49  ;;  %1869 = vst [vmem:[#allocation3 + $0x11] sm:$0x3f] %v1865_v54  ;;  %v2088_v0 = vmul.f32 %v2084_v10, %v5606_v30  ;;  %v2059_v43 = vmul.f32 %v5624_v55, %v2051_v29  ;;  %v2058_v30 = vmul.f32 %v2050_v25, %v5629_v16 }
 0x1c9   : > { %v2065_v4 = vrot.slane %v2057_v63, 1  ;;  %v2081_v51 = vld [vmem:[#allocation3 + $0x8] sm:$0x1]  ;;  %v2129_v8 = vrot.slane %v2121_v41, 7  ;;  %v2087_v34 = vld [vmem:[#allocation2 + $0x29] sm:$0x1]  ;;  %v2122_v11 = vmul.f32 %v2114_v53, %v5629_v16  ;;  %v2266_v62 = vmul.f32 %v5640_v17, %v2258_v3 }
 0x1ca   : > { %v2249_v21 = vld [vmem:[#allocation2 + $0x12] sm:$0x3f]  ;;  %1933 = vst [vmem:[#allocation3 + $0x17] sm:$0x1] %v1929_v26  ;;  %v2093_v28 = vadd.f32 %v2089_v46, %v2081_v51  ;;  %v2064_v7 = vrot.slane %v2056_v38, 1  ;;  %v2128_v36 = vrot.slane %v2120_v5, 7  ;;  %v2091_v29 = vmul.f32 %v5624_v55, %v2087_v34 }
 0x1cb   : > { %v2080_v23 = vld [vmem:[#allocation3] sm:$0x1]  ;;  %v2313_v13 = vld [vmem:[#allocation2 + $0x17] sm:$0x1]  ;;  %v2037_v6 = vld [vmem:[#allocation3 + $0x9] sm:$0x3f] }
 0x1cc   : > { %v2101_v50 = vld [vmem:[#allocation3 + $0xf] sm:$0x1]  ;;  %v2092_v45 = vadd.f32 %v2088_v0, %v2080_v23  ;;  %v2086_v20 = vld [vmem:[#allocation2 + $0x21] sm:$0x1]  ;;  %v2073_v22 = vadd.f32 %v2065_v4, %v2037_v6  ;;  %2097 = vst [vmem:[#allocation3 + $0x8] sm:$0x1] %v2093_v28 }
 0x1cd   : > { %v2137_v58 = vadd.f32 %v2129_v8, %v2101_v50  ;;  %v2036_v57 = vld [vmem:[#allocation3 + $0x1] sm:$0x3f]  ;;  %v2100_v59 = vld [vmem:[#allocation3 + $0x7] sm:$0x1]  ;;  %v2322_v18 = vrot.slane %v2314_v47, 1  ;;  %v2257_v39 = vrot.slane %v2249_v21, 7  ;;  %v2090_v2 = vmul.f32 %v2086_v20, %v5629_v16 }
 0x1ce   : > { %v2072_v31 = vadd.f32 %v2064_v7, %v2036_v57  ;;  %2096 = vst [vmem:[#allocation3] sm:$0x1] %v2092_v45  ;;  %v2136_v27 = vadd.f32 %v2128_v36, %v2100_v59  ;;  %v2083_v24 = vld [vmem:[#allocation3 + $0x18] sm:$0x1]  ;;  %v2321_v63 = vrot.slane %v2313_v13, 1  ;;  %v2067_v1 = vrot.slane %v2059_v43, 1 }
 0x1cf   : > { %v2252_v41 = vld [vmem:[#allocation2 + $0x2a] sm:$0x3f]  ;;  %2077 = vst [vmem:[#allocation3 + $0x9] sm:$0x3f] %v2073_v22  ;;  %2141 = vst [vmem:[#allocation3 + $0xf] sm:$0x1] %v2137_v58  ;;  %v2095_v33 = vadd.f32 %v2091_v29, %v2083_v24  ;;  %v2330_v10 = vmul.f32 %v5640_v17, %v2322_v18  ;;  %v2265_v53 = vmul.f32 %v2257_v39, %v5649_v37 }
 0x1d0   : > { %v2131_v32 = vrot.slane %v2123_v19, 7  ;;  %v2316_v15 = vld [vmem:[#allocation2 + $0x2f] sm:$0x1]  ;;  %v2251_v38 = vld [vmem:[#allocation2 + $0x22] sm:$0x3f]  ;;  %v2066_v49 = vrot.slane %v2058_v30, 1  ;;  %v2329_v0 = vmul.f32 %v2321_v63, %v5649_v37 }
 0x1d1   : > { %2076 = vst [vmem:[#allocation3 + $0x1] sm:$0x3f] %v2072_v31  ;;  %2140 = vst [vmem:[#allocation3 + $0x7] sm:$0x1] %v2136_v27  ;;  %v2039_v55 = vld [vmem:[#allocation3 + $0x19] sm:$0x3f] }
 0x1d2   : > { %v2082_v54 = vld [vmem:[#allocation3 + $0x10] sm:$0x1]  ;;  %v2130_v14 = vrot.slane %v2122_v11, 7  ;;  %v2075_v5 = vadd.f32 %v2067_v1, %v2039_v55  ;;  %2099 = vst [vmem:[#allocation3 + $0x18] sm:$0x1] %v2095_v33  ;;  %v2260_v28 = vrot.slane %v2252_v41, 7 }
 0x1d3   : > { %v2103_v25 = vld [vmem:[#allocation3 + $0x1f] sm:$0x1]  ;;  %v2038_v26 = vld [vmem:[#allocation3 + $0x11] sm:$0x3f]  ;;  %v2094_v46 = vadd.f32 %v2090_v2, %v2082_v54  ;;  %v2315_v16 = vld [vmem:[#allocation2 + $0x27] sm:$0x1] }
 0x1d4   : > { %v2139_v47 = vadd.f32 %v2131_v32, %v2103_v25  ;;  %v2074_v4 = vadd.f32 %v2066_v49, %v2038_v26  ;;  %v2102_v51 = vld [vmem:[#allocation3 + $0x17] sm:$0x1]  ;;  %v2294_v8 = vld [vmem:[#allocation2 + $0x1a] sm:$0x1]  ;;  %2079 = vst [vmem:[#allocation3 + $0x19] sm:$0x3f] %v2075_v5  ;;  %v2268_v20 = vmul.f32 %v5654_v61, %v2260_v28 }
 0x1d5   : > { %2098 = vst [vmem:[#allocation3 + $0x10] sm:$0x1] %v2094_v46  ;;  %v2138_v34 = vadd.f32 %v2130_v14, %v2102_v51  ;;  %v2298_v3 = vmul.f32 %v5640_v17, %v2294_v8  ;;  %v2293_v21 = vld [vmem:[#allocation2 + $0x12] sm:$0x1]  ;;  %v2324_v7 = vrot.slane %v2316_v15, 1  ;;  %v2274_v23 = vrot.slane %v2266_v62, 1 }
 0x1d6   : > { %2143 = vst [vmem:[#allocation3 + $0x1f] sm:$0x1] %v2139_v47  ;;  %2078 = vst [vmem:[#allocation3 + $0x11] sm:$0x3f] %v2074_v4  ;;  %v2290_v43 = vld [vmem:[#allocation3 + $0x8] sm:$0x1]  ;;  %v2297_v19 = vmul.f32 %v2293_v21, %v5649_v37 }
 0x1d7   : > { %v2259_v13 = vrot.slane %v2251_v38, 7  ;;  %v2323_v6 = vrot.slane %v2315_v16, 1  ;;  %2142 = vst [vmem:[#allocation3 + $0x17] sm:$0x1] %v2138_v34  ;;  %v2302_v50 = vadd.f32 %v2298_v3, %v2290_v43  ;;  %v2338_v45 = vrot.slane %v2330_v10, 7 }
 0x1d8   : > { %v2273_v36 = vrot.slane %v2265_v53, 1  ;;  %v2289_v30 = vld [vmem:[#allocation3] sm:$0x1]  ;;  %v2296_v11 = vld [vmem:[#allocation2 + $0x2a] sm:$0x1]  ;;  %v2337_v57 = vrot.slane %v2329_v0, 7  ;;  %v2332_v59 = vmul.f32 %v5654_v61, %v2324_v7 }
 0x1d9   : > { %v2246_v17 = vld [vmem:[#allocation3 + $0x9] sm:$0x3f]  ;;  %v2310_v22 = vld [vmem:[#allocation3 + $0xf] sm:$0x1]  ;;  %v2301_v58 = vadd.f32 %v2297_v19, %v2289_v30  ;;  %v2267_v29 = vmul.f32 %v2259_v13, %v5662_v42  ;;  %2306 = vst [vmem:[#allocation3 + $0x8] sm:$0x1] %v2302_v50  ;;  %v2300_v24 = vmul.f32 %v5654_v61, %v2296_v11  ;;  %v2331_v39 = vmul.f32 %v2323_v6, %v5662_v42 }
 0x1da   : > { %v2282_v18 = vadd.f32 %v2274_v23, %v2246_v17  ;;  %v2346_v37 = vadd.f32 %v2338_v45, %v2310_v22  ;;  %v2245_v31 = vld [vmem:[#allocation3 + $0x1] sm:$0x3f]  ;;  %v2309_v27 = vld [vmem:[#allocation3 + $0x7] sm:$0x1]  ;;  %v2292_v1 = vld [vmem:[#allocation3 + $0x18] sm:$0x1] }
 0x1db   : > { %v2281_v63 = vadd.f32 %v2273_v36, %v2245_v31  ;;  %2305 = vst [vmem:[#allocation3] sm:$0x1] %v2301_v58  ;;  %v2345_v41 = vadd.f32 %v2337_v57, %v2309_v27  ;;  %v2295_v33 = vld [vmem:[#allocation2 + $0x22] sm:$0x1]  ;;  %v2276_v32 = vrot.slane %v2268_v20, 1  ;;  %v2304_v2 = vadd.f32 %v2300_v24, %v2292_v1 }
 0x1dc   : > { %2286 = vst [vmem:[#allocation3 + $0x9] sm:$0x3f] %v2282_v18  ;;  %2350 = vst [vmem:[#allocation3 + $0xf] sm:$0x1] %v2346_v37  ;;  %v2299_v15 = vmul.f32 %v2295_v33, %v5662_v42  ;;  %v2248_v38 = vld [vmem:[#allocation3 + $0x19] sm:$0x3f] }
 0x1dd   : > { %2285 = vst [vmem:[#allocation3 + $0x1] sm:$0x3f] %v2281_v63  ;;  %2349 = vst [vmem:[#allocation3 + $0x7] sm:$0x1] %v2345_v41  ;;  %v2340_v55 = vrot.slane %v2332_v59, 7  ;;  %v2275_v49 = vrot.slane %v2267_v29, 1  ;;  %v2284_v61 = vadd.f32 %v2276_v32, %v2248_v38 }
 0x1de   : > { %v2291_v54 = vld [vmem:[#allocation3 + $0x10] sm:$0x1]  ;;  %2308 = vst [vmem:[#allocation3 + $0x18] sm:$0x1] %v2304_v2  ;;  %v2312_v14 = vld [vmem:[#allocation3 + $0x1f] sm:$0x1] }
 0x1df   : > { %v2247_v62 = vld [vmem:[#allocation3 + $0x11] sm:$0x3f]  ;;  %v2303_v5 = vadd.f32 %v2299_v15, %v2291_v54  ;;  %v2339_v25 = vrot.slane %v2331_v39, 7  ;;  %v2348_v26 = vadd.f32 %v2340_v55, %v2312_v14  ;;  %v2311_v10 = vld [vmem:[#allocation3 + $0x17] sm:$0x1]  ;;  %2356 = sbr.rel (%p4295_p0) target bundleno = 782 (0x30e), region = 52 }
 0x1e0   : > { %v2283_v46 = vadd.f32 %v2275_v49, %v2247_v62  ;;  %2288 = vst [vmem:[#allocation3 + $0x19] sm:$0x3f] %v2284_v61  ;;  %v4977_v42 = vmov (!%p4295_p0), 0.0   ;;  %v2632_v38 = vld [vmem:[#allocation2 + $0x10] sm:$0xff] (!%p4295_p0) }
 0x1e1   : > { %2307 = vst [vmem:[#allocation3 + $0x10] sm:$0x1] %v2303_v5  ;;  %v2347_v53 = vadd.f32 %v2339_v25, %v2311_v10  ;;  %2352 = vst [vmem:[#allocation3 + $0x1f] sm:$0x1] %v2348_v26  ;;  %4575 = vmatprep.subr.mxu0 (!%p4295_p0), %v4977_v42  ;;  %4577 = vmatprep.mubr.msk.f32.mxu0 (!%p4295_p0), %vm4978_vm2, %v4977_v42  ;;  %v2705_v14 = vrot.slane (!%p4295_p0), %v2632_v38, 7  ;;  %v2718_v62 = vrot.slane (!%p4295_p0), %v2632_v38, 6 }
 0x1e2   : > { %2287 = vst [vmem:[#allocation3 + $0x11] sm:$0x3f] %v2283_v46  ;;  %2357 = vst [vmem:[#allocation3] sm:$0xff] (!%p4295_p0), %v4977_v42  ;;  %4576 = vmatpush3.msk.msra.mxu0 (!%p4295_p0), %vm482_vm0, %v5126_v9  ;;  %4580 = vmatprep.subr.mxu1 (!%p4295_p0), %v4977_v42 }
 0x1e3   : > { %2351 = vst [vmem:[#allocation3 + $0x17] sm:$0x1] %v2347_v53  ;;  %4578 = vmatmul.mubr.msk.f32.vlgmr.msra.gmra.mrb[0].mxu0 (!%p4295_p0), %vm469_vm1, %v5143_v12  ;;  %4581 = vmatpush3.msk.msra.mxu1 (!%p4295_p0), %vm482_vm0, %v5126_v9  ;;  %v6014_v12 = vld [vmem:[#allocation17_spill] sm:$0xff] (!%p4295_p0) }
 0x1e4   : > { %4582 = vmatprep.mubr.msk.f32.mxu1 (!%p4295_p0), %vm4978_vm2, %v4977_v42  ;;  %4585 = vmatprep.subr.mxu0 (!%p4295_p0), %v4977_v42 }
 0x1e5   : > { %4583 = vmatmul.mubr.msk.f32.vlgmr.msra.gmra.mrb[0].mxu1 (!%p4295_p0), %vm469_vm1, %v5243_v35  ;;  %4586 = vmatpush3.msk.msra.mxu0 (!%p4295_p0), %vm482_vm0, %v5126_v9  ;;  %v2358_v35 = vld [vmem:[#allocation2 + $0x8] sm:$0xff] (!%p4295_p0) }
 0x1e6   : > { %4587 = vmatprep.mubr.msk.f32.mxu0 %vm4978_vm2, %v4977_v42  ;;  %4590 = vmatprep.subr.mxu1 %v4977_v42  ;;  %v2530_v43 = vrot.slane %v2358_v35, 1  ;;  %v2620_v63 = vrot.slane %v2358_v35, 2 }
 0x1e7   : > { %4588 = vmatmul.mubr.msk.f32.vlgmr.msra.gmra.mrb[2].mxu0 %vm469_vm1, %v5255_v40  ;;  %4591 = vmatpush3.msk.msra.mxu1 %vm482_vm0, %v5126_v9  ;;  %v2431_v40 = vrot.slane %v2358_v35, 7 }
 0x1e8   : > { %4592 = vmatprep.mubr.msk.f32.mxu1 %vm4978_vm2, %v4977_v42  ;;  %4595 = vmatprep.subr.mxu0 %v4977_v42 }
 0x1e9   : > { %4593 = vmatmul.mubr.msk.f32.vlgmr.msra.gmra.mrb[2].mxu1 %vm469_vm1, %v5269_v44  ;;  %4596 = vmatpush3.msk.msra.mxu0 %vm482_vm0, %v5126_v9  ;;  %v2444_v44 = vrot.slane %v2358_v35, 6  ;;  %v2429_v51 = vld [vmem:[#allocation3 + $0x1] sm:$0x3f]  ;;  %v2443_v8 = vld [vmem:[#allocation3 + $0x7] sm:$0x1] }
 0x1ea   : > { %4597 = vmatprep.mubr.msk.f32.mxu0 %vm4978_vm2, %v4977_v42  ;;  %4600 = vmatprep.subr.mxu1 %v4977_v42 }
 0x1eb   : > { %4598 = vmatmul.mubr.msk.f32.vlgmr.msra.gmra.mrb[4].mxu0 %vm469_vm1, %v5283_v48  ;;  %4601 = vmatpush3.msk.msra.mxu1 %vm482_vm0, %v5126_v9 }
 0x1ec   : > { %4602 = vmatprep.mubr.msk.f32.mxu1 %vm4978_vm2, %v4977_v42  ;;  %4605 = vmatprep.subr.mxu0 %v4977_v42 }
 0x1ed   : > { %4603 = vmatmul.mubr.msk.f32.vlgmr.msra.gmra.mrb[4].mxu1 %vm469_vm1, %v5297_v52  ;;  %4606 = vmatpush3.msk.msra.mxu0 %vm482_vm0, %v5126_v9  ;;  %v2439_v52 = vld [vmem:[#allocation3] sm:$0x1] }
 0x1ee   : > { %4607 = vmatprep.mubr.msk.f32.mxu0 %vm4978_vm2, %v4977_v42  ;;  %4610 = vmatprep.subr.mxu1 %v4977_v42 }
 0x1ef   : > { %4608 = vmatmul.mubr.msk.f32.vlgmr.msra.gmra.mrb[6].mxu0 %vm469_vm1, %v5309_v56  ;;  %4611 = vmatpush3.msk.msra.mxu1 %vm482_vm0, %v5126_v9 }
 0x1f0   : > { %4612 = vmatprep.mubr.msk.f32.mxu1 %vm4978_vm2, %v4977_v42  ;;  %4615 = vmatprep.subr.mxu0 %v4977_v42 }
 0x1f1   : > { %4613 = vmatmul.mubr.msk.f32.vlgmr.msra.gmra.mrb[6].mxu1 %vm469_vm1, %v5323_v60  ;;  %4616 = vmatpush3.msk.msra.mxu0 %vm482_vm0, %v5126_v9 }
 0x1f2   : > { %4617 = vmatprep.mubr.msk.f32.mxu0 %vm4978_vm2, %v4977_v42 }
 0x1f3   : > { %4618 = vmatmul.mubr.msk.f32.vlgmr.msra.gmra.mrb[8].mxu0 %vm469_vm1, %v6014_v12 }
 0x2b6   : > { %v2425_v48 = vpop.f32.mrb[0].mxu0 }
 0x2b7   : > { %v2433_v56 = vmul.f32 %v2431_v40, %v2425_v48  ;;  %v2440_v16 = vmul.f32 %v2425_v48, %v2358_v35  ;;  %v2446_v47 = vmul.f32 %v2444_v44, %v2425_v48  ;;  %v4579_v4 = vpop.f32.mrb[1].mxu0 }
 0x2b8   : > { %v2518_v60 = vpop.f32.mrb[0].mxu1 }
 0x2b9   : > { %v2435_v0 = vrot.slane %v2433_v56, 1  ;;  %v2441_v34 = vadd.f32 %v2440_v16, %v2439_v52  ;;  %v2448_v3 = vrot.slane %v2446_v47, 7  ;;  %v4584_v21 = vpop.f32.mrb[1].mxu1  ;;  %v2523_v6 = vmul.f32 %v2518_v60, %v2358_v35 }
 0x2ba   : > { %v2608_v28 = vpop.f32.mrb[2].mxu0  ;;  %v2536_v50 = vmul.f32 %v2518_v60, %v2431_v40  ;;  %v2532_v30 = vmul.f32 %v2530_v43, %v2518_v60  ;;  %v2804_v47 = vrot.slane %v2632_v38, 1 }
 0x2bb   : > { %v2437_v7 = vadd.f32 %v2435_v0, %v2429_v51  ;;  %2442 = vst [vmem:[#allocation3] sm:$0x1] %v2441_v34  ;;  %v2450_v23 = vadd.f32 %v2448_v3, %v2443_v8  ;;  %v4589_v19 = vpop.f32.mrb[3].mxu0  ;;  %v2525_v17 = vrot.slane %v2523_v6, 1  ;;  %v2613_v33 = vmul.f32 %v2608_v28, %v2530_v43 }
 0x2bc   : > { %v2699_v13 = vpop.f32.mrb[2].mxu1  ;;  %v2538_v22 = vrot.slane %v2536_v50, 7  ;;  %v2626_v32 = vmul.f32 %v2608_v28, %v2358_v35  ;;  %v2622_v15 = vmul.f32 %v2620_v63, %v2608_v28  ;;  %v2894_v43 = vrot.slane %v2632_v38, 2  ;;  %v2907_v50 = vld [vmem:[#allocation2 + $0x18] sm:$0xff] }
 0x2bd   : > { %2438 = vst [vmem:[#allocation3 + $0x1] sm:$0x3f] %v2437_v7  ;;  %2451 = vst [vmem:[#allocation3 + $0x7] sm:$0x1] %v2450_v23  ;;  %v4594_v45 = vpop.f32.mrb[3].mxu1  ;;  %v2615_v55 = vrot.slane %v2613_v33, 1  ;;  %v2707_v10 = vmul.f32 %v2705_v14, %v2699_v13  ;;  %v2720_v53 = vmul.f32 %v2718_v62, %v2699_v13  ;;  %v2714_v42 = vmul.f32 %v2699_v13, %v2632_v38 }
 0x2be   : > { %v2792_v36 = vpop.f32.mrb[4].mxu0  ;;  %v2628_v49 = vrot.slane %v2626_v32, 7 }
 0x2bf   : > { %v4599_v20 = vpop.f32.mrb[5].mxu0  ;;  %v2709_v12 = vrot.slane %v2707_v10, 1  ;;  %v2722_v35 = vrot.slane %v2720_v53, 7  ;;  %v2797_v4 = vmul.f32 %v2792_v36, %v2632_v38  ;;  %v2810_v51 = vmul.f32 %v2792_v36, %v2705_v14 }
 0x2c0   : > { %v5742_v11 = vpop.f32.mrb[4].mxu1  ;;  %v2806_v8 = vmul.f32 %v2804_v47, %v2792_v36  ;;  %v3169_v10 = vrot.slane %v2907_v50, 2 }
 0x2c1   : > { %v4604_v58 = vpop.f32.mrb[5].mxu1  ;;  %v2799_v60 = vrot.slane %v2797_v4, 1  ;;  %v2812_v0 = vrot.slane %v2810_v51, 7  ;;  %v2887_v19 = vmul.f32 %v5742_v11, %v2804_v47  ;;  %v2900_v13 = vmul.f32 %v5742_v11, %v2632_v38 }
 0x2c2   : > { %v2529_v57 = vld [vmem:[#allocation3] sm:$0x1]  ;;  %v5744_v59 = vpop.f32.mrb[6].mxu0  ;;  %v2896_v6 = vmul.f32 %v2894_v43, %v5742_v11  ;;  %v3079_v38 = vrot.slane %v2907_v50, 1 }
 0x2c3   : > { %v2533_v29 = vadd.f32 %v2532_v30, %v2529_v57  ;;  %v4609_v18 = vpop.f32.mrb[7].mxu0  ;;  %v2889_v45 = vrot.slane %v2887_v19, 1  ;;  %v2902_v36 = vrot.slane %v2900_v13, 7  ;;  %v2989_v11 = vmul.f32 %v5744_v59, %v2907_v50 }
 0x2c4   : > { %v2522_v37 = vld [vmem:[#allocation3 + $0x1] sm:$0x3f]  ;;  %v2535_v31 = vld [vmem:[#allocation3 + $0x7] sm:$0x1]  ;;  %v5746_v27 = vpop.f32.mrb[6].mxu1 }
 0x2c5   : > { %v2527_v24 = vadd.f32 %v2525_v17, %v2522_v37  ;;  %2534 = vst [vmem:[#allocation3] sm:$0x1] %v2533_v29  ;;  %v2540_v39 = vadd.f32 %v2538_v22, %v2535_v31  ;;  %v4614_v41 = vpop.f32.mrb[7].mxu1  ;;  %v2980_v17 = vrot.slane %v2907_v50, 7  ;;  %v2993_v22 = vrot.slane %v2907_v50, 6 }
 0x2c6   : > { %v5748_v1 = vpop.f32.mrb[8].mxu0 }
 0x2c7   : > { %2528 = vst [vmem:[#allocation3 + $0x1] sm:$0x3f] %v2527_v24  ;;  %2541 = vst [vmem:[#allocation3 + $0x7] sm:$0x1] %v2540_v39  ;;  %v4619_v2 = vpop.f32.mrb[9].mxu0  ;;  %v2982_v37 = vmul.f32 %v2980_v17, %v5744_v59  ;;  %v2995_v31 = vmul.f32 %v2993_v22, %v5744_v59  ;;  %v3162_v53 = vmul.f32 %v5748_v1, %v3079_v38 }
 0x2c9   : > { %v2984_v24 = vrot.slane %v2982_v37, 1  ;;  %v2997_v39 = vrot.slane %v2995_v31, 7 }
 0x2cc   : > { %v2619_v54 = vld [vmem:[#allocation3] sm:$0x1] }
 0x2cd   : > { %v2623_v61 = vadd.f32 %v2622_v15, %v2619_v54  ;;  %v3081_v54 = vmul.f32 %v3079_v38, %v5746_v27 }
 0x2ce   : > { %v2612_v5 = vld [vmem:[#allocation3 + $0x1] sm:$0x3f]  ;;  %v2625_v25 = vld [vmem:[#allocation3 + $0x7] sm:$0x1] }
 0x2cf   : > { %v2617_v26 = vadd.f32 %v2615_v55, %v2612_v5  ;;  %2624 = vst [vmem:[#allocation3] sm:$0x1] %v2623_v61  ;;  %v2630_v46 = vadd.f32 %v2628_v49, %v2625_v25  ;;  %v3072_v55 = vmul.f32 %v5746_v27, %v2907_v50  ;;  %v3085_v49 = vmul.f32 %v5746_v27, %v2980_v17 }
 0x2d1   : > { %2618 = vst [vmem:[#allocation3 + $0x1] sm:$0x3f] %v2617_v26  ;;  %2631 = vst [vmem:[#allocation3 + $0x7] sm:$0x1] %v2630_v46  ;;  %v3074_v61 = vrot.slane %v3072_v55, 1  ;;  %v3087_v59 = vrot.slane %v3085_v49, 7 }
 0x2d6   : > { %v2713_v40 = vld [vmem:[#allocation3] sm:$0x1] }
 0x2d7   : > { %v2715_v44 = vadd.f32 %v2714_v42, %v2713_v40  ;;  %v3175_v42 = vmul.f32 %v5748_v1, %v2907_v50 }
 0x2d8   : > { %v2703_v48 = vld [vmem:[#allocation3 + $0x1] sm:$0x3f]  ;;  %v2717_v52 = vld [vmem:[#allocation3 + $0x7] sm:$0x1] }
 0x2d9   : > { %v2711_v56 = vadd.f32 %v2709_v12, %v2703_v48  ;;  %2716 = vst [vmem:[#allocation3] sm:$0x1] %v2715_v44  ;;  %v2724_v16 = vadd.f32 %v2722_v35, %v2717_v52  ;;  %v3171_v12 = vmul.f32 %v3169_v10, %v5748_v1  ;;  %v3164_v35 = vrot.slane %v3162_v53, 1 }
 0x2da   : > { %v3177_v27 = vrot.slane %v3175_v42, 7 }
 0x2db   : > { %2712 = vst [vmem:[#allocation3 + $0x1] sm:$0x3f] %v2711_v56  ;;  %2725 = vst [vmem:[#allocation3 + $0x7] sm:$0x1] %v2724_v16 }
 0x2e0   : > { %v2803_v34 = vld [vmem:[#allocation3] sm:$0x1] }
 0x2e1   : > { %v2807_v3 = vadd.f32 %v2806_v8, %v2803_v34 }
 0x2e2   : > { %v2796_v21 = vld [vmem:[#allocation3 + $0x1] sm:$0x3f]  ;;  %v2809_v28 = vld [vmem:[#allocation3 + $0x7] sm:$0x1] }
 0x2e3   : > { %v2801_v7 = vadd.f32 %v2799_v60, %v2796_v21  ;;  %2808 = vst [vmem:[#allocation3] sm:$0x1] %v2807_v3  ;;  %v2814_v23 = vadd.f32 %v2812_v0, %v2809_v28 }
 0x2e5   : > { %2802 = vst [vmem:[#allocation3 + $0x1] sm:$0x3f] %v2801_v7  ;;  %2815 = vst [vmem:[#allocation3 + $0x7] sm:$0x1] %v2814_v23 }
 0x2ea   : > { %v2893_v30 = vld [vmem:[#allocation3] sm:$0x1] }
 0x2eb   : > { %v2897_v20 = vadd.f32 %v2896_v6, %v2893_v30 }
 0x2ec   : > { %v2886_v58 = vld [vmem:[#allocation3 + $0x1] sm:$0x3f]  ;;  %v2899_v57 = vld [vmem:[#allocation3 + $0x7] sm:$0x1] }
 0x2ed   : > { %v2891_v29 = vadd.f32 %v2889_v45, %v2886_v58  ;;  %2898 = vst [vmem:[#allocation3] sm:$0x1] %v2897_v20  ;;  %v2904_v18 = vadd.f32 %v2902_v36, %v2899_v57 }
 0x2ef   : > { %2892 = vst [vmem:[#allocation3 + $0x1] sm:$0x3f] %v2891_v29  ;;  %2905 = vst [vmem:[#allocation3 + $0x7] sm:$0x1] %v2904_v18 }
 0x2f4   : > { %v2988_v63 = vld [vmem:[#allocation3] sm:$0x1] }
 0x2f5   : > { %v2990_v41 = vadd.f32 %v2989_v11, %v2988_v63 }
 0x2f6   : > { %v2978_v33 = vld [vmem:[#allocation3 + $0x1] sm:$0x3f]  ;;  %v2992_v32 = vld [vmem:[#allocation3 + $0x7] sm:$0x1] }
 0x2f7   : > { %v2986_v2 = vadd.f32 %v2984_v24, %v2978_v33  ;;  %2991 = vst [vmem:[#allocation3] sm:$0x1] %v2990_v41  ;;  %v2999_v15 = vadd.f32 %v2997_v39, %v2992_v32 }
 0x2f9   : > { %2987 = vst [vmem:[#allocation3 + $0x1] sm:$0x3f] %v2986_v2  ;;  %3000 = vst [vmem:[#allocation3 + $0x7] sm:$0x1] %v2999_v15 }
 0x2fe   : > { %v3078_v14 = vld [vmem:[#allocation3] sm:$0x1] }
 0x2ff   : > { %v3082_v62 = vadd.f32 %v3081_v54, %v3078_v14 }
 0x300   : > { %v3071_v5 = vld [vmem:[#allocation3 + $0x1] sm:$0x3f]  ;;  %v3084_v25 = vld [vmem:[#allocation3 + $0x7] sm:$0x1] }
 0x301   : > { %v3076_v26 = vadd.f32 %v3074_v61, %v3071_v5  ;;  %3083 = vst [vmem:[#allocation3] sm:$0x1] %v3082_v62  ;;  %v3089_v46 = vadd.f32 %v3087_v59, %v3084_v25 }
 0x303   : > { %3077 = vst [vmem:[#allocation3 + $0x1] sm:$0x3f] %v3076_v26  ;;  %3090 = vst [vmem:[#allocation3 + $0x7] sm:$0x1] %v3089_v46 }
 0x308   : > { %v3168_v40 = vld [vmem:[#allocation3] sm:$0x1] }
 0x309   : > { %v3172_v44 = vadd.f32 %v3171_v12, %v3168_v40 }
 0x30a   : > { %v3161_v48 = vld [vmem:[#allocation3 + $0x1] sm:$0x3f]  ;;  %v3174_v52 = vld [vmem:[#allocation3 + $0x7] sm:$0x1] }
 0x30b   : > { %v3166_v56 = vadd.f32 %v3164_v35, %v3161_v48  ;;  %3173 = vst [vmem:[#allocation3] sm:$0x1] %v3172_v44  ;;  %v3179_v16 = vadd.f32 %v3177_v27, %v3174_v52 }
 0x30d   : > { %3167 = vst [vmem:[#allocation3 + $0x1] sm:$0x3f] %v3166_v56  ;;  %3180 = vst [vmem:[#allocation3 + $0x7] sm:$0x1] %v3179_v16 }
 0x30e PF: > { %p4314_p1 = scmp.ne.s32.totalorder %s4950_s27, 2 }
 0x30f   : > { %v4979_v47 = vmov (!%p4314_p1), 0.0   ;;  %vm4980_vm3 = vmmov (!%p4314_p1), 0   ;;  %v6015_v1 = vld [vmem:[#allocation9_spill] sm:$0xff] (!%p4314_p1)  ;;  %v6016_v4 = vld [vmem:[#allocation10_spill] sm:$0xff] (!%p4314_p1)  ;;  %v6017_v51 = vld [vmem:[#allocation11_spill] sm:$0xff] (!%p4314_p1) }
 0x310   : > { %3184 = sbr.rel (%p4314_p1) target bundleno = 1085 (0x43d), region = 56  ;;  %4620 = vmatprep.subr.mxu0 (!%p4314_p1), %v4979_v47  ;;  %3186 = vst [vmem:[#allocation3 + $0x18] sm:$0xff] (!%p4314_p1), %v4979_v47  ;;  %4622 = vmatprep.mubr.msk.f32.mxu0 (!%p4314_p1), %vm4980_vm3, %v4979_v47  ;;  %v6018_v8 = vld [vmem:[#allocation12_spill] sm:$0xff] (!%p4314_p1)  ;;  %v6019_v60 = vld [vmem:[#allocation13_spill] sm:$0xff] (!%p4314_p1)  ;;  %v6020_v0 = vld [vmem:[#allocation14_spill] sm:$0xff] (!%p4314_p1) }
 0x311   : > { %4621 = vmatpush3.msk.msra.mxu0 (!%p4314_p1), %vm482_vm0, %v5126_v9  ;;  %4625 = vmatprep.subr.mxu1 (!%p4314_p1), %v4979_v47  ;;  %v6021_v34 = vld [vmem:[#allocation15_spill] sm:$0xff] (!%p4314_p1)  ;;  %v6022_v3 = vld [vmem:[#allocation16_spill] sm:$0xff] (!%p4314_p1)  ;;  %v6023_v21 = vld [vmem:[#allocation18_spill] sm:$0xff] (!%p4314_p1) }
 0x312   : > { %4623 = vmatmul.mubr.msk.f32.vlgmr.msra.gmra.mrb[0].mxu0 (!%p4314_p1), %vm469_vm1, %v6015_v1  ;;  %4626 = vmatpush3.msk.msra.mxu1 (!%p4314_p1), %vm482_vm0, %v5126_v9  ;;  %v3187_v28 = vld [vmem:[#allocation2 + $0x10] sm:$0xff] (!%p4314_p1)  ;;  %v3462_v40 = vld [vmem:[#allocation2 + $0x18] sm:$0xff] (!%p4314_p1) }
 0x313   : > { %4627 = vmatprep.mubr.msk.f32.mxu1 (!%p4314_p1), %vm4980_vm3, %v4979_v47  ;;  %4630 = vmatprep.subr.mxu0 (!%p4314_p1), %v4979_v47  ;;  %v3260_v7 = vrot.slane (!%p4314_p1), %v3187_v28, 7  ;;  %v3273_v23 = vrot.slane (!%p4314_p1), %v3187_v28, 6  ;;  %v3359_v37 = vrot.slane (!%p4314_p1), %v3187_v28, 1  ;;  %v3449_v46 = vrot.slane (!%p4314_p1), %v3187_v28, 2 }
 0x314   : > { %4628 = vmatmul.mubr.msk.f32.vlgmr.msra.gmra.mrb[0].mxu1 (!%p4314_p1), %vm469_vm1, %v6016_v4  ;;  %4631 = vmatpush3.msk.msra.mxu0 (!%p4314_p1), %vm482_vm0, %v5126_v9  ;;  %v3535_v16 = vrot.slane (!%p4314_p1), %v3462_v40, 7 }
 0x315   : > { %4632 = vmatprep.mubr.msk.f32.mxu0 (!%p4314_p1), %vm4980_vm3, %v4979_v47  ;;  %4635 = vmatprep.subr.mxu1 (!%p4314_p1), %v4979_v47 }
 0x316   : > { %4633 = vmatmul.mubr.msk.f32.vlgmr.msra.gmra.mrb[2].mxu0 (!%p4314_p1), %vm469_vm1, %v6017_v51  ;;  %4636 = vmatpush3.msk.msra.mxu1 (!%p4314_p1), %vm482_vm0, %v5126_v9 }
 0x317   : > { %4637 = vmatprep.mubr.msk.f32.mxu1 %vm4980_vm3, %v4979_v47  ;;  %4640 = vmatprep.subr.mxu0 %v4979_v47  ;;  %v3268_v19 = vld [vmem:[#allocation3 + $0x18] sm:$0x1]  ;;  %v3258_v36 = vld [vmem:[#allocation3 + $0x19] sm:$0x3f]  ;;  %v3272_v30 = vld [vmem:[#allocation3 + $0x1f] sm:$0x1] }
 0x318   : > { %4638 = vmatmul.mubr.msk.f32.vlgmr.msra.gmra.mrb[2].mxu1 %vm469_vm1, %v6018_v8  ;;  %4641 = vmatpush3.msk.msra.mxu0 %vm482_vm0, %v5126_v9 }
 0x319   : > { %4642 = vmatprep.mubr.msk.f32.mxu0 %vm4980_vm3, %v4979_v47  ;;  %4645 = vmatprep.subr.mxu1 %v4979_v47 }
 0x31a   : > { %4643 = vmatmul.mubr.msk.f32.vlgmr.msra.gmra.mrb[4].mxu0 %vm469_vm1, %v6019_v60  ;;  %4646 = vmatpush3.msk.msra.mxu1 %vm482_vm0, %v5126_v9 }
 0x31b   : > { %4647 = vmatprep.mubr.msk.f32.mxu1 %vm4980_vm3, %v4979_v47  ;;  %4650 = vmatprep.subr.mxu0 %v4979_v47 }
 0x31c   : > { %4648 = vmatmul.mubr.msk.f32.vlgmr.msra.gmra.mrb[4].mxu1 %vm469_vm1, %v6020_v0  ;;  %4651 = vmatpush3.msk.msra.mxu0 %vm482_vm0, %v5126_v9 }
 0x31d   : > { %4652 = vmatprep.mubr.msk.f32.mxu0 %vm4980_vm3, %v4979_v47  ;;  %4655 = vmatprep.subr.mxu1 %v4979_v47 }
 0x31e   : > { %4653 = vmatmul.mubr.msk.f32.vlgmr.msra.gmra.mrb[6].mxu0 %vm469_vm1, %v6021_v34  ;;  %4656 = vmatpush3.msk.msra.mxu1 %vm482_vm0, %v5126_v9 }
 0x31f   : > { %4657 = vmatprep.mubr.msk.f32.mxu1 %vm4980_vm3, %v4979_v47  ;;  %4660 = vmatprep.subr.mxu0 %v4979_v47 }
 0x320   : > { %4658 = vmatmul.mubr.msk.f32.vlgmr.msra.gmra.mrb[6].mxu1 %vm469_vm1, %v6022_v3  ;;  %4661 = vmatpush3.msk.msra.mxu0 %vm482_vm0, %v5126_v9 }
 0x321   : > { %4662 = vmatprep.mubr.msk.f32.mxu0 %vm4980_vm3, %v4979_v47  ;;  %v3548_v47 = vrot.slane %v3462_v40, 6 }
 0x322   : > { %4663 = vmatmul.mubr.msk.f32.vlgmr.msra.gmra.mrb[8].mxu0 %vm469_vm1, %v6023_v21 }
 0x3e5   : > { %v3254_v43 = vpop.f32.mrb[0].mxu0 }
 0x3e6   : > { %v3262_v13 = vmul.f32 %v3260_v7, %v3254_v43  ;;  %v3269_v6 = vmul.f32 %v3254_v43, %v3187_v28  ;;  %v3275_v50 = vmul.f32 %v3273_v23, %v3254_v43  ;;  %v4624_v45 = vpop.f32.mrb[1].mxu0 }
 0x3e7   : > { %v3347_v20 = vpop.f32.mrb[0].mxu1 }
 0x3e8   : > { %v3264_v17 = vrot.slane %v3262_v13, 1  ;;  %v3270_v22 = vadd.f32 %v3269_v6, %v3268_v19  ;;  %v3277_v9 = vrot.slane %v3275_v50, 7  ;;  %v4629_v58 = vpop.f32.mrb[1].mxu1  ;;  %v3352_v24 = vmul.f32 %v3347_v20, %v3187_v28 }
 0x3e9   : > { %v3437_v57 = vpop.f32.mrb[2].mxu0  ;;  %v3365_v39 = vmul.f32 %v3347_v20, %v3260_v7  ;;  %v3361_v33 = vmul.f32 %v3359_v37, %v3347_v20  ;;  %v3634_v6 = vrot.slane %v3462_v40, 1 }
 0x3ea   : > { %v3266_v29 = vadd.f32 %v3264_v17, %v3258_v36  ;;  %3271 = vst [vmem:[#allocation3 + $0x18] sm:$0x1] %v3270_v22  ;;  %v3279_v18 = vadd.f32 %v3277_v9, %v3272_v30  ;;  %v4634_v31 = vpop.f32.mrb[3].mxu0  ;;  %v3354_v15 = vrot.slane %v3352_v24, 1  ;;  %v3442_v42 = vmul.f32 %v3437_v57, %v3359_v37  ;;  %v3737_v24 = vld [vmem:[#allocation2 + $0x20] sm:$0xff] }
 0x3eb   : > { %v3529_v11 = vpop.f32.mrb[2].mxu1  ;;  %v3367_v38 = vrot.slane %v3365_v39, 7  ;;  %v3455_v12 = vmul.f32 %v3437_v57, %v3187_v28  ;;  %v3451_v27 = vmul.f32 %v3449_v46, %v3437_v57 }
 0x3ec   : > { %3267 = vst [vmem:[#allocation3 + $0x19] sm:$0x3f] %v3266_v29  ;;  %3280 = vst [vmem:[#allocation3 + $0x1f] sm:$0x1] %v3279_v18  ;;  %v4639_v63 = vpop.f32.mrb[3].mxu1  ;;  %v3444_v44 = vrot.slane %v3442_v42, 1  ;;  %v3537_v60 = vmul.f32 %v3535_v16, %v3529_v11  ;;  %v3550_v0 = vmul.f32 %v3548_v47, %v3529_v11  ;;  %v3544_v34 = vmul.f32 %v3529_v11, %v3462_v40 }
 0x3ed   : > { %v3622_v41 = vpop.f32.mrb[4].mxu0  ;;  %v3457_v48 = vrot.slane %v3455_v12, 7  ;;  %v3724_v18 = vrot.slane %v3462_v40, 2 }
 0x3ee   : > { %v4644_v32 = vpop.f32.mrb[5].mxu0  ;;  %v3539_v3 = vrot.slane %v3537_v60, 1  ;;  %v3552_v21 = vrot.slane %v3550_v0, 7  ;;  %v3627_v50 = vmul.f32 %v3622_v41, %v3462_v40  ;;  %v3640_v45 = vmul.f32 %v3622_v41, %v3535_v16 }
 0x3ef   : > { %v5808_v2 = vpop.f32.mrb[4].mxu1  ;;  %v3636_v36 = vmul.f32 %v3634_v6, %v3622_v41  ;;  %v3810_v32 = vrot.slane %v3737_v24, 7 }
 0x3f0   : > { %v4649_v55 = vpop.f32.mrb[5].mxu1  ;;  %v3629_v30 = vrot.slane %v3627_v50, 1  ;;  %v3642_v20 = vrot.slane %v3640_v45, 7  ;;  %v3717_v37 = vmul.f32 %v5808_v2, %v3634_v6  ;;  %v3730_v31 = vmul.f32 %v5808_v2, %v3462_v40 }
 0x3f1   : > { %v3358_v49 = vld [vmem:[#allocation3 + $0x18] sm:$0x1]  ;;  %v5810_v54 = vpop.f32.mrb[6].mxu0  ;;  %v3726_v11 = vmul.f32 %v3724_v18, %v5808_v2 }
 0x3f2   : > { %v3362_v61 = vadd.f32 %v3361_v33, %v3358_v49  ;;  %v4654_v59 = vpop.f32.mrb[7].mxu0  ;;  %v3719_v39 = vrot.slane %v3717_v37, 1  ;;  %v3732_v63 = vrot.slane %v3730_v31, 7  ;;  %v3819_v2 = vmul.f32 %v5810_v54, %v3737_v24 }
 0x3f3   : > { %v3351_v14 = vld [vmem:[#allocation3 + $0x19] sm:$0x3f]  ;;  %v3364_v62 = vld [vmem:[#allocation3 + $0x1f] sm:$0x1]  ;;  %v5812_v5 = vpop.f32.mrb[6].mxu1  ;;  %v3812_v59 = vmul.f32 %v3810_v32, %v5810_v54 }
 0x3f4   : > { %v3356_v25 = vadd.f32 %v3354_v15, %v3351_v14  ;;  %3363 = vst [vmem:[#allocation3 + $0x18] sm:$0x1] %v3362_v61  ;;  %v3369_v26 = vadd.f32 %v3367_v38, %v3364_v62  ;;  %v4659_v10 = vpop.f32.mrb[7].mxu1  ;;  %v3823_v15 = vrot.slane %v3737_v24, 6  ;;  %v3902_v40 = vmul.f32 %v5812_v5, %v3737_v24 }
 0x3f5   : > { %v5814_v53 = vpop.f32.mrb[8].mxu0  ;;  %v3814_v62 = vrot.slane %v3812_v59, 1 }
 0x3f6   : > { %3357 = vst [vmem:[#allocation3 + $0x19] sm:$0x3f] %v3356_v25  ;;  %3370 = vst [vmem:[#allocation3 + $0x1f] sm:$0x1] %v3369_v26  ;;  %v4664_v35 = vpop.f32.mrb[9].mxu0  ;;  %v3825_v14 = vmul.f32 %v3823_v15, %v5810_v54  ;;  %v4005_v0 = vmul.f32 %v5814_v53, %v3737_v24 }
 0x3f8   : > { %v3827_v25 = vrot.slane %v3825_v14, 7 }
 0x3fb   : > { %v3448_v52 = vld [vmem:[#allocation3 + $0x18] sm:$0x1] }
 0x3fc   : > { %v3452_v56 = vadd.f32 %v3451_v27, %v3448_v52  ;;  %v3909_v27 = vrot.slane %v3737_v24, 1  ;;  %v3904_v52 = vrot.slane %v3902_v40, 1 }
 0x3fd   : > { %v3441_v1 = vld [vmem:[#allocation3 + $0x19] sm:$0x3f]  ;;  %v3454_v4 = vld [vmem:[#allocation3 + $0x1f] sm:$0x1] }
 0x3fe   : > { %v3446_v51 = vadd.f32 %v3444_v44, %v3441_v1  ;;  %3453 = vst [vmem:[#allocation3 + $0x18] sm:$0x1] %v3452_v56  ;;  %v3459_v8 = vadd.f32 %v3457_v48, %v3454_v4  ;;  %v3915_v44 = vmul.f32 %v5812_v5, %v3810_v32  ;;  %v3911_v48 = vmul.f32 %v3909_v27, %v5812_v5 }
 0x3ff   : > { %v3992_v60 = vmul.f32 %v5814_v53, %v3909_v27  ;;  %v4007_v5 = vrot.slane %v4005_v0, 7 }
 0x400   : > { %3447 = vst [vmem:[#allocation3 + $0x19] sm:$0x3f] %v3446_v51  ;;  %3460 = vst [vmem:[#allocation3 + $0x1f] sm:$0x1] %v3459_v8  ;;  %v3917_v54 = vrot.slane %v3915_v44, 7  ;;  %v3999_v8 = vrot.slane %v3737_v24, 2 }
 0x405   : > { %v3543_v28 = vld [vmem:[#allocation3 + $0x18] sm:$0x1] }
 0x406   : > { %v3545_v7 = vadd.f32 %v3544_v34, %v3543_v28  ;;  %v4001_v34 = vmul.f32 %v3999_v8, %v5814_v53 }
 0x407   : > { %v3533_v23 = vld [vmem:[#allocation3 + $0x19] sm:$0x3f]  ;;  %v3547_v43 = vld [vmem:[#allocation3 + $0x1f] sm:$0x1] }
 0x408   : > { %v3541_v19 = vadd.f32 %v3539_v3, %v3533_v23  ;;  %3546 = vst [vmem:[#allocation3 + $0x18] sm:$0x1] %v3545_v7  ;;  %v3554_v13 = vadd.f32 %v3552_v21, %v3547_v43  ;;  %v3994_v3 = vrot.slane %v3992_v60, 1 }
 0x40a   : > { %3542 = vst [vmem:[#allocation3 + $0x19] sm:$0x3f] %v3541_v19  ;;  %3555 = vst [vmem:[#allocation3 + $0x1f] sm:$0x1] %v3554_v13 }
 0x40f   : > { %v3633_v17 = vld [vmem:[#allocation3 + $0x18] sm:$0x1] }
 0x410   : > { %v3637_v22 = vadd.f32 %v3636_v36, %v3633_v17 }
 0x411   : > { %v3626_v9 = vld [vmem:[#allocation3 + $0x19] sm:$0x3f]  ;;  %v3639_v58 = vld [vmem:[#allocation3 + $0x1f] sm:$0x1] }
 0x412   : > { %v3631_v57 = vadd.f32 %v3629_v30, %v3626_v9  ;;  %3638 = vst [vmem:[#allocation3 + $0x18] sm:$0x1] %v3637_v22  ;;  %v3644_v29 = vadd.f32 %v3642_v20, %v3639_v58 }
 0x414   : > { %3632 = vst [vmem:[#allocation3 + $0x19] sm:$0x3f] %v3631_v57  ;;  %3645 = vst [vmem:[#allocation3 + $0x1f] sm:$0x1] %v3644_v29 }
 0x419   : > { %v3723_v41 = vld [vmem:[#allocation3 + $0x18] sm:$0x1] }
 0x41a   : > { %v3727_v33 = vadd.f32 %v3726_v11, %v3723_v41 }
 0x41b   : > { %v3716_v38 = vld [vmem:[#allocation3 + $0x19] sm:$0x3f]  ;;  %v3729_v55 = vld [vmem:[#allocation3 + $0x1f] sm:$0x1] }
 0x41c   : > { %v3721_v49 = vadd.f32 %v3719_v39, %v3716_v38  ;;  %3728 = vst [vmem:[#allocation3 + $0x18] sm:$0x1] %v3727_v33  ;;  %v3734_v61 = vadd.f32 %v3732_v63, %v3729_v55 }
 0x41e   : > { %3722 = vst [vmem:[#allocation3 + $0x19] sm:$0x3f] %v3721_v49  ;;  %3735 = vst [vmem:[#allocation3 + $0x1f] sm:$0x1] %v3734_v61 }
 0x423   : > { %v3818_v26 = vld [vmem:[#allocation3 + $0x18] sm:$0x1] }
 0x424   : > { %v3820_v46 = vadd.f32 %v3819_v2, %v3818_v26 }
 0x425   : > { %v3808_v10 = vld [vmem:[#allocation3 + $0x19] sm:$0x3f]  ;;  %v3822_v42 = vld [vmem:[#allocation3 + $0x1f] sm:$0x1] }
 0x426   : > { %v3816_v12 = vadd.f32 %v3814_v62, %v3808_v10  ;;  %3821 = vst [vmem:[#allocation3 + $0x18] sm:$0x1] %v3820_v46  ;;  %v3829_v35 = vadd.f32 %v3827_v25, %v3822_v42 }
 0x428   : > { %3817 = vst [vmem:[#allocation3 + $0x19] sm:$0x3f] %v3816_v12  ;;  %3830 = vst [vmem:[#allocation3 + $0x1f] sm:$0x1] %v3829_v35 }
 0x42d   : > { %v3908_v56 = vld [vmem:[#allocation3 + $0x18] sm:$0x1] }
 0x42e   : > { %v3912_v16 = vadd.f32 %v3911_v48, %v3908_v56 }
 0x42f   : > { %v3901_v47 = vld [vmem:[#allocation3 + $0x19] sm:$0x3f]  ;;  %v3914_v1 = vld [vmem:[#allocation3 + $0x1f] sm:$0x1] }
 0x430   : > { %v3906_v4 = vadd.f32 %v3904_v52, %v3901_v47  ;;  %3913 = vst [vmem:[#allocation3 + $0x18] sm:$0x1] %v3912_v16  ;;  %v3919_v51 = vadd.f32 %v3917_v54, %v3914_v1 }
 0x432   : > { %3907 = vst [vmem:[#allocation3 + $0x19] sm:$0x3f] %v3906_v4  ;;  %3920 = vst [vmem:[#allocation3 + $0x1f] sm:$0x1] %v3919_v51 }
 0x437   : > { %v3998_v21 = vld [vmem:[#allocation3 + $0x18] sm:$0x1] }
 0x438   : > { %v4002_v28 = vadd.f32 %v4001_v34, %v3998_v21 }
 0x439   : > { %v3991_v7 = vld [vmem:[#allocation3 + $0x19] sm:$0x3f]  ;;  %v4004_v23 = vld [vmem:[#allocation3 + $0x1f] sm:$0x1] }
 0x43a   : > { %v3996_v43 = vadd.f32 %v3994_v3, %v3991_v7  ;;  %4003 = vst [vmem:[#allocation3 + $0x18] sm:$0x1] %v4002_v28  ;;  %v4009_v19 = vadd.f32 %v4007_v5, %v4004_v23 }
 0x43c   : > { %3997 = vst [vmem:[#allocation3 + $0x19] sm:$0x3f] %v3996_v43  ;;  %4010 = vst [vmem:[#allocation3 + $0x1f] sm:$0x1] %v4009_v19 }
 0x43d PF: > { %v4015_v13 = vld [vmem:[%s5951_s4] sm:$0xff]  ;;  %v4016_v53 = vld [vmem:[%s5951_s4 + $0x8] sm:$0xff]  ;;  %v4017_v6 = vld [vmem:[%s5951_s4 + $0x10] sm:$0xff]  ;;  %s4785_s13 = smul.u32 12, %s4954_s28  ;;  %s4143_s23 = sshll.u32 %s5694_s16, 4  ;;  %s5887_s23 = int_to_ptr.vmem [resolvable:$true] %s4143_s23 }
 0x43e   : > { %v4735_v50 = vpack.c.bf16 %v4016_v53, %v4015_v13  ;;  %v4018_v45 = vld [vmem:[%s5951_s4 + $0x18] sm:$0xff]  ;;  %v4019_v30 = vld [vmem:[%s5951_s4 + $0x20] sm:$0xff]  ;;  %v4020_v20 = vld [vmem:[%s5951_s4 + $0x28] sm:$0xff]  ;;  %s6024_s27 = sand.u32 1, %s4942_s25   ;;  %s4872_s17 = scalar_lea.vmem %s5887_s23, 512 }
 0x43f   : > { %v4739_v36 = vpack.c.bf16 %v4018_v45, %v4017_v6  ;;  %v4743_v17 = vpack.c.bf16 %v4020_v20, %v4019_v30  ;;  %v4011_v22 = vld [vmem:[#allocation3] sm:$0xff]  ;;  %v4013_v9 = vld [vmem:[#allocation3 + $0x10] sm:$0xff]  ;;  %v4022_v57 = vld [vmem:[%s5951_s4 + $0x38] sm:$0xff]  ;;  %s4140_s6 = sadd.s32 %s4785_s13, %s5096_s20  ;;  %s5895_s11 = scalar_lea.sflag [#allocation5], %s6024_s27 }
 0x440   : > { %4736 = vmatprep.subr.bf16.mxu0 %v4735_v50  ;;  %4767 = vmatprep.subr.bf16.mxu1 %v4735_v50  ;;  %v4021_v58 = vld [vmem:[%s5951_s4 + $0x30] sm:$0xff]  ;;  %v4023_v18 = vld [vmem:[%s5951_s4 + $0x40] sm:$0xff]  ;;  %v4024_v37 = vld [vmem:[%s5951_s4 + $0x48] sm:$0xff]  ;;  %s4336_s22 = sshll.u32 %s4140_s6, 7  ;;  %p4873_p2 = scmp.ne.s32.totalorder %s5887_s23, %s4872_s17 }
 0x441   : > { %4738 = vmatpush3.bf16.msra.mxu0 %v4735_v50  ;;  %4775 = vmatpush3.bf16.msra.mxu1 %v4735_v50  ;;  %v4747_v29 = vpack.c.bf16 %v4022_v57, %v4021_v58  ;;  %v4751_v31 = vpack.c.bf16 %v4024_v37, %v4023_v18  ;;  %v4025_v11 = vld [vmem:[%s5951_s4 + $0x50] sm:$0xff]  ;;  %v4026_v24 = vld [vmem:[%s5951_s4 + $0x58] sm:$0xff]  ;;  %v4027_v63 = vld [vmem:[%s5951_s4 + $0x60] sm:$0xff]  ;;  %s5885_s20 = scalar_lea.hbm %s5954_s7, %s4336_s22  ;;  %s4981_s21 = smov [#allocation4]  }
 0x442   : > { %4740 = vmatprep.subr.bf16.mxu0 %v4739_v36  ;;  %4768 = vmatprep.subr.bf16.mxu1 %v4739_v36  ;;  %v4755_v39 = vpack.c.bf16 %v4026_v24, %v4025_v11  ;;  %v4028_v41 = vld [vmem:[%s5951_s4 + $0x68] sm:$0xff]  ;;  %v4029_v32 = vld [vmem:[%s5951_s4 + $0x70] sm:$0xff]  ;;  %v4030_v15 = vld [vmem:[%s5951_s4 + $0x78] sm:$0xff]  ;;  %p4874_p4 = pnand %p4873_p2, %p5075_p3  ;;  %s4876_s18 = sshll.u32 %s4981_s21, 4  ;;  %s4877_s18 = int_to_ptr.vmem [resolvable:$false] %s4876_s18 }
 0x443   : > { %4697 = vmatprep.mubr.f32.mxu0 %v4011_v22  ;;  %4700 = vmatprep.mubr.f32.mxu1 %v4013_v9  ;;  %v4759_v33 = vpack.c.bf16 %v4028_v41, %v4027_v63  ;;  %v4763_v38 = vpack.c.bf16 %v4030_v15, %v4029_v32  ;;  %v4012_v55 = vld [vmem:[#allocation3 + $0x8] sm:$0xff]  ;;  %v4014_v49 = vld [vmem:[#allocation3 + $0x18] sm:$0xff]  ;;  %v4333_v61 = vld [vmem:[%s5952_s5] ss:$0 sm:$0xff]  ;;  %s4878_s0 = scalar_lea.vmem %s4877_s18, 1024  ;;  %p4879_p6 = scmp.lt.s32.totalorder %s5887_s23, %s4877_s18 }
 0x444   : > { %p4875_p5 = pneg %p4874_p4  ;;  %p4880_p7 = scmp.lt.s32.totalorder %s4878_s0, %s4872_s17 }
 0x445   : > { %4742 = vmatpush3.bf16.msra.mxu0 %v4739_v36  ;;  %4776 = vmatpush3.bf16.msra.mxu1 %v4739_v36 }
 0x446   : > { %4744 = vmatprep.subr.bf16.mxu0 %v4743_v17  ;;  %4769 = vmatprep.subr.bf16.mxu1 %v4743_v17  ;;  %p4881_p9 = por %p4880_p7, %p4879_p6 }
 0x448   : > { %p4882_p10 = pnand %p4881_p9, %p4875_p5 }
 0x449   : > { %4746 = vmatpush3.bf16.msra.mxu0 %v4743_v17  ;;  %4777 = vmatpush3.bf16.msra.mxu1 %v4743_v17 }
 0x44a   : > { %4748 = vmatprep.subr.bf16.mxu0 %v4747_v29  ;;  %4770 = vmatprep.subr.bf16.mxu1 %v4747_v29 }
 0x44d   : > { %4750 = vmatpush3.bf16.msra.mxu0 %v4747_v29  ;;  %4778 = vmatpush3.bf16.msra.mxu1 %v4747_v29 }
 0x44e   : > { %4752 = vmatprep.subr.bf16.mxu0 %v4751_v31  ;;  %4771 = vmatprep.subr.bf16.mxu1 %v4751_v31 }
 0x451   : > { %4754 = vmatpush3.bf16.msra.mxu0 %v4751_v31  ;;  %4779 = vmatpush3.bf16.msra.mxu1 %v4751_v31 }
 0x452   : > { %4756 = vmatprep.subr.bf16.mxu0 %v4755_v39  ;;  %4772 = vmatprep.subr.bf16.mxu1 %v4755_v39 }
 0x455   : > { %4758 = vmatpush3.bf16.msra.mxu0 %v4755_v39  ;;  %4780 = vmatpush3.bf16.msra.mxu1 %v4755_v39 }
 0x456   : > { %4760 = vmatprep.subr.bf16.mxu0 %v4759_v33  ;;  %4773 = vmatprep.subr.bf16.mxu1 %v4759_v33 }
 0x459   : > { %4762 = vmatpush3.bf16.msra.mxu0 %v4759_v33  ;;  %4781 = vmatpush3.bf16.msra.mxu1 %v4759_v33 }
 0x45a   : > { %4764 = vmatprep.subr.bf16.mxu0 %v4763_v38  ;;  %4774 = vmatprep.subr.bf16.mxu1 %v4763_v38 }
 0x45d   : > { %4766 = vmatpush3.bf16.msra.mxu0 %v4763_v38  ;;  %4782 = vmatpush3.bf16.msra.mxu1 %v4763_v38 }
 0x460   : > { %4698 = vmatmul.mubr.f32.vlgmr.msra.gmra.mrb[0].mxu0 %v4012_v55  ;;  %4701 = vmatmul.mubr.f32.vlgmr.msra.gmra.mrb[0].mxu1 %v4014_v49 }
 0x533   : > { %v4699_v59 = vpop.f32.mrb[0].mxu0  ;;  %v4702_v14 = vpop.f32.mrb[0].mxu1 }
 0x534   : > { %v4110_v2 = vadd.f32 %v4699_v59, %v4333_v61  ;;  %v4120_v62 = vadd.f32 %v4702_v14, %v4333_v61  ;;  %v4104_v25 = vpop.f32.mrb[1].mxu0  ;;  %v4114_v26 = vpop.f32.mrb[1].mxu1 }
 0x535   : > { %v4105_v46 = vadd.f32 %v4333_v61, %v4104_v25  ;;  %v4115_v10 = vadd.f32 %v4333_v61, %v4114_v26 }
 0x536   : > { %4124 = vst [vmem:[%s5694_s16 + $0x8] sm:$0xff] %v4110_v2  ;;  %4126 = vst [vmem:[%s5694_s16 + $0x18] sm:$0xff] %v4120_v62 }
 0x537   : > { %4123 = vst [vmem:[%s5694_s16] sm:$0xff] %v4105_v46  ;;  %4125 = vst [vmem:[%s5694_s16 + $0x10] sm:$0xff] %v4115_v10 }
 0x538   : > { %4885 = shalt.err (!%p4882_p10)
}
 0x539   : > { %s4886_s16 = scalar_lea.hbm %s5885_s20, 512  ;;  %s4890_s12 = scalar_lea.hbm %s5954_s7, 3072 }
 0x53a   : > { %p4887_p11 = scmp.ne.s32.totalorder %s5885_s20, %s4886_s16  ;;  %p4891_p0 = scmp.lt.u32.totalorder %s5885_s20, %s5954_s7 }
 0x53b   : > { %p4892_p1 = scmp.lt.u32.totalorder %s4890_s12, %s4886_s16  ;;  %p4894_p4 = scmp.lt.u32.totalorder %s4886_s16, %s5885_s20 }
 0x53c   : > { %p4888_p12 = pnand %p4887_p11, %p5075_p3 }
 0x53d   : > { %p4893_p2 = por %p4892_p1, %p4891_p0 }
 0x53e   : > { %p4889_p13 = pneg %p4888_p12 }
 0x53f   : > { %p4895_p5 = por %p4894_p4, %p4893_p2 }
 0x541   : > { %p4896_p6 = pnand %p4895_p5, %p4889_p13 }
 0x543   : > { %4899 = shalt.err (!%p4896_p6)
}
 0x544   : > { %s4982_s9 = smov 128   ;;  %s4983_s28 = smov 8  }
 0x545   : > { %4786 = dma.vmem_to_hbm [thread:$0]  (%p5075_p3), %s5887_s23, 512, %s5885_s20, %s5895_s11, %s4982_s9, %s4982_s9, %s4983_s28  }
 0x546 PF: > { %p4792_p7 = scmp.ge.s32.totalorder %s4966_s8, 2  ;;  %s4158_s27 = sand.u32 1, %s4938_s24  }
 0x547   : > { %s4159_s17 = scalar_lea.sflag [#allocation5], %s4158_s27 }
 0x548   : > { %p4789_p9 = pnand %p4792_p7, %p5084_p8 }
 0x54a   : > { %4933 = dma.done.wait (!%p4789_p9), %s4159_s17, 512  }
 0x54b   : > { %4935 = vsyncadd (!%p4789_p9), %s4159_s17, 4294966784  ;;  %s20_s8 = sadd.s32 1, %s4966_s8   ;;  %s6025_s14 = sld [smem:[#allocation7_spill]] }
 0x54c   : > { %p17_p10 = scmp.ge.s32.totalorder %s20_s8, 8   ;;  %s6026_s23 = sld [smem:[#allocation8_spill]] }
 0x54d   : > { %s6027_s24 = smov %s4942_s25  ;;  %s6028_s25 = smov %s4946_s26 }
 0x54e   : > { %s6029_s26 = smov %s5093_s19  ;;  %s6030_s27 = smov %s4958_s29 }
 0x54f   : > { %s6031_s28 = smov %s4962_s30  ;;  %19 = sbr.rel (!%p17_p10) target bundleno = 8 (0x8), region = 101 }
 0x551   : > { %s6032_s29 = smov %s6025_s14 }
 0x552   : > { %s6033_s30 = smov %s6026_s23 }
 0x556   :  { %4164 = vsyncpa [#allocation5], 1 }
 0x557   :  { %4166 = vsyncpa [#allocation5 + $0x1], 1 }

</bundles_post_ra>
